<compile_context>
chip_gen: v7x
topology: tpu7x:2x2x1
jax: 0.10.0
libtpu: 0.0.40
codegen_flags: <defaults>
</compile_context>

<pallas_src>
import functools

import jax
import jax.numpy as jnp
from jax import lax
from jax.experimental import pallas as pl
from jax.experimental.pallas import tpu as pltpu


def _basic_block_kernel(x_ref, w1_ref, w2_ref, b1_ref, b2_ref, out_ref,
                        pad_ref, patch_ref, *, H, W, C):
    """One batch element per grid step (NHWC, Cin == Cout == C).

    x_ref     : (1, H, W, C)      f32   unpadded input block (also the identity)
    w1_ref    : (9*C, C)          bf16  conv1 weight, BN1 scale folded in
    w2_ref    : (9*C, C)          bf16  conv2 weight, BN2 scale folded in
    b1_ref    : (1, C)            f32   folded BN1 bias
    b2_ref    : (1, C)            f32   folded BN2 bias
    out_ref   : (1, H, W, C)      f32   output block
    pad_ref   : (H+2, W+2, C)     bf16  VMEM scratch with a 1-px zero halo
    patch_ref : (H*W, 9*C)        bf16  VMEM scratch, im2col patch (K = 9*C)
    """
    bf16 = jnp.bfloat16

    # --- zero ONLY the halo; the interior is fully overwritten below.
    # Invariant: the halo is never written anywhere else in this kernel.
    pad_ref[0:1, :, :] = jnp.zeros((1, W + 2, C), bf16)
    pad_ref[H + 1:H + 2, :, :] = jnp.zeros((1, W + 2, C), bf16)
    pad_ref[:, 0:1, :] = jnp.zeros((H + 2, 1, C), bf16)
    pad_ref[:, W + 1:W + 2, :] = jnp.zeros((H + 2, 1, C), bf16)

    def im2col_into_patch(src):
        # src: (H+2, W+2, C) value; lay the 9 shifted taps side by side along
        # the channel axis so each conv is ONE matmul with K = 9*C.  The
        # reshape only collapses the leading (H, W) dims; channels stay minor.
        for dy in range(3):
            for dx in range(3):
                t = dy * 3 + dx
                patch_ref[:, t * C:(t + 1) * C] = (
                    src[dy:dy + H, dx:dx + W, :].reshape(H * W, C))

    # ---- conv1 (3x3, s=1, p=1) + bn1 (scale pre-folded, bias here) + relu ----
    pad_ref[1:H + 1, 1:W + 1, :] = x_ref[0].astype(bf16)
    im2col_into_patch(pad_ref[...])
    acc1 = jnp.dot(patch_ref[...], w1_ref[...],
                   preferred_element_type=jnp.float32)          # (H*W, C) f32
    out1 = jnp.maximum(acc1 + b1_ref[...], 0.0)

    # ---- conv2 (3x3, s=1, p=1) + bn2 ----
    pad_ref[1:H + 1, 1:W + 1, :] = out1.reshape(H, W, C).astype(bf16)
    im2col_into_patch(pad_ref[...])
    acc2 = jnp.dot(patch_ref[...], w2_ref[...],
                   preferred_element_type=jnp.float32)          # (H*W, C) f32
    out2 = acc2 + b2_ref[...]

    # ---- residual add (downsample=None => identity = x, exact f32) + relu ----
    identity = x_ref[0].reshape(H * W, C)
    out = jnp.maximum(out2 + identity, 0.0)
    out_ref[0] = out.reshape(H, W, C)


def basic_block_forward(x_nchw, w1, w2, bn1, bn2, eps=1e-5):
    """x_nchw: (N, Cin, H, W) float32.  w1: (Cout, Cin, 3, 3), w2: (Cout, Cout, 3, 3).
    bn1/bn2: dict with gamma, beta, mean, var of shape (Cout,).
    Returns (N, Cout, H, W) float32.  stride=1, downsample=None (Cin == Cout)."""
    N, Cin, H, W = x_nchw.shape
    Cout = w1.shape[0]
    assert Cin == Cout, "BasicBlock with downsample=None requires Cin == Cout"
    C = Cout

    # --- glue: layout + parameter folding (plain JAX) ---
    # NCHW -> NHWC (channels on lanes).  Kept in f32 so the kernel gets the
    # exact identity for the residual and no extra HBM cast pass is needed.
    x_nhwc = jnp.transpose(x_nchw, (0, 2, 3, 1))

    def fold(bn, w_oihw):
        scale = (bn["gamma"] / jnp.sqrt(bn["var"] + eps)).astype(jnp.float32)
        bias = (bn["beta"] - bn["mean"] * scale).astype(jnp.float32)
        # OIHW -> HWIO, fold the per-output-channel BN scale into the weight,
        # then merge the 3x3 taps into the contraction dim: (3,3,C,C)->(9C,C).
        w_hwio = jnp.transpose(w_oihw, (2, 3, 1, 0)).astype(jnp.float32)
        w_mat = (w_hwio * scale).reshape(9 * C, C).astype(jnp.bfloat16)
        return w_mat, bias.reshape(1, C)

    w1_mat, b1 = fold(bn1, w1)
    w2_mat, b2 = fold(bn2, w2)

    kernel = functools.partial(_basic_block_kernel, H=H, W=W, C=C)

    out_nhwc = pl.pallas_call(
        kernel,
        out_shape=jax.ShapeDtypeStruct((N, H, W, C), jnp.float32),
        grid_spec=pltpu.PrefetchScalarGridSpec(
            num_scalar_prefetch=0,
            grid=(N,),
            in_specs=[
                pl.BlockSpec((1, H, W, C), lambda n: (n, 0, 0, 0)),   # x (unpadded, f32)
                pl.BlockSpec((9 * C, C), lambda n: (0, 0)),           # w1 (folded)
                pl.BlockSpec((9 * C, C), lambda n: (0, 0)),           # w2 (folded)
                pl.BlockSpec((1, C), lambda n: (0, 0)),               # b1
                pl.BlockSpec((1, C), lambda n: (0, 0)),               # b2
            ],
            out_specs=pl.BlockSpec((1, H, W, C), lambda n: (n, 0, 0, 0)),
            scratch_shapes=[
                pltpu.VMEM((H + 2, W + 2, C), jnp.bfloat16),  # padded activation
                pltpu.VMEM((H * W, 9 * C), jnp.bfloat16),     # im2col patch
            ],
        ),
        compiler_params=pltpu.CompilerParams(
            dimension_semantics=("parallel",),
            # Tiny footprint at these shapes; re-derive for real ResNet layers
            # (v7x has 64 MiB VMEM per TensorCore).
            vmem_limit_bytes=32 * 1024 * 1024,
        ),
    )(x_nhwc, w1_mat, w2_mat, b1, b2)

    return jnp.transpose(out_nhwc, (0, 3, 1, 2))


def _reference_forward(x_nchw, w1, w2, bn1, bn2, eps=1e-5):
    """Pure-JAX f32 reference (eval-mode BN), NCHW, matching PyTorch semantics."""
    def conv(x, w):
        return lax.conv_general_dilated(
            x, w, window_strides=(1, 1), padding=((1, 1), (1, 1)),
            dimension_numbers=("NCHW", "OIHW", "NCHW"))

    def bn(x, p):
        scale = (p["gamma"] / jnp.sqrt(p["var"] + eps)).reshape(1, -1, 1, 1)
        bias = (p["beta"] - p["mean"] * p["gamma"] / jnp.sqrt(p["var"] + eps)
                ).reshape(1, -1, 1, 1)
        return x * scale + bias

    out = jnp.maximum(bn(conv(x_nchw, w1), bn1), 0.0)
    out = bn(conv(out, w2), bn2)
    return jnp.maximum(out + x_nchw, 0.0)


if __name__ == "__main__":
    # Small shapes consistent with the module: inplanes = planes = 4,
    # stride = 1, downsample = None.
    N, C, H, W = 2, 4, 16, 16

    key = jax.random.PRNGKey(0)
    k_x, k_w1, k_w2, k_g1, k_b1, k_g2, k_b2, k_m1, k_v1, k_m2, k_v2 = \
        jax.random.split(key, 11)

    x = jax.random.normal(k_x, (N, C, H, W), dtype=jnp.float32)
    w1 = jax.random.normal(k_w1, (C, C, 3, 3), dtype=jnp.float32) * 0.1
    w2 = jax.random.normal(k_w2, (C, C, 3, 3), dtype=jnp.float32) * 0.1
    bn1 = dict(gamma=1.0 + 0.1 * jax.random.normal(k_g1, (C,), jnp.float32),
               beta=0.1 * jax.random.normal(k_b1, (C,), jnp.float32),
               mean=0.1 * jax.random.normal(k_m1, (C,), jnp.float32),
               var=jnp.abs(jax.random.normal(k_v1, (C,), jnp.float32)) + 0.5)
    bn2 = dict(gamma=1.0 + 0.1 * jax.random.normal(k_g2, (C,), jnp.float32),
               beta=0.1 * jax.random.normal(k_b2, (C,), jnp.float32),
               mean=0.1 * jax.random.normal(k_m2, (C,), jnp.float32),
               var=jnp.abs(jax.random.normal(k_v2, (C,), jnp.float32)) + 0.5)

    out = basic_block_forward(x, w1, w2, bn1, bn2)
    out = jax.block_until_ready(out)

    ref = jax.block_until_ready(_reference_forward(x, w1, w2, bn1, bn2))
    assert out.shape == (N, C, H, W)
    # bf16 MXU conv inputs (f32 accumulation, f32 residual) vs an all-f32
    # reference -> bf16-level tolerance.
    assert jnp.allclose(out, ref, atol=3e-2, rtol=3e-2), \
        f"max abs err {jnp.max(jnp.abs(out - ref))}"

    print("KERNEL_OK")
</pallas_src>

<mosaic_0001>
module attributes {stable_mosaic.version = 11 : i64} {
  func.func @_basic_block_kernel(%arg0: i32, %arg1: memref<1x16x16x4xf32, #tpu.memory_space<vmem>>, %arg2: memref<36x4xbf16, #tpu.memory_space<vmem>>, %arg3: memref<36x4xbf16, #tpu.memory_space<vmem>>, %arg4: memref<1x4xf32, #tpu.memory_space<vmem>>, %arg5: memref<1x4xf32, #tpu.memory_space<vmem>>, %arg6: memref<1x16x16x4xf32, #tpu.memory_space<vmem>>, %arg7: memref<18x18x4xbf16, #tpu.memory_space<vmem>>, %arg8: memref<256x36xbf16, #tpu.memory_space<vmem>>) attributes {dimension_semantics = [#tpu.dimension_semantics<parallel>], iteration_bounds = array<i64: 2>, scalar_prefetch = 0 : i64, scratch_operands = 2 : i64, tpu.core_type = #tpu.core_type<tc>, window_params = [{transform_indices = @transform_0, window_bounds = array<i64: 1, 16, 16, 4>}, {pipeline_mode = #tpu.pipeline_mode<synchronous>, transform_indices = @transform_1, window_bounds = array<i64: 36, 4>}, {pipeline_mode = #tpu.pipeline_mode<synchronous>, transform_indices = @transform_2, window_bounds = array<i64: 36, 4>}, {pipeline_mode = #tpu.pipeline_mode<synchronous>, transform_indices = @transform_3, window_bounds = array<i64: 1, 4>}, {pipeline_mode = #tpu.pipeline_mode<synchronous>, transform_indices = @transform_4, window_bounds = array<i64: 1, 4>}, {transform_indices = @transform_5, window_bounds = array<i64: 1, 16, 16, 4>}]} {
    %cst = arith.constant 0.000000e+00 : bf16
    %0 = vector.broadcast %cst : bf16 to vector<1x18x4xbf16>
    %c0 = arith.constant 0 : index
    %c0_0 = arith.constant 0 : index
    %c0_1 = arith.constant 0 : index
    %1 = vector.load %arg7[%c0, %c0_0, %c0_1] : memref<18x18x4xbf16, #tpu.memory_space<vmem>>, vector<1x18x4xbf16>
    tpu.vector_store %arg7[%c0, %c0_0, %c0_1], %0 {strides = array<i32>} : memref<18x18x4xbf16, #tpu.memory_space<vmem>>, vector<1x18x4xbf16>,
    %cst_2 = arith.constant 0.000000e+00 : bf16
    %2 = vector.broadcast %cst_2 : bf16 to vector<1x18x4xbf16>
    %c17 = arith.constant 17 : index
    %c0_3 = arith.constant 0 : index
    %c0_4 = arith.constant 0 : index
    %3 = vector.load %arg7[%c17, %c0_3, %c0_4] : memref<18x18x4xbf16, #tpu.memory_space<vmem>>, vector<1x18x4xbf16>
    tpu.vector_store %arg7[%c17, %c0_3, %c0_4], %2 {strides = array<i32>} : memref<18x18x4xbf16, #tpu.memory_space<vmem>>, vector<1x18x4xbf16>,
    %cst_5 = arith.constant 0.000000e+00 : bf16
    %4 = vector.broadcast %cst_5 : bf16 to vector<18x1x4xbf16>
    %c0_6 = arith.constant 0 : index
    %c0_7 = arith.constant 0 : index
    %c0_8 = arith.constant 0 : index
    %5 = vector.load %arg7[%c0_6, %c0_7, %c0_8] : memref<18x18x4xbf16, #tpu.memory_space<vmem>>, vector<18x1x4xbf16>
    tpu.vector_store %arg7[%c0_6, %c0_7, %c0_8], %4 {strides = array<i32>} : memref<18x18x4xbf16, #tpu.memory_space<vmem>>, vector<18x1x4xbf16>,
    %cst_9 = arith.constant 0.000000e+00 : bf16
    %6 = vector.broadcast %cst_9 : bf16 to vector<18x1x4xbf16>
    %c0_10 = arith.constant 0 : index
    %c17_11 = arith.constant 17 : index
    %c0_12 = arith.constant 0 : index
    %7 = vector.load %arg7[%c0_10, %c17_11, %c0_12] : memref<18x18x4xbf16, #tpu.memory_space<vmem>>, vector<18x1x4xbf16>
    tpu.vector_store %arg7[%c0_10, %c17_11, %c0_12], %6 {strides = array<i32>} : memref<18x18x4xbf16, #tpu.memory_space<vmem>>, vector<18x1x4xbf16>,
    %c0_13 = arith.constant 0 : index
    %c0_14 = arith.constant 0 : index
    %c0_15 = arith.constant 0 : index
    %c0_16 = arith.constant 0 : index
    %8 = vector.load %arg1[%c0_13, %c0_14, %c0_15, %c0_16] : memref<1x16x16x4xf32, #tpu.memory_space<vmem>>, vector<1x16x16x4xf32>
    %9 = vector.shape_cast %8 : vector<1x16x16x4xf32> to vector<16x16x4xf32>
    %10 = arith.truncf %9 : vector<16x16x4xf32> to vector<16x16x4xbf16>
    %c1 = arith.constant 1 : index
    %c1_17 = arith.constant 1 : index
    %c0_18 = arith.constant 0 : index
    %11 = vector.load %arg7[%c1, %c1_17, %c0_18] : memref<18x18x4xbf16, #tpu.memory_space<vmem>>, vector<16x16x4xbf16>
    tpu.vector_store %arg7[%c1, %c1_17, %c0_18], %10 {strides = array<i32>} : memref<18x18x4xbf16, #tpu.memory_space<vmem>>, vector<16x16x4xbf16>,
    %c0_19 = arith.constant 0 : index
    %c0_20 = arith.constant 0 : index
    %c0_21 = arith.constant 0 : index
    %12 = vector.load %arg7[%c0_19, %c0_20, %c0_21] : memref<18x18x4xbf16, #tpu.memory_space<vmem>>, vector<18x18x4xbf16>
    %13 = vector.extract_strided_slice %12 {offsets = [0, 0, 0], sizes = [16, 16, 4], strides = [1, 1, 1]} : vector<18x18x4xbf16> to vector<16x16x4xbf16>
    %14 = vector.shape_cast %13 : vector<16x16x4xbf16> to vector<256x4xbf16>
    %c0_22 = arith.constant 0 : index
    %c0_23 = arith.constant 0 : index
    %15 = vector.load %arg8[%c0_22, %c0_23] : memref<256x36xbf16, #tpu.memory_space<vmem>>, vector<256x4xbf16>
    tpu.vector_store %arg8[%c0_22, %c0_23], %14 {strides = array<i32>} : memref<256x36xbf16, #tpu.memory_space<vmem>>, vector<256x4xbf16>,
    %16 = vector.extract_strided_slice %12 {offsets = [0, 1, 0], sizes = [16, 16, 4], strides = [1, 1, 1]} : vector<18x18x4xbf16> to vector<16x16x4xbf16>
    %17 = vector.shape_cast %16 : vector<16x16x4xbf16> to vector<256x4xbf16>
    %c0_24 = arith.constant 0 : index
    %c4 = arith.constant 4 : index
    %18 = vector.load %arg8[%c0_24, %c4] : memref<256x36xbf16, #tpu.memory_space<vmem>>, vector<256x4xbf16>
    tpu.vector_store %arg8[%c0_24, %c4], %17 {strides = array<i32>} : memref<256x36xbf16, #tpu.memory_space<vmem>>, vector<256x4xbf16>,
    %19 = vector.extract_strided_slice %12 {offsets = [0, 2, 0], sizes = [16, 16, 4], strides = [1, 1, 1]} : vector<18x18x4xbf16> to vector<16x16x4xbf16>
    %20 = vector.shape_cast %19 : vector<16x16x4xbf16> to vector<256x4xbf16>
    %c0_25 = arith.constant 0 : index
    %c8 = arith.constant 8 : index
    %21 = vector.load %arg8[%c0_25, %c8] : memref<256x36xbf16, #tpu.memory_space<vmem>>, vector<256x4xbf16>
    tpu.vector_store %arg8[%c0_25, %c8], %20 {strides = array<i32>} : memref<256x36xbf16, #tpu.memory_space<vmem>>, vector<256x4xbf16>,
    %22 = vector.extract_strided_slice %12 {offsets = [1, 0, 0], sizes = [16, 16, 4], strides = [1, 1, 1]} : vector<18x18x4xbf16> to vector<16x16x4xbf16>
    %23 = vector.shape_cast %22 : vector<16x16x4xbf16> to vector<256x4xbf16>
    %c0_26 = arith.constant 0 : index
    %c12 = arith.constant 12 : index
    %24 = vector.load %arg8[%c0_26, %c12] : memref<256x36xbf16, #tpu.memory_space<vmem>>, vector<256x4xbf16>
    tpu.vector_store %arg8[%c0_26, %c12], %23 {strides = array<i32>} : memref<256x36xbf16, #tpu.memory_space<vmem>>, vector<256x4xbf16>,
    %25 = vector.extract_strided_slice %12 {offsets = [1, 1, 0], sizes = [16, 16, 4], strides = [1, 1, 1]} : vector<18x18x4xbf16> to vector<16x16x4xbf16>
    %26 = vector.shape_cast %25 : vector<16x16x4xbf16> to vector<256x4xbf16>
    %c0_27 = arith.constant 0 : index
    %c16 = arith.constant 16 : index
    %27 = vector.load %arg8[%c0_27, %c16] : memref<256x36xbf16, #tpu.memory_space<vmem>>, vector<256x4xbf16>
    tpu.vector_store %arg8[%c0_27, %c16], %26 {strides = array<i32>} : memref<256x36xbf16, #tpu.memory_space<vmem>>, vector<256x4xbf16>,
    %28 = vector.extract_strided_slice %12 {offsets = [1, 2, 0], sizes = [16, 16, 4], strides = [1, 1, 1]} : vector<18x18x4xbf16> to vector<16x16x4xbf16>
    %29 = vector.shape_cast %28 : vector<16x16x4xbf16> to vector<256x4xbf16>
    %c0_28 = arith.constant 0 : index
    %c20 = arith.constant 20 : index
    %30 = vector.load %arg8[%c0_28, %c20] : memref<256x36xbf16, #tpu.memory_space<vmem>>, vector<256x4xbf16>
    tpu.vector_store %arg8[%c0_28, %c20], %29 {strides = array<i32>} : memref<256x36xbf16, #tpu.memory_space<vmem>>, vector<256x4xbf16>,
    %31 = vector.extract_strided_slice %12 {offsets = [2, 0, 0], sizes = [16, 16, 4], strides = [1, 1, 1]} : vector<18x18x4xbf16> to vector<16x16x4xbf16>
    %32 = vector.shape_cast %31 : vector<16x16x4xbf16> to vector<256x4xbf16>
    %c0_29 = arith.constant 0 : index
    %c24 = arith.constant 24 : index
    %33 = vector.load %arg8[%c0_29, %c24] : memref<256x36xbf16, #tpu.memory_space<vmem>>, vector<256x4xbf16>
    tpu.vector_store %arg8[%c0_29, %c24], %32 {strides = array<i32>} : memref<256x36xbf16, #tpu.memory_space<vmem>>, vector<256x4xbf16>,
    %34 = vector.extract_strided_slice %12 {offsets = [2, 1, 0], sizes = [16, 16, 4], strides = [1, 1, 1]} : vector<18x18x4xbf16> to vector<16x16x4xbf16>
    %35 = vector.shape_cast %34 : vector<16x16x4xbf16> to vector<256x4xbf16>
    %c0_30 = arith.constant 0 : index
    %c28 = arith.constant 28 : index
    %36 = vector.load %arg8[%c0_30, %c28] : memref<256x36xbf16, #tpu.memory_space<vmem>>, vector<256x4xbf16>
    tpu.vector_store %arg8[%c0_30, %c28], %35 {strides = array<i32>} : memref<256x36xbf16, #tpu.memory_space<vmem>>, vector<256x4xbf16>,
    %37 = vector.extract_strided_slice %12 {offsets = [2, 2, 0], sizes = [16, 16, 4], strides = [1, 1, 1]} : vector<18x18x4xbf16> to vector<16x16x4xbf16>
    %38 = vector.shape_cast %37 : vector<16x16x4xbf16> to vector<256x4xbf16>
    %c0_31 = arith.constant 0 : index
    %c32 = arith.constant 32 : index
    %39 = vector.load %arg8[%c0_31, %c32] : memref<256x36xbf16, #tpu.memory_space<vmem>>, vector<256x4xbf16>
    tpu.vector_store %arg8[%c0_31, %c32], %38 {strides = array<i32>} : memref<256x36xbf16, #tpu.memory_space<vmem>>, vector<256x4xbf16>,
    %c0_32 = arith.constant 0 : index
    %c0_33 = arith.constant 0 : index
    %40 = vector.load %arg8[%c0_32, %c0_33] : memref<256x36xbf16, #tpu.memory_space<vmem>>, vector<256x36xbf16>
    %c0_34 = arith.constant 0 : index
    %c0_35 = arith.constant 0 : index
    %41 = vector.load %arg2[%c0_34, %c0_35] : memref<36x4xbf16, #tpu.memory_space<vmem>>, vector<36x4xbf16>
    %cst_36 = arith.constant dense<0.000000e+00> : vector<256x4xf32>
    %42 = tpu.matmul %40, %41, %cst_36 {dimension_numbers = #tpu.dot_dimension_numbers<[1], [0], [0], [1], [0, 0, 1, 1], [], []>} : vector<256x36xbf16>, vector<36x4xbf16>, vector<256x4xf32> -> vector<256x4xf32>
    %c0_37 = arith.constant 0 : index
    %c0_38 = arith.constant 0 : index
    %43 = vector.load %arg4[%c0_37, %c0_38] : memref<1x4xf32, #tpu.memory_space<vmem>>, vector<1x4xf32>
    %44 = vector.broadcast %43 : vector<1x4xf32> to vector<256x4xf32>
    %45 = arith.addf %42, %44 : vector<256x4xf32>
    %cst_39 = arith.constant 0.000000e+00 : f32
    %46 = vector.broadcast %cst_39 : f32 to vector<256x4xf32>
    %47 = arith.maximumf %45, %46 : vector<256x4xf32>
    %48 = vector.shape_cast %47 : vector<256x4xf32> to vector<16x16x4xf32>
    %49 = arith.truncf %48 : vector<16x16x4xf32> to vector<16x16x4xbf16>
    %c1_40 = arith.constant 1 : index
    %c1_41 = arith.constant 1 : index
    %c0_42 = arith.constant 0 : index
    %50 = vector.load %arg7[%c1_40, %c1_41, %c0_42] : memref<18x18x4xbf16, #tpu.memory_space<vmem>>, vector<16x16x4xbf16>
    tpu.vector_store %arg7[%c1_40, %c1_41, %c0_42], %49 {strides = array<i32>} : memref<18x18x4xbf16, #tpu.memory_space<vmem>>, vector<16x16x4xbf16>,
    %c0_43 = arith.constant 0 : index
    %c0_44 = arith.constant 0 : index
    %c0_45 = arith.constant 0 : index
    %51 = vector.load %arg7[%c0_43, %c0_44, %c0_45] : memref<18x18x4xbf16, #tpu.memory_space<vmem>>, vector<18x18x4xbf16>
    %52 = vector.extract_strided_slice %51 {offsets = [0, 0, 0], sizes = [16, 16, 4], strides = [1, 1, 1]} : vector<18x18x4xbf16> to vector<16x16x4xbf16>
    %53 = vector.shape_cast %52 : vector<16x16x4xbf16> to vector<256x4xbf16>
    %c0_46 = arith.constant 0 : index
    %c0_47 = arith.constant 0 : index
    %54 = vector.load %arg8[%c0_46, %c0_47] : memref<256x36xbf16, #tpu.memory_space<vmem>>, vector<256x4xbf16>
    tpu.vector_store %arg8[%c0_46, %c0_47], %53 {strides = array<i32>} : memref<256x36xbf16, #tpu.memory_space<vmem>>, vector<256x4xbf16>,
    %55 = vector.extract_strided_slice %51 {offsets = [0, 1, 0], sizes = [16, 16, 4], strides = [1, 1, 1]} : vector<18x18x4xbf16> to vector<16x16x4xbf16>
    %56 = vector.shape_cast %55 : vector<16x16x4xbf16> to vector<256x4xbf16>
    %c0_48 = arith.constant 0 : index
    %c4_49 = arith.constant 4 : index
    %57 = vector.load %arg8[%c0_48, %c4_49] : memref<256x36xbf16, #tpu.memory_space<vmem>>, vector<256x4xbf16>
    tpu.vector_store %arg8[%c0_48, %c4_49], %56 {strides = array<i32>} : memref<256x36xbf16, #tpu.memory_space<vmem>>, vector<256x4xbf16>,
    %58 = vector.extract_strided_slice %51 {offsets = [0, 2, 0], sizes = [16, 16, 4], strides = [1, 1, 1]} : vector<18x18x4xbf16> to vector<16x16x4xbf16>
    %59 = vector.shape_cast %58 : vector<16x16x4xbf16> to vector<256x4xbf16>
    %c0_50 = arith.constant 0 : index
    %c8_51 = arith.constant 8 : index
    %60 = vector.load %arg8[%c0_50, %c8_51] : memref<256x36xbf16, #tpu.memory_space<vmem>>, vector<256x4xbf16>
    tpu.vector_store %arg8[%c0_50, %c8_51], %59 {strides = array<i32>} : memref<256x36xbf16, #tpu.memory_space<vmem>>, vector<256x4xbf16>,
    %61 = vector.extract_strided_slice %51 {offsets = [1, 0, 0], sizes = [16, 16, 4], strides = [1, 1, 1]} : vector<18x18x4xbf16> to vector<16x16x4xbf16>
    %62 = vector.shape_cast %61 : vector<16x16x4xbf16> to vector<256x4xbf16>
    %c0_52 = arith.constant 0 : index
    %c12_53 = arith.constant 12 : index
    %63 = vector.load %arg8[%c0_52, %c12_53] : memref<256x36xbf16, #tpu.memory_space<vmem>>, vector<256x4xbf16>
    tpu.vector_store %arg8[%c0_52, %c12_53], %62 {strides = array<i32>} : memref<256x36xbf16, #tpu.memory_space<vmem>>, vector<256x4xbf16>,
    %64 = vector.extract_strided_slice %51 {offsets = [1, 1, 0], sizes = [16, 16, 4], strides = [1, 1, 1]} : vector<18x18x4xbf16> to vector<16x16x4xbf16>
    %65 = vector.shape_cast %64 : vector<16x16x4xbf16> to vector<256x4xbf16>
    %c0_54 = arith.constant 0 : index
    %c16_55 = arith.constant 16 : index
    %66 = vector.load %arg8[%c0_54, %c16_55] : memref<256x36xbf16, #tpu.memory_space<vmem>>, vector<256x4xbf16>
    tpu.vector_store %arg8[%c0_54, %c16_55], %65 {strides = array<i32>} : memref<256x36xbf16, #tpu.memory_space<vmem>>, vector<256x4xbf16>,
    %67 = vector.extract_strided_slice %51 {offsets = [1, 2, 0], sizes = [16, 16, 4], strides = [1, 1, 1]} : vector<18x18x4xbf16> to vector<16x16x4xbf16>
    %68 = vector.shape_cast %67 : vector<16x16x4xbf16> to vector<256x4xbf16>
    %c0_56 = arith.constant 0 : index
    %c20_57 = arith.constant 20 : index
    %69 = vector.load %arg8[%c0_56, %c20_57] : memref<256x36xbf16, #tpu.memory_space<vmem>>, vector<256x4xbf16>
    tpu.vector_store %arg8[%c0_56, %c20_57], %68 {strides = array<i32>} : memref<256x36xbf16, #tpu.memory_space<vmem>>, vector<256x4xbf16>,
    %70 = vector.extract_strided_slice %51 {offsets = [2, 0, 0], sizes = [16, 16, 4], strides = [1, 1, 1]} : vector<18x18x4xbf16> to vector<16x16x4xbf16>
    %71 = vector.shape_cast %70 : vector<16x16x4xbf16> to vector<256x4xbf16>
    %c0_58 = arith.constant 0 : index
    %c24_59 = arith.constant 24 : index
    %72 = vector.load %arg8[%c0_58, %c24_59] : memref<256x36xbf16, #tpu.memory_space<vmem>>, vector<256x4xbf16>
    tpu.vector_store %arg8[%c0_58, %c24_59], %71 {strides = array<i32>} : memref<256x36xbf16, #tpu.memory_space<vmem>>, vector<256x4xbf16>,
    %73 = vector.extract_strided_slice %51 {offsets = [2, 1, 0], sizes = [16, 16, 4], strides = [1, 1, 1]} : vector<18x18x4xbf16> to vector<16x16x4xbf16>
    %74 = vector.shape_cast %73 : vector<16x16x4xbf16> to vector<256x4xbf16>
    %c0_60 = arith.constant 0 : index
    %c28_61 = arith.constant 28 : index
    %75 = vector.load %arg8[%c0_60, %c28_61] : memref<256x36xbf16, #tpu.memory_space<vmem>>, vector<256x4xbf16>
    tpu.vector_store %arg8[%c0_60, %c28_61], %74 {strides = array<i32>} : memref<256x36xbf16, #tpu.memory_space<vmem>>, vector<256x4xbf16>,
    %76 = vector.extract_strided_slice %51 {offsets = [2, 2, 0], sizes = [16, 16, 4], strides = [1, 1, 1]} : vector<18x18x4xbf16> to vector<16x16x4xbf16>
    %77 = vector.shape_cast %76 : vector<16x16x4xbf16> to vector<256x4xbf16>
    %c0_62 = arith.constant 0 : index
    %c32_63 = arith.constant 32 : index
    %78 = vector.load %arg8[%c0_62, %c32_63] : memref<256x36xbf16, #tpu.memory_space<vmem>>, vector<256x4xbf16>
    tpu.vector_store %arg8[%c0_62, %c32_63], %77 {strides = array<i32>} : memref<256x36xbf16, #tpu.memory_space<vmem>>, vector<256x4xbf16>,
    %c0_64 = arith.constant 0 : index
    %c0_65 = arith.constant 0 : index
    %79 = vector.load %arg8[%c0_64, %c0_65] : memref<256x36xbf16, #tpu.memory_space<vmem>>, vector<256x36xbf16>
    %c0_66 = arith.constant 0 : index
    %c0_67 = arith.constant 0 : index
    %80 = vector.load %arg3[%c0_66, %c0_67] : memref<36x4xbf16, #tpu.memory_space<vmem>>, vector<36x4xbf16>
    %cst_68 = arith.constant dense<0.000000e+00> : vector<256x4xf32>
    %81 = tpu.matmul %79, %80, %cst_68 {dimension_numbers = #tpu.dot_dimension_numbers<[1], [0], [0], [1], [0, 0, 1, 1], [], []>} : vector<256x36xbf16>, vector<36x4xbf16>, vector<256x4xf32> -> vector<256x4xf32>
    %c0_69 = arith.constant 0 : index
    %c0_70 = arith.constant 0 : index
    %82 = vector.load %arg5[%c0_69, %c0_70] : memref<1x4xf32, #tpu.memory_space<vmem>>, vector<1x4xf32>
    %83 = vector.broadcast %82 : vector<1x4xf32> to vector<256x4xf32>
    %84 = arith.addf %81, %83 : vector<256x4xf32>
    %c0_71 = arith.constant 0 : index
    %c0_72 = arith.constant 0 : index
    %c0_73 = arith.constant 0 : index
    %c0_74 = arith.constant 0 : index
    %85 = vector.load %arg1[%c0_71, %c0_72, %c0_73, %c0_74] : memref<1x16x16x4xf32, #tpu.memory_space<vmem>>, vector<1x16x16x4xf32>
    %86 = vector.shape_cast %85 : vector<1x16x16x4xf32> to vector<16x16x4xf32>
    %87 = vector.shape_cast %86 : vector<16x16x4xf32> to vector<256x4xf32>
    %88 = arith.addf %84, %87 : vector<256x4xf32>
    %cst_75 = arith.constant 0.000000e+00 : f32
    %89 = vector.broadcast %cst_75 : f32 to vector<256x4xf32>
    %90 = arith.maximumf %88, %89 : vector<256x4xf32>
    %91 = vector.shape_cast %90 : vector<256x4xf32> to vector<16x16x4xf32>
    %c0_76 = arith.constant 0 : index
    %c0_77 = arith.constant 0 : index
    %c0_78 = arith.constant 0 : index
    %c0_79 = arith.constant 0 : index
    %92 = vector.load %arg6[%c0_76, %c0_77, %c0_78, %c0_79] : memref<1x16x16x4xf32, #tpu.memory_space<vmem>>, vector<1x16x16x4xf32>
    %93 = vector.shape_cast %92 : vector<1x16x16x4xf32> to vector<16x16x4xf32>
    %94 = vector.shape_cast %91 : vector<16x16x4xf32> to vector<1x16x16x4xf32>
    tpu.vector_store %arg6[%c0_76, %c0_77, %c0_78, %c0_79], %94 {strides = array<i32>} : memref<1x16x16x4xf32, #tpu.memory_space<vmem>>, vector<1x16x16x4xf32>,
    return
  }
  func.func @transform_0(%arg0: i32) -> (i32, i32, i32, i32) {
    %c0_i32 = arith.constant 0 : i32
    %c0_i32_0 = arith.constant 0 : i32
    %c0_i32_1 = arith.constant 0 : i32
    %c0_i32_2 = arith.constant 0 : i32
    return %arg0, %c0_i32, %c0_i32_0, %c0_i32_1 : i32, i32, i32, i32
  }
  func.func @transform_1(%arg0: i32) -> (i32, i32) {
    %c0_i32 = arith.constant 0 : i32
    %c0_i32_0 = arith.constant 0 : i32
    %c0_i32_1 = arith.constant 0 : i32
    return %c0_i32, %c0_i32_0 : i32, i32
  }
  func.func @transform_2(%arg0: i32) -> (i32, i32) {
    %c0_i32 = arith.constant 0 : i32
    %c0_i32_0 = arith.constant 0 : i32
    %c0_i32_1 = arith.constant 0 : i32
    return %c0_i32, %c0_i32_0 : i32, i32
  }
  func.func @transform_3(%arg0: i32) -> (i32, i32) {
    %c0_i32 = arith.constant 0 : i32
    %c0_i32_0 = arith.constant 0 : i32
    %c0_i32_1 = arith.constant 0 : i32
    return %c0_i32, %c0_i32_0 : i32, i32
  }
  func.func @transform_4(%arg0: i32) -> (i32, i32) {
    %c0_i32 = arith.constant 0 : i32
    %c0_i32_0 = arith.constant 0 : i32
    %c0_i32_1 = arith.constant 0 : i32
    return %c0_i32, %c0_i32_0 : i32, i32
  }
  func.func @transform_5(%arg0: i32) -> (i32, i32, i32, i32) {
    %c0_i32 = arith.constant 0 : i32
    %c0_i32_0 = arith.constant 0 : i32
    %c0_i32_1 = arith.constant 0 : i32
    %c0_i32_2 = arith.constant 0 : i32
    return %arg0, %c0_i32, %c0_i32_0, %c0_i32_1 : i32, i32, i32, i32
  }
}

</mosaic_0001>

<bundles_post_ra>
// kernel: tpu_custom_call.1
= control target key start
LH: loop header
LB: loop body
LE: loop exit
PB: predicated region body
PF: predicated region fallthrough
CT: control target
= control target key end

     0   :  { %s5472_s18 = smov 0   ;;  %s8021_s0 = inlined_call_operand.vmem [shape: f32[2,16,16,4], index: 0, kind: input, shape index: {}]   ;;  %s8022_s1 = inlined_call_operand.vmem [shape: bf16[36,4], index: 1, kind: input, shape index: {}]   ;;  %s8023_s2 = inlined_call_operand.vmem [shape: bf16[36,4], index: 2, kind: input, shape index: {}]   ;;  %s8024_s3 = inlined_call_operand.vmem [shape: f32[1,4], index: 3, kind: input, shape index: {}]   ;;  %s8025_s4 = inlined_call_operand.vmem [shape: f32[1,4], index: 4, kind: input, shape index: {}]   ;;  %s8026_s5 = inlined_call_operand.vmem [shape: f32[2,16,16,4], index: 5, kind: output, shape index: {}]  }
   0x1 LB: > { %s4927_s19 = sadd.s32 4294967295, %s5431_s18   ;;  %p4931_p0 = scmp.ge.s32.totalorder %s5431_s18, 1  ;;  %s5431_s18 = sphi %s5472_s18, %s15_s18  }
   0x2   : > { %p187_p1 = scmp.lt.s32.totalorder %s5431_s18, 3 }
   0x4   : > { %p188_p2 = pnand %p4931_p0, %p187_p1 }
   0x5   : > { %p215_p3 = scmp.lt.s32.totalorder (!%p188_p2), %s4927_s19, 1  ;;  %vm226_vm0 = vcmask (!%p188_p2), 27648   ;;  %vm229_vm1 = vcmask (!%p188_p2), 24576   ;;  %vm236_vm2 = vsmask.f32 (!%p188_p2), 256  ;;  %v5433_v3 = vmov (!%p188_p2), 0  }
   0x6   : > { %191 = sbr.rel (%p188_p2) target bundleno = 1054 (0x41e), region = 40  ;;  %vm5482_vm3 = vmand (!%p188_p2), %vm229_vm1, %vm236_vm2  ;;  %v241_v1 = vld [vmem:[#allocation2 + $0xc] sm:$0x1] (!%p188_p2)  ;;  %vm292_vm4 = vsmask.f32 (!%p188_p2), 7938  ;;  %vm1596_vm7 = vcmask (!%p188_p2), 1042432  }
   0x7   : > { %v242_v2 = vsel (!%p188_p2), %vm5482_vm3, 0, %v241_v1  ;;  %227 = vst.msk [vmem:[#allocation2] sm:$0xf] (!%p188_p2), %vm226_vm0, %v5433_v3  ;;  %228 = vst.msk [vmem:[#allocation2 + $0x4] sm:$0xf] (!%p188_p2), %vm226_vm0, %v5433_v3  ;;  %vm1597_vm8 = vcmask (!%p188_p2), 1046532  }
   0x8   : > { %243 = vst [vmem:[#allocation2 + $0xc] sm:$0x1] (!%p188_p2), %v242_v2  ;;  %230 = vst.msk [vmem:[#allocation2 + $0x8] sm:$0x1] (!%p188_p2), %vm229_vm1, %v5433_v3  ;;  %v244_v4 = vld [vmem:[#allocation2 + $0x18] sm:$0x1] (!%p188_p2) }
   0x9   : > { %232 = vst.msk [vmem:[#allocation2 + $0xcc] sm:$0xf] (!%p188_p2), %vm226_vm0, %v5433_v3  ;;  %233 = vst.msk [vmem:[#allocation2 + $0xd0] sm:$0xf] (!%p188_p2), %vm226_vm0, %v5433_v3  ;;  %v245_v5 = vsel (!%p188_p2), %vm5482_vm3, 0, %v244_v4  ;;  %vm1063_vm13 = vcmask (!%p188_p2), 31744  }
   0xa   : > { %234 = vst.msk [vmem:[#allocation2 + $0xd4] sm:$0x1] (!%p188_p2), %vm229_vm1, %v5433_v3  ;;  %vm5508_vm5 = vmand (!%p188_p2), %vm229_vm1, %vm292_vm4  ;;  %v247_v7 = vld [vmem:[#allocation2 + $0x24] sm:$0x1] (!%p188_p2)  ;;  %v297_v8 = vld [vmem:[#allocation2 + $0x14] sm:$0x1] (!%p188_p2) }
   0xb   : > { %246 = vst [vmem:[#allocation2 + $0x18] sm:$0x1] (!%p188_p2), %v245_v5  ;;  %v248_v12 = vsel (!%p188_p2), %vm5482_vm3, 0, %v247_v7  ;;  %v298_v13 = vsel (!%p188_p2), %vm5508_vm5, 0, %v297_v8  ;;  %vm476_vm6 = vsmask.f32 (!%p188_p2), 4368  ;;  %vm5540_vm12 = vmand (!%p188_p2), %vm226_vm0, %vm292_vm4 }
   0xc   : > { %249 = vst [vmem:[#allocation2 + $0x24] sm:$0x1] (!%p188_p2), %v248_v12  ;;  %299 = vst [vmem:[#allocation2 + $0x14] sm:$0x1] (!%p188_p2), %v298_v13  ;;  %vm1080_vm9 = vsmask.f32 (!%p188_p2), 3328 }
   0xd   : > { %s8074_s19 = smov (!%p215_p3, %s4927_s19), 1  ;;  %vm1081_vm10 = vsmask.f32 7440  ;;  %vm5528_vm11 = vmor %vm236_vm2, %vm476_vm6  ;;  %v300_v59 = vld [vmem:[#allocation2 + $0x20] sm:$0x1]  ;;  %s5434_s24 = smov 8  }
   0xe   : > { %s5186_s20 = sshll.u32 %s8074_s19, 8  ;;  %v238_v25 = vld [vmem:[#allocation2] sm:$0x1]  ;;  %v5536_v34 = vld [vmem:[#allocation2 + $0x4] sm:$0xf]  ;;  %vm5570_vm14 = vmor %vm1596_vm7, %vm1597_vm8  ;;  %v301_v12 = vsel %vm5508_vm5, 0, %v300_v59 }
   0xf   : > { %s5504_s23 = scalar_lea.vmem %s8021_s0, %s5186_s20  ;;  %v294_v26 = vld [vmem:[#allocation2 + $0x8] sm:$0x1]  ;;  %v239_v32 = vsel %vm5482_vm3, 0, %v238_v25  ;;  %v801_v36 = vld [vmem:[#allocation2 + $0xc] sm:$0xf]  ;;  %v1601_v37 = vrot.slane %v5536_v34, 5  ;;  %vm5584_vm15 = vmor %vm1080_vm9, %vm1081_vm10 }
  0x10   : > { %v348_v9 = vld [vmem:[%s5504_s23] sm:$0xff]  ;;  %v349_v10 = vld [vmem:[%s5504_s23 + $0x8] sm:$0xff]  ;;  %v350_v11 = vld [vmem:[%s5504_s23 + $0x10] sm:$0xff]  ;;  %v295_v33 = vsel %vm5508_vm5, 0, %v294_v26  ;;  %240 = vst [vmem:[#allocation2] sm:$0x1] %v239_v32 }
  0x11   : > { %v5188_v14 = vpack.c.bf16 %v348_v9, %v348_v9  ;;  %v5189_v15 = vpack.c.bf16 %v349_v10, %v349_v10  ;;  %v351_v16 = vld [vmem:[%s5504_s23 + $0x18] sm:$0xff]  ;;  %v352_v17 = vld [vmem:[%s5504_s23 + $0x20] sm:$0xff]  ;;  %v5190_v18 = vpack.c.bf16 %v350_v11, %v350_v11  ;;  %v353_v20 = vld [vmem:[%s5504_s23 + $0x28] sm:$0xff]  ;;  %296 = vst [vmem:[#allocation2 + $0x8] sm:$0x1] %v295_v33  ;;  %v1603_v45 = vrot.slane %v1601_v37, 4 }
  0x12   : > { %v5191_v19 = vpack.c.bf16 %v351_v16, %v351_v16  ;;  %v5522_v27 = vpack.c.bf16 %v352_v17, %v352_v17  ;;  %v5524_v28 = vpack.c.bf16 %v353_v20, %v353_v20  ;;  %v808_v51 = vld [vmem:[#allocation2 + $0x18] sm:$0xf]  ;;  %v1093_v52 = vshll.u32 %v5536_v34, 16  ;;  %302 = vst [vmem:[#allocation2 + $0x20] sm:$0x1] %v301_v12  ;;  %s5435_s25 = smov 12  }
  0x13   : > { %v479_v21 = vshrl.u32 %v5188_v14, 16  ;;  %v482_v22 = vshll.u32 %v5188_v14, 16  ;;  %v487_v23 = vshrl.u32 %v5189_v15, 16  ;;  %v490_v24 = vshll.u32 %v5189_v15, 16  ;;  %v805_v58 = vld [vmem:[#allocation2 + $0x14] sm:$0x1] }
  0x14   : > { %v496_v38 = vshrl.u32 %v5190_v18, 16  ;;  %v499_v39 = vshll.u32 %v5190_v18, 16  ;;  %v504_v40 = vshrl.u32 %v5191_v19, 16  ;;  %v507_v48 = vshll.u32 %v5191_v19, 16  ;;  %v815_v17 = vld [vmem:[#allocation2 + $0x24] sm:$0xf] }
  0x15   : > { %v481_v30 = vrot.slane %v479_v21, 7  ;;  %v489_v31 = vrot.slane %v487_v23, 7  ;;  %v1097_v53 = vshrl.u32 %v5536_v34, 16  ;;  %v5556_v60 = vrot.slane %v1093_v52, 5  ;;  %s5436_s26 = smov 24   ;;  %s5437_s27 = smov 4  }
  0x16   : > { %v498_v46 = vrot.slane %v496_v38, 7  ;;  %v5545_v47 = vrot.slane %v504_v40, 7  ;;  %v513_v62 = vshrl.u32 %v5522_v27, 16  ;;  %v516_v63 = vshll.u32 %v5522_v27, 16  ;;  %v303_v27 = vld [vmem:[#allocation2 + $0x2c] sm:$0x1] }
  0x17   : > { %v484_v41 = vor.u32 %v482_v22, %v481_v30  ;;  %v485_v42 = vrot.slane %v481_v30, 4  ;;  %v492_v43 = vor.u32 %v490_v24, %v489_v31  ;;  %v494_v44 = vrot.slane %v489_v31, 4  ;;  %v5566_v5 = vld [vmem:[#allocation2] sm:$0xf]  ;;  %s5438_s28 = smov 20   ;;  %s5439_s29 = smov 32  }
  0x18   : > { %v501_v54 = vor.u32 %v499_v39, %v498_v46  ;;  %v502_v55 = vrot.slane %v498_v46, 4  ;;  %v509_v56 = vor.u32 %v507_v48, %v5545_v47  ;;  %v511_v57 = vrot.slane %v5545_v47, 4  ;;  %v915_v7 = vld [vmem:[#allocation2 + $0x8] sm:$0x1]  ;;  %s5440_s9 = smov 16   ;;  %s5441_s10 = smov 28  }
  0x19   : > { %v493_v49 = vsel %vm5528_vm11, %v485_v42, %v492_v43  ;;  %v802_v50 = vsel %vm5540_vm12, %v484_v41, %v801_v36  ;;  %v1099_v61 = vrot.slane %v1097_v53, 4  ;;  %v521_v3 = vshrl.u32 %v5524_v28, 16 }
  0x1a   : > { %803 = vst [vmem:[#allocation2 + $0xc] sm:$0xf] %v802_v50  ;;  %804 = vst.msk [vmem:[#allocation2 + $0x10] sm:$0xf] %vm226_vm0, %v493_v49  ;;  %v510_v1 = vsel %vm5528_vm11, %v502_v55, %v509_v56  ;;  %v809_v2 = vsel %vm5540_vm12, %v501_v54, %v808_v51  ;;  %v524_v4 = vshll.u32 %v5524_v28, 16  ;;  %v515_v10 = vrot.slane %v513_v62, 7 }
  0x1b   : > { %810 = vst [vmem:[#allocation2 + $0x18] sm:$0xf] %v809_v2  ;;  %811 = vst.msk [vmem:[#allocation2 + $0x1c] sm:$0xf] %vm226_vm0, %v510_v1  ;;  %v1100_v9 = vor.u32 %v1099_v61, %v5556_v60  ;;  %v806_v11 = vsel %vm5482_vm3, %v494_v44, %v805_v58  ;;  %v1103_v13 = vshll.u32 %v915_v7, 16  ;;  %v5000_v14 = vrot.slane %v5566_v5, 9 }
  0x1c   : > { %v1604_v15 = vrot.slane %v915_v7, 5  ;;  %v1084_v16 = vshrl.u32 %v5566_v5, 16  ;;  %807 = vst [vmem:[#allocation2 + $0x14] sm:$0x1] %v806_v11  ;;  %v1087_v19 = vshll.u32 %v5566_v5, 16  ;;  %v518_v21 = vor.u32 %v516_v63, %v515_v10  ;;  %v354_v28 = vld [vmem:[%s5504_s23 + $0x30] sm:$0xff] }
  0x1d   : > { %v1101_v20 = vrot.slane %v1100_v9, 4  ;;  %v519_v22 = vrot.slane %v515_v10, 4  ;;  %v1602_v23 = vsel %vm5570_vm14, %v5000_v14, %v1601_v37  ;;  %v1105_v26 = vrot.slane %v1103_v13, 5  ;;  %v812_v58 = vld [vmem:[#allocation2 + $0x20] sm:$0x1] }
  0x1e   : > { %v1605_v24 = vsel %vm5570_vm14, %v1603_v45, %v1604_v15  ;;  %v1086_v25 = vrot.slane %v1084_v16, 4  ;;  %v1089_v33 = vrot.slane %v1087_v19, 5  ;;  %v5598_v36 = vrot.slane %v521_v3, 7 }
  0x1f   : > { %v5016_v32 = vcombine.low %v1602_v23, %v1605_v24  ;;  %v816_v38 = vsel %vm5540_vm12, %v518_v21, %v815_v17  ;;  %v1106_v39 = vsel %vm5584_vm15, %v1101_v20, %v1105_v26  ;;  %v304_v45 = vsel %vm5508_vm5, 0, %v303_v27 }
  0x20   : > { %817 = vst [vmem:[#allocation2 + $0x24] sm:$0xf] %v816_v38  ;;  %v1090_v42 = vor.u32 %v1089_v33, %v1086_v25  ;;  %v526_v43 = vor.u32 %v524_v4, %v5598_v36  ;;  %v528_v44 = vrot.slane %v5598_v36, 4  ;;  %305 = vst [vmem:[#allocation2 + $0x2c] sm:$0x1] %v304_v45  ;;  %v5618_v52 = vpack.c.bf16 %v354_v28, %v354_v28 }
  0x21   : > { %v5594_v30 = vld [vmem:[#allocation2 + $0xc] sm:$0xf]  ;;  %v5596_v31 = vld [vmem:[#allocation2 + $0x10] sm:$0xf]  ;;  %1759 = vrot.lane.b32.xlu1 %v5016_v32, %s5434_s24  ;;  %v813_v62 = vsel %vm5482_vm3, %v511_v57, %v812_v58  ;;  %v355_v58 = vld [vmem:[%s5504_s23 + $0x38] sm:$0xff]  ;;  %vm8027_vm1 = vcmask 1041408  }
  0x22   : > { %v4969_v37 = vcombine.low %v5594_v30, %v5596_v31  ;;  %v5001_v40 = vrot.slane %v5594_v30, 9  ;;  %v1608_v41 = vrot.slane %v5596_v31, 5  ;;  %v919_v46 = vld [vmem:[#allocation2 + $0x18] sm:$0xf]  ;;  %v920_v48 = vld [vmem:[#allocation2 + $0x1c] sm:$0xf]  ;;  %v527_v55 = vsel %vm5528_vm11, %v519_v22, %v526_v43 }
  0x23   : > { %v1108_v51 = vshrl.u32 %v5594_v30, 16  ;;  %v4970_v53 = vcombine.low %v919_v46, %v920_v48  ;;  %v1091_v54 = vrot.slane %v1090_v42, 4  ;;  %v918_v56 = vld [vmem:[#allocation2 + $0x14] sm:$0x1]  ;;  %v5002_v59 = vrot.slane %v919_v46, 9 }
  0x24   : > { %1829 = vrot.lane.b32.xlu0 %v4969_v37, %s5435_s25  ;;  %1065 = vst.msk [vmem:[#allocation3 + $0x8] sm:$0xff] %vm1063_vm13, %v4969_v37  ;;  %v1609_v49 = vsel %vm5570_vm14, %v5001_v40, %v1608_v41  ;;  %v1610_v50 = vrot.slane %v1608_v41, 4  ;;  %v1611_v61 = vrot.slane %v918_v56, 5  ;;  %v1615_v63 = vrot.slane %v920_v48, 5  ;;  %814 = vst [vmem:[#allocation2 + $0x20] sm:$0x1] %v813_v62 }
  0x25   : > { %818 = vst.msk [vmem:[#allocation2 + $0x28] sm:$0xf] %vm226_vm0, %v527_v55  ;;  %v1132_v1 = vshrl.u32 %v919_v46, 16  ;;  %1831 = vrot.lane.b32.xlu1 %v4970_v53, %s5435_s25  ;;  %v1096_v2 = vsel %vm5584_vm15, %v1091_v54, %v5556_v60  ;;  %v1135_v3 = vshll.u32 %v919_v46, 16  ;;  %v1141_v4 = vshll.u32 %v920_v48, 16 }
  0x26   : > { %1066 = vst.msk [vmem:[#allocation3 + $0x10] sm:$0xff] %vm1063_vm13, %v4970_v53  ;;  %v1145_v7 = vshrl.u32 %v920_v48, 16  ;;  %v4984_v47 = vcombine.low %v1096_v2, %v1106_v39  ;;  %v1612_v57 = vsel %vm5570_vm14, %v1610_v50, %v1611_v61  ;;  %v1616_v9 = vsel %vm5570_vm14, %v5002_v59, %v1615_v63  ;;  %v250_v46 = vld [vmem:[#allocation2 + $0x30] sm:$0x1] }
  0x27   : > { %v1617_v10 = vrot.slane %v1615_v63, 4  ;;  %v922_v11 = vld [vmem:[#allocation2 + $0x24] sm:$0xf]  ;;  %v5017_v12 = vcombine.low %v1609_v49, %v1612_v57  ;;  %v1134_v13 = vrot.slane %v1132_v1, 4  ;;  %v1137_v14 = vrot.slane %v1135_v3, 5 }
  0x28   : > { %2067 = vrot.lane.b32.xlu0 %v4970_v53, %s5436_s26  ;;  %v1143_v60 = vrot.slane %v1141_v4, 5  ;;  %v5003_v15 = vrot.slane %v922_v11, 9  ;;  %v1147_v16 = vrot.slane %v1145_v7, 4  ;;  %v1110_v17 = vrot.slane %v1108_v51, 4  ;;  %v819_v20 = vld [vmem:[#allocation2 + $0x2c] sm:$0x1] }
  0x29   : > { %v1111_v19 = vshll.u32 %v5594_v30, 16  ;;  %v1138_v21 = vor.u32 %v1137_v14, %v1134_v13  ;;  %v1117_v22 = vshll.u32 %v5596_v31, 16  ;;  %v1121_v23 = vshrl.u32 %v5596_v31, 16  ;;  %v306_v7 = vld [vmem:[#allocation2 + $0x38] sm:$0x1] }
  0x2a   : > { %v1127_v24 = vshll.u32 %v918_v56, 16  ;;  %v820_v25 = vsel %vm5482_vm3, %v528_v44, %v819_v20  ;;  %v1148_v26 = vor.u32 %v1147_v16, %v1143_v60  ;;  %v1156_v28 = vshrl.u32 %v922_v11, 16  ;;  %v253_v16 = vld [vmem:[#allocation2 + $0x3c] sm:$0x1] }
  0x2b   : > { %v1113_v27 = vrot.slane %v1111_v19, 5  ;;  %821 = vst [vmem:[#allocation2 + $0x2c] sm:$0x1] %v820_v25  ;;  %v1139_v33 = vrot.slane %v1138_v21, 4  ;;  %v1119_v30 = vrot.slane %v1117_v22, 5  ;;  %v1123_v36 = vrot.slane %v1121_v23, 4 }
  0x2c   : > { %1515 = vrot.lane.b32.xlu0 %v4984_v47, %s5437_s27  ;;  %v923_v32 = vld [vmem:[#allocation2 + $0x28] sm:$0xf]  ;;  %v1129_v38 = vrot.slane %v1127_v24, 5  ;;  %v921_v39 = vld [vmem:[#allocation2 + $0x20] sm:$0x1]  ;;  %v1149_v40 = vrot.slane %v1148_v26, 4 }
  0x2d   : > { %v5643_v37 = vcombine.low %v922_v11, %v923_v32  ;;  %v1622_v31 = vrot.slane %v923_v32, 5  ;;  %v1114_v41 = vor.u32 %v1113_v27, %v1110_v17  ;;  %v1618_v42 = vrot.slane %v921_v39, 5  ;;  %v356_v21 = vld [vmem:[%s5504_s23 + $0x40] sm:$0xff]  ;;  %v357_v27 = vld [vmem:[%s5504_s23 + $0x48] sm:$0xff] }
  0x2e   : > { %v1144_v43 = vsel %vm5584_vm15, %v1139_v33, %v1143_v60  ;;  %v1151_v44 = vshll.u32 %v921_v39, 16  ;;  %v1124_v45 = vor.u32 %v1123_v36, %v1119_v30  ;;  %v1158_v51 = vrot.slane %v1156_v28, 4  ;;  %v5395_v22 = vld [vmem:[%s8022_s1] sm:$0xff]  }
  0x2f   : > { %2069 = vrot.lane.b32.xlu1 %v5643_v37, %s5436_s26  ;;  %1067 = vst.msk [vmem:[#allocation3 + $0x18] sm:$0xff] %vm1063_vm13, %v5643_v37  ;;  %v1623_v48 = vsel %vm5570_vm14, %v5003_v15, %v1622_v31  ;;  %v1624_v49 = vrot.slane %v1622_v31, 4  ;;  %v1115_v50 = vrot.slane %v1114_v41, 4  ;;  %v1619_v53 = vsel %vm5570_vm14, %v1617_v10, %v1618_v42  ;;  %5290 = vmatprep.subr.bf16.mxu0 %v5395_v22  ;;  %v309_v31 = vld [vmem:[#allocation2 + $0x44] sm:$0x1] }
  0x30   : > { %1997 = vrot.lane.b32.xlu0 %v5017_v12, %s5438_s28  ;;  %v1153_v54 = vrot.slane %v1151_v44, 5  ;;  %v1125_v55 = vrot.slane %v1124_v45, 4  ;;  %v1159_v56 = vshll.u32 %v922_v11, 16  ;;  %v5657_v59 = vcombine.low %v1616_v9, %v1619_v53  ;;  %5291 = vmatpush3.bf16.msra.mxu0 %v5395_v22  ;;  %v358_v45 = vld [vmem:[%s5504_s23 + $0x50] sm:$0xff] }
  0x31   : > { %v1120_v61 = vsel %vm5584_vm15, %v1115_v50, %v1119_v30  ;;  %v1165_v62 = vshll.u32 %v923_v32, 16  ;;  %v1169_v63 = vshrl.u32 %v923_v32, 16  ;;  %v251_v4 = vsel %vm5482_vm3, 0, %v250_v46  ;;  %v359_v46 = vld [vmem:[%s5504_s23 + $0x58] sm:$0xff] }
  0x32   : > { %v1154_v1 = vsel %vm5584_vm15, %v1149_v40, %v1153_v54  ;;  %v1130_v2 = vsel %vm5584_vm15, %v1125_v55, %v1129_v38  ;;  %v1161_v3 = vrot.slane %v1159_v56, 5  ;;  %v924_v47 = vld [vmem:[#allocation2 + $0x2c] sm:$0x1]  ;;  %252 = vst [vmem:[#allocation2 + $0x30] sm:$0x1] %v251_v4  ;;  %v5195_v15 = vpack.c.bf16 %v355_v58, %v355_v58 }
  0x33   : > { %1761 = vrot.lane.b32.xlu1 %v5017_v12, %s5434_s24  ;;  %v5670_v57 = vcombine.low %v1144_v43, %v1154_v1  ;;  %v5672_v9 = vcombine.low %v1120_v61, %v1130_v2  ;;  %v1167_v10 = vrot.slane %v1165_v62, 5  ;;  %v1171_v11 = vrot.slane %v1169_v63, 4  ;;  %v256_v40 = vld [vmem:[#allocation2 + $0x48] sm:$0x1]  ;;  %v312_v55 = vld [vmem:[#allocation2 + $0x50] sm:$0x1] }
  0x34   : > { %2235 = vrot.lane.b32.xlu0 %v5657_v59, %s5439_s29  ;;  %v1625_v13 = vrot.slane %v924_v47, 5  ;;  %v1162_v14 = vor.u32 %v1161_v3, %v1158_v51  ;;  %v1175_v60 = vshll.u32 %v924_v47, 16  ;;  %v530_v17 = vshrl.u32 %v5618_v52, 16  ;;  %v259_v63 = vld [vmem:[#allocation2 + $0x54] sm:$0x1] }
  0x35   : > { %v1172_v12 = vor.u32 %v1171_v11, %v1167_v10  ;;  %v533_v19 = vshll.u32 %v5618_v52, 16  ;;  %v307_v20 = vsel %vm5508_vm5, 0, %v306_v7  ;;  %v538_v26 = vshrl.u32 %v5195_v15, 16 }
  0x36   : > { %v1626_v23 = vsel %vm5570_vm14, %v1624_v49, %v1625_v13  ;;  %v1163_v24 = vrot.slane %v1162_v14, 4  ;;  %v1177_v25 = vrot.slane %v1175_v60, 5  ;;  %308 = vst [vmem:[#allocation2 + $0x38] sm:$0x1] %v307_v20  ;;  %v532_v32 = vrot.slane %v530_v17, 7 }
  0x37   : > { %1999 = vrot.lane.b32.xlu1 %v5657_v59, %s5438_s28  ;;  %v5687_v52 = vcombine.low %v1623_v48, %v1626_v23  ;;  %v1173_v28 = vrot.slane %v1172_v12, 4  ;;  %v541_v33 = vshll.u32 %v5195_v15, 16  ;;  %v540_v36 = vrot.slane %v538_v26, 7  ;;  %v5396_v48 = vld [vmem:[%s8022_s1 + $0x8] sm:$0xff]   ;;  %v315_v12 = vld [vmem:[#allocation2 + $0x5c] sm:$0x1] }
  0x38   : > { %v1168_v30 = vsel %vm5584_vm15, %v1163_v24, %v1167_v10  ;;  %v254_v38 = vsel %vm5482_vm3, 0, %v253_v16  ;;  %v5196_v39 = vpack.c.bf16 %v356_v21, %v356_v21  ;;  %v535_v42 = vor.u32 %v533_v19, %v532_v32  ;;  %5292 = vmatprep.subr.bf16.mxu0 %v5396_v48  ;;  %v262_v20 = vld [vmem:[#allocation2 + $0x60] sm:$0x1] }
  0x39   : > { %2237 = vrot.lane.b32.xlu0 %v5687_v52, %s5439_s29  ;;  %v1178_v41 = vsel %vm5584_vm15, %v1173_v28, %v1177_v25  ;;  %v536_v43 = vrot.slane %v532_v32, 4  ;;  %255 = vst [vmem:[#allocation2 + $0x3c] sm:$0x1] %v254_v38  ;;  %v5197_v44 = vpack.c.bf16 %v357_v27, %v357_v27  ;;  %v543_v50 = vor.u32 %v541_v33, %v540_v36  ;;  %v822_v53 = vld [vmem:[#allocation2 + $0x30] sm:$0xf]  ;;  %v360_v28 = vld [vmem:[%s5504_s23 + $0x60] sm:$0xff] }
  0x3a   : > { %v5702_v49 = vcombine.low %v1168_v30, %v1178_v41  ;;  %v545_v51 = vrot.slane %v540_v36, 4  ;;  %v547_v54 = vshrl.u32 %v5196_v39, 16  ;;  %v823_v56 = vsel %vm5540_vm12, %v535_v42, %v822_v53  ;;  %5293 = vmatpush3.bf16.msra.mxu0 %v5396_v48 }
  0x3b   : > { %1923 = vrot.lane.b32.xlu1 %v5670_v57, %s5440_s9  ;;  %v550_v58 = vshll.u32 %v5196_v39, 16  ;;  %v555_v61 = vshrl.u32 %v5197_v44, 16  ;;  %v558_v62 = vshll.u32 %v5197_v44, 16  ;;  %v544_v1 = vsel %vm5528_vm11, %v536_v43, %v543_v50  ;;  %824 = vst [vmem:[#allocation2 + $0x30] sm:$0xf] %v823_v56 }
  0x3c   : > { %v549_v2 = vrot.slane %v547_v54, 7  ;;  %v310_v3 = vsel %vm5508_vm5, 0, %v309_v31  ;;  %v257_v4 = vsel %vm5482_vm3, 0, %v256_v40  ;;  %825 = vst.msk [vmem:[#allocation2 + $0x34] sm:$0xf] %vm226_vm0, %v544_v1  ;;  %v5198_v10 = vpack.c.bf16 %v358_v45, %v358_v45 }
  0x3d   : > { %1517 = vrot.lane.b32.xlu0 %v5672_v9, %s5437_s27  ;;  %v826_v7 = vld [vmem:[#allocation2 + $0x38] sm:$0x1]  ;;  %v557_v47 = vrot.slane %v555_v61, 7  ;;  %311 = vst [vmem:[#allocation2 + $0x44] sm:$0x1] %v310_v3  ;;  %v5199_v11 = vpack.c.bf16 %v359_v46, %v359_v46  ;;  %v313_v13 = vsel %vm5508_vm5, 0, %v312_v55  ;;  %v5748_v42 = vpack.c.bf16 %v360_v28, %v360_v28 }
  0x3e   : > { %258 = vst [vmem:[#allocation2 + $0x48] sm:$0x1] %v257_v4  ;;  %v827_v14 = vsel %vm5482_vm3, %v545_v51, %v826_v7  ;;  %v552_v60 = vor.u32 %v550_v58, %v549_v2  ;;  %v553_v15 = vrot.slane %v549_v2, 4  ;;  %314 = vst [vmem:[#allocation2 + $0x50] sm:$0x1] %v313_v13  ;;  %v260_v16 = vsel %vm5482_vm3, 0, %v259_v63 }
  0x3f   : > { %2161 = vrot.lane.b32.xlu1 %v5702_v49, %s5441_s10  ;;  %828 = vst [vmem:[#allocation2 + $0x38] sm:$0x1] %v827_v14  ;;  %v560_v17 = vor.u32 %v558_v62, %v557_v47  ;;  %v564_v19 = vshrl.u32 %v5198_v10, 16  ;;  %261 = vst [vmem:[#allocation2 + $0x54] sm:$0x1] %v260_v16  ;;  %v567_v22 = vshll.u32 %v5198_v10, 16 }
  0x40   : > { %v829_v21 = vld [vmem:[#allocation2 + $0x3c] sm:$0xf]  ;;  %v572_v23 = vshrl.u32 %v5199_v11, 16  ;;  %v575_v24 = vshll.u32 %v5199_v11, 16  ;;  %v316_v32 = vsel %vm5508_vm5, 0, %v315_v12  ;;  %v562_v33 = vrot.slane %v557_v47, 4 }
  0x41   : > { %1921 = vrot.lane.b32.xlu0 %v5672_v9, %s5440_s9  ;;  %v561_v25 = vsel %vm5528_vm11, %v553_v15, %v560_v17  ;;  %v830_v26 = vsel %vm5540_vm12, %v552_v60, %v829_v21  ;;  %v566_v27 = vrot.slane %v564_v19, 7  ;;  %317 = vst [vmem:[#allocation2 + $0x5c] sm:$0x1] %v316_v32  ;;  %v263_v38 = vsel %vm5482_vm3, 0, %v262_v20  ;;  %v361_v60 = vld [vmem:[%s5504_s23 + $0x68] sm:$0xff] }
  0x42   : > { %831 = vst [vmem:[#allocation2 + $0x3c] sm:$0xf] %v830_v26  ;;  %832 = vst.msk [vmem:[#allocation2 + $0x40] sm:$0xf] %vm226_vm0, %v561_v25  ;;  %v5735_v30 = vrot.slane %v572_v23, 7  ;;  %v581_v1 = vshrl.u32 %v5748_v42, 16 }
  0x43   : > { %1519 = vrot.lane.b32.xlu1 %v5670_v57, %s5437_s27  ;;  %v5739_v9 = vld [vmem:[#allocation2 + $0x30] sm:$0xf]  ;;  %v570_v36 = vrot.slane %v566_v27, 4  ;;  %v5743_v39 = vld [vmem:[#allocation2 + $0x34] sm:$0xf]  ;;  %v569_v48 = vor.u32 %v567_v22, %v566_v27  ;;  %v5201_v27 = vpack.c.bf16 %v361_v60, %v361_v60  ;;  %vm1563_vm2 = vcmask 64544  }
  0x44   : > { %v1180_v31 = vshrl.u32 %v5739_v9, 16  ;;  %v1183_v40 = vshll.u32 %v5739_v9, 16  ;;  %v577_v41 = vor.u32 %v575_v24, %v5735_v30  ;;  %264 = vst [vmem:[#allocation2 + $0x60] sm:$0x1] %v263_v38  ;;  %v5754_v43 = vcombine.low %v5739_v9, %v5743_v39  ;;  %v833_v46 = vld [vmem:[#allocation2 + $0x44] sm:$0x1] }
  0x45   : > { %2159 = vrot.lane.b32.xlu0 %v5670_v57, %s5441_s10  ;;  %v1189_v44 = vshll.u32 %v5743_v39, 16  ;;  %v1193_v45 = vshrl.u32 %v5743_v39, 16  ;;  %v834_v54 = vsel %vm5482_vm3, %v562_v33, %v833_v46  ;;  %v836_v57 = vld [vmem:[#allocation2 + $0x48] sm:$0xf]  ;;  %v1629_v62 = vrot.slane %v5743_v39, 5 }
  0x46   : > { %v927_v50 = vld [vmem:[#allocation2 + $0x38] sm:$0x1]  ;;  %v1182_v51 = vrot.slane %v1180_v31, 4  ;;  %v1185_v53 = vrot.slane %v1183_v40, 5  ;;  %v578_v55 = vsel %vm5528_vm11, %v570_v36, %v577_v41  ;;  %1068 = vst.msk [vmem:[#allocation3 + $0x20] sm:$0xff] %vm1063_vm13, %v5754_v43  ;;  %v5004_v4 = vrot.slane %v5739_v9, 9 }
  0x47   : > { %1521 = vrot.lane.b32.xlu1 %v5702_v49, %s5437_s27  ;;  %v1191_v56 = vrot.slane %v1189_v44, 5  ;;  %v1195_v58 = vrot.slane %v1193_v45, 4  ;;  %v1199_v61 = vshll.u32 %v927_v50, 16  ;;  %835 = vst [vmem:[#allocation2 + $0x44] sm:$0x1] %v834_v54  ;;  %v837_v10 = vsel %vm5540_vm12, %v569_v48, %v836_v57  ;;  %v362_v54 = vld [vmem:[%s5504_s23 + $0x70] sm:$0xff] }
  0x48   : > { %839 = vst.msk [vmem:[#allocation2 + $0x4c] sm:$0xf] %vm226_vm0, %v578_v55  ;;  %v1186_v63 = vor.u32 %v1185_v53, %v1182_v51  ;;  %838 = vst [vmem:[#allocation2 + $0x48] sm:$0xf] %v837_v10  ;;  %v1631_v16 = vrot.slane %v1629_v62, 4  ;;  %v1632_v21 = vrot.slane %v927_v50, 5  ;;  %v1630_v38 = vsel %vm5570_vm14, %v5004_v4, %v1629_v62 }
  0x49   : > { %1763 = vrot.lane.b32.xlu0 %v5657_v59, %s5434_s24  ;;  %v1196_v2 = vor.u32 %v1195_v58, %v1191_v56  ;;  %v1201_v3 = vrot.slane %v1199_v61, 5  ;;  %v5772_v7 = vld [vmem:[#allocation2 + $0x3c] sm:$0xf]  ;;  %v5774_v47 = vld [vmem:[#allocation2 + $0x40] sm:$0xf]  ;;  %v579_v59 = vrot.slane %v5735_v30, 4 }
  0x4a   : > { %v1187_v11 = vrot.slane %v1186_v63, 4  ;;  %v5780_v13 = vcombine.low %v5772_v7, %v5774_v47  ;;  %v1204_v14 = vshrl.u32 %v5772_v7, 16  ;;  %v1207_v12 = vshll.u32 %v5772_v7, 16  ;;  %v840_v19 = vld [vmem:[#allocation2 + $0x50] sm:$0x1] }
  0x4b   : > { %1765 = vrot.lane.b32.xlu1 %v5687_v52, %s5434_s24  ;;  %v1197_v15 = vrot.slane %v1196_v2, 4  ;;  %v1213_v17 = vshll.u32 %v5774_v47, 16  ;;  %v1217_v23 = vshrl.u32 %v5774_v47, 16  ;;  %v841_v33 = vsel %vm5482_vm3, %v579_v59, %v840_v19  ;;  %v843_v53 = vld [vmem:[#allocation2 + $0x54] sm:$0xf] }
  0x4c   : > { %v1192_v20 = vsel %vm5584_vm15, %v1187_v11, %v1191_v56  ;;  %1069 = vst.msk [vmem:[#allocation3 + $0x28] sm:$0xff] %vm1063_vm13, %v5780_v13  ;;  %v1206_v22 = vrot.slane %v1204_v14, 4  ;;  %v1209_v25 = vrot.slane %v1207_v12, 5  ;;  %v583_v30 = vrot.slane %v581_v1, 7  ;;  %842 = vst [vmem:[#allocation2 + $0x50] sm:$0x1] %v841_v33 }
  0x4d   : > { %1833 = vrot.lane.b32.xlu0 %v5643_v37, %s5435_s25  ;;  %v1202_v24 = vsel %vm5584_vm15, %v1197_v15, %v1201_v3  ;;  %v5798_v26 = vrot.slane %v1213_v17, 5  ;;  %v1219_v32 = vrot.slane %v1217_v23, 4  ;;  %v584_v9 = vshll.u32 %v5748_v42, 16  ;;  %v363_v1 = vld [vmem:[%s5504_s23 + $0x78] sm:$0xff] }
  0x4e   : > { %v930_v28 = vld [vmem:[#allocation2 + $0x44] sm:$0x1]  ;;  %v5805_v36 = vcombine.low %v1192_v20, %v1202_v24  ;;  %v1210_v37 = vor.u32 %v1209_v25, %v1206_v22  ;;  %v1633_v39 = vsel %vm5570_vm14, %v1631_v16, %v1632_v21  ;;  %v1636_v41 = vrot.slane %v5774_v47, 5  ;;  %v847_v14 = vld [vmem:[#allocation2 + $0x5c] sm:$0x1] }
  0x4f   : > { %1835 = vrot.lane.b32.xlu1 %v5754_v43, %s5435_s25  ;;  %v1220_v31 = vor.u32 %v1219_v32, %v5798_v26  ;;  %v1223_v40 = vshll.u32 %v930_v28, 16  ;;  %v5815_v42 = vld [vmem:[#allocation2 + $0x48] sm:$0xf]  ;;  %v5817_v44 = vld [vmem:[#allocation2 + $0x4c] sm:$0xf]  ;;  %v589_v45 = vshrl.u32 %v5201_v27, 16  ;;  %v586_v48 = vor.u32 %v584_v9, %v583_v30 }
  0x50   : > { %v5821_v46 = vcombine.low %v5815_v42, %v5817_v44  ;;  %v5825_v50 = vcombine.low %v1630_v38, %v1633_v39  ;;  %v1211_v51 = vrot.slane %v1210_v37, 4  ;;  %v5005_v56 = vrot.slane %v5772_v7, 9  ;;  %v318_v20 = vld [vmem:[#allocation2 + $0x68] sm:$0x1]  ;;  %v265_v21 = vld [vmem:[#allocation2 + $0x6c] sm:$0x1] }
  0x51   : > { %1925 = vrot.lane.b32.xlu0 %v5702_v49, %s5440_s9  ;;  %v592_v49 = vshll.u32 %v5201_v27, 16  ;;  %v1221_v55 = vrot.slane %v1220_v31, 4  ;;  %v1225_v57 = vrot.slane %v1223_v40, 5  ;;  %v1638_v58 = vrot.slane %v1636_v41, 4  ;;  %v364_v25 = vld [vmem:[%s5504_s23 + $0x80] sm:$0xff]  ;;  %v365_v9 = vld [vmem:[%s5504_s23 + $0x88] sm:$0xff] }
  0x52   : > { %1070 = vst.msk [vmem:[#allocation3 + $0x30] sm:$0xff] %vm1063_vm13, %v5821_v46  ;;  %v1639_v61 = vrot.slane %v930_v28, 5  ;;  %v587_v62 = vrot.slane %v583_v30, 4  ;;  %v591_v63 = vrot.slane %v589_v45, 7  ;;  %v1237_v2 = vshll.u32 %v5817_v44, 16 }
  0x53   : > { %1927 = vrot.lane.b32.xlu1 %v5805_v36, %s5440_s9  ;;  %v1241_v3 = vshrl.u32 %v5817_v44, 16  ;;  %v844_v4 = vsel %vm5540_vm12, %v586_v48, %v843_v53  ;;  %v5202_v47 = vpack.c.bf16 %v362_v54, %v362_v54  ;;  %v1228_v7 = vshrl.u32 %v5815_v42, 16  ;;  %v850_v30 = vld [vmem:[#allocation2 + $0x60] sm:$0xf] }
  0x54   : > { %v1231_v10 = vshll.u32 %v5815_v42, 16  ;;  %v594_v11 = vor.u32 %v592_v49, %v591_v63  ;;  %845 = vst [vmem:[#allocation2 + $0x54] sm:$0xf] %v844_v4  ;;  %v1226_v59 = vsel %vm5584_vm15, %v1221_v55, %v1225_v57  ;;  %v596_v60 = vrot.slane %v591_v63, 4  ;;  %v5880_v57 = vld [vmem:[#allocation2 + $0x50] sm:$0x1] }
  0x55   : > { %2001 = vrot.lane.b32.xlu0 %v5687_v52, %s5438_s28  ;;  %v1216_v52 = vsel %vm5584_vm15, %v1211_v51, %v5798_v26  ;;  %v5203_v15 = vpack.c.bf16 %v363_v1, %v363_v1  ;;  %v598_v16 = vshrl.u32 %v5202_v47, 16  ;;  %v1637_v12 = vsel %vm5570_vm14, %v5005_v56, %v1636_v41  ;;  %v321_v26 = vld [vmem:[#allocation2 + $0x74] sm:$0x1] }
  0x56   : > { %v1640_v17 = vsel %vm5570_vm14, %v1638_v58, %v1639_v61  ;;  %v595_v19 = vsel %vm5528_vm11, %v587_v62, %v594_v11  ;;  %v5855_v22 = vrot.slane %v1237_v2, 5  ;;  %v848_v23 = vsel %vm5482_vm3, %v596_v60, %v847_v14 }
  0x57   : > { %2003 = vrot.lane.b32.xlu1 %v5825_v50, %s5438_s28  ;;  %846 = vst.msk [vmem:[#allocation2 + $0x58] sm:$0xf] %vm226_vm0, %v595_v19  ;;  %v601_v24 = vshll.u32 %v5202_v47, 16  ;;  %v5863_v27 = vcombine.low %v1216_v52, %v1226_v59  ;;  %v1230_v28 = vrot.slane %v1228_v7, 4  ;;  %849 = vst [vmem:[#allocation2 + $0x5c] sm:$0x1] %v848_v23  ;;  %v5204_v48 = vpack.c.bf16 %v364_v25, %v364_v25 }
  0x58   : > { %v606_v32 = vshrl.u32 %v5203_v15, 16  ;;  %v609_v33 = vshll.u32 %v5203_v15, 16  ;;  %v1233_v37 = vrot.slane %v1231_v10, 5  ;;  %v1243_v38 = vrot.slane %v1241_v3, 4 }
  0x59   : > { %2071 = vrot.lane.b32.xlu0 %v5754_v43, %s5436_s26  ;;  %v600_v43 = vrot.slane %v598_v16, 7  ;;  %v319_v31 = vsel %vm5508_vm5, 0, %v318_v20  ;;  %v266_v45 = vsel %vm5482_vm3, 0, %v265_v21  ;;  %v5205_v49 = vpack.c.bf16 %v365_v9, %v365_v9 }
  0x5a   : > { %v608_v41 = vrot.slane %v606_v32, 7  ;;  %320 = vst [vmem:[#allocation2 + $0x68] sm:$0x1] %v319_v31  ;;  %267 = vst [vmem:[#allocation2 + $0x6c] sm:$0x1] %v266_v45  ;;  %v322_v53 = vsel %vm5508_vm5, 0, %v321_v26  ;;  %v4968_v54 = vcombine.low %v5566_v5, %v5536_v34  ;;  %v5885_v58 = vcombine.low %v1637_v12, %v1640_v17 }
  0x5b   : > { %2073 = vrot.lane.b32.xlu1 %v5780_v13, %s5436_s26  ;;  %v603_v39 = vor.u32 %v601_v24, %v600_v43  ;;  %v604_v40 = vrot.slane %v600_v43, 4  ;;  %323 = vst [vmem:[#allocation2 + $0x74] sm:$0x1] %v322_v53  ;;  %v615_v56 = vshrl.u32 %v5204_v48, 16  ;;  %v5887_v61 = vld [vmem:[#allocation2 + $0x54] sm:$0xf]  ;;  %v1234_v1 = vor.u32 %v1233_v37, %v1230_v28 }
  0x5c   : > { %v611_v55 = vor.u32 %v609_v33, %v608_v41  ;;  %1064 = vst.msk [vmem:[#allocation3] sm:$0xff] %vm1063_vm13, %v4968_v54  ;;  %v613_v5 = vrot.slane %v608_v41, 4  ;;  %v618_v63 = vshll.u32 %v5204_v48, 16  ;;  %v1244_v2 = vor.u32 %v1243_v38, %v5855_v22  ;;  %v268_v28 = vld [vmem:[#allocation2 + $0x78] sm:$0x1] }
  0x5d   : > { %2163 = vrot.lane.b32.xlu0 %v5805_v36, %s5441_s10  ;;  %v851_v51 = vsel %vm5540_vm12, %v603_v39, %v850_v30  ;;  %v623_v4 = vshrl.u32 %v5205_v49, 16  ;;  %v1247_v47 = vshll.u32 %v5880_v57, 16  ;;  %v617_v52 = vrot.slane %v615_v56, 7  ;;  %v366_v39 = vld [vmem:[%s5504_s23 + $0x90] sm:$0xff]  ;;  %v367_v45 = vld [vmem:[%s5504_s23 + $0x98] sm:$0xff] }
  0x5e   : > { %852 = vst [vmem:[#allocation2 + $0x60] sm:$0xf] %v851_v51  ;;  %v5889_v62 = vld [vmem:[#allocation2 + $0x58] sm:$0xf]  ;;  %v612_v34 = vsel %vm5528_vm11, %v604_v40, %v611_v55  ;;  %v1252_v7 = vshrl.u32 %v5887_v61, 16  ;;  %v1255_v10 = vshll.u32 %v5887_v61, 16 }
  0x5f   : > { %2165 = vrot.lane.b32.xlu1 %v5863_v27, %s5441_s10  ;;  %v5896_v3 = vcombine.low %v5887_v61, %v5889_v62  ;;  %853 = vst.msk [vmem:[#allocation2 + $0x64] sm:$0xf] %vm226_vm0, %v612_v34  ;;  %v626_v14 = vshll.u32 %v5205_v49, 16  ;;  %v620_v60 = vor.u32 %v618_v63, %v617_v52  ;;  %v1245_v15 = vrot.slane %v1244_v2, 4  ;;  %v5932_v31 = vld [vmem:[#allocation2 + $0x5c] sm:$0x1] }
  0x60   : > { %v1643_v16 = vrot.slane %v5817_v44, 5  ;;  %v625_v12 = vrot.slane %v623_v4, 7  ;;  %v1249_v19 = vrot.slane %v1247_v47, 5  ;;  %v1261_v20 = vshll.u32 %v5889_v62, 16 }
  0x61   : > { %2239 = vrot.lane.b32.xlu0 %v5825_v50, %s5439_s29  ;;  %1071 = vst.msk [vmem:[#allocation3 + $0x38] sm:$0xff] %vm1063_vm13, %v5896_v3  ;;  %v854_v11 = vld [vmem:[#allocation2 + $0x68] sm:$0x1]  ;;  %v857_v17 = vld [vmem:[#allocation2 + $0x6c] sm:$0xf]  ;;  %v1265_v21 = vshrl.u32 %v5889_v62, 16 }
  0x62   : > { %v855_v59 = vsel %vm5482_vm3, %v613_v5, %v854_v11  ;;  %v621_v23 = vrot.slane %v617_v52, 4  ;;  %v1254_v43 = vrot.slane %v1252_v7, 4  ;;  %v1257_v24 = vrot.slane %v1255_v10, 5  ;;  %v861_v30 = vld [vmem:[#allocation2 + $0x74] sm:$0x1] }
  0x63   : > { %1523 = vrot.lane.b32.xlu1 %v5805_v36, %s5437_s27  ;;  %v1235_v36 = vrot.slane %v1234_v1, 4  ;;  %856 = vst [vmem:[#allocation2 + $0x68] sm:$0x1] %v855_v59  ;;  %v628_v25 = vor.u32 %v626_v14, %v625_v12  ;;  %v630_v26 = vrot.slane %v625_v12, 4  ;;  %v858_v33 = vsel %vm5540_vm12, %v620_v60, %v857_v17 }
  0x64   : > { %v5006_v9 = vrot.slane %v5815_v42, 9  ;;  %v1645_v37 = vrot.slane %v1643_v16, 4  ;;  %859 = vst [vmem:[#allocation2 + $0x6c] sm:$0xf] %v858_v33  ;;  %v5934_v40 = vrot.slane %v1261_v20, 5  ;;  %v1267_v41 = vrot.slane %v1265_v21, 4 }
  0x65   : > { %2241 = vrot.lane.b32.xlu0 %v5885_v58, %s5439_s29  ;;  %v5917_v44 = vld [vmem:[#allocation2 + $0x60] sm:$0xf]  ;;  %v629_v42 = vsel %vm5528_vm11, %v621_v23, %v628_v25  ;;  %v1240_v48 = vsel %vm5584_vm15, %v1235_v36, %v5855_v22  ;;  %v1250_v51 = vsel %vm5584_vm15, %v1245_v15, %v1249_v19  ;;  %v862_v49 = vsel %vm5482_vm3, %v630_v26, %v861_v30  ;;  %v271_v30 = vld [vmem:[#allocation2 + $0x84] sm:$0x1] }
  0x66   : > { %v5919_v32 = vld [vmem:[#allocation2 + $0x64] sm:$0xf]  ;;  %860 = vst.msk [vmem:[#allocation2 + $0x70] sm:$0xf] %vm226_vm0, %v629_v42  ;;  %v269_v53 = vsel %vm5482_vm3, 0, %v268_v28  ;;  %v1258_v54 = vor.u32 %v1257_v24, %v1254_v43  ;;  %v5206_v22 = vpack.c.bf16 %v366_v39, %v366_v39  ;;  %v1271_v55 = vshll.u32 %v5932_v31, 16 }
  0x67   : > { %1525 = vrot.lane.b32.xlu1 %v5863_v27, %s5437_s27  ;;  %v5926_v38 = vcombine.low %v5917_v44, %v5919_v32  ;;  %863 = vst [vmem:[#allocation2 + $0x74] sm:$0x1] %v862_v49  ;;  %270 = vst [vmem:[#allocation2 + $0x78] sm:$0x1] %v269_v53  ;;  %v5956_v56 = vcombine.low %v1240_v48, %v1250_v51  ;;  %v1268_v34 = vor.u32 %v1267_v41, %v5934_v40  ;;  %v368_v28 = vld [vmem:[%s5504_s23 + $0xa0] sm:$0xff]  ;;  %vm1807_vm4 = vcmask 97344  }
  0x68   : > { %v632_v5 = vshrl.u32 %v5206_v22, 16  ;;  %v1644_v63 = vsel %vm5570_vm14, %v5006_v9, %v1643_v16  ;;  %v635_v1 = vshll.u32 %v5206_v22, 16  ;;  %v1259_v4 = vrot.slane %v1258_v54, 4  ;;  %v369_v9 = vld [vmem:[%s5504_s23 + $0xa8] sm:$0xff]  ;;  %v274_v48 = vld [vmem:[#allocation2 + $0x90] sm:$0x1] }
  0x69   : > { %1767 = vrot.lane.b32.xlu0 %v5825_v50, %s5434_s24  ;;  %v1646_v50 = vrot.slane %v5880_v57, 5  ;;  %1072 = vst.msk [vmem:[#allocation3 + $0x40] sm:$0xff] %vm1063_vm13, %v5926_v38  ;;  %v5207_v57 = vpack.c.bf16 %v367_v45, %v367_v45  ;;  %v1276_v47 = vshrl.u32 %v5917_v44, 16  ;;  %v1279_v52 = vshll.u32 %v5917_v44, 16  ;;  %v327_v45 = vld [vmem:[#allocation2 + $0x8c] sm:$0x1] }
  0x6a   : > { %v634_v7 = vrot.slane %v632_v5, 7  ;;  %v1273_v10 = vrot.slane %v1271_v55, 5  ;;  %v1285_v11 = vshll.u32 %v5919_v32, 16  ;;  %v1289_v14 = vshrl.u32 %v5919_v32, 16 }
  0x6b   : > { %1769 = vrot.lane.b32.xlu1 %v5885_v58, %s5434_s24  ;;  %v640_v2 = vshrl.u32 %v5207_v57, 16  ;;  %v643_v59 = vshll.u32 %v5207_v57, 16  ;;  %v1269_v36 = vrot.slane %v1268_v34, 4  ;;  %v5973_v15 = vld [vmem:[#allocation2 + $0x6c] sm:$0xf]  ;;  %v1650_v12 = vrot.slane %v5889_v62, 5 }
  0x6c   : > { %v637_v19 = vor.u32 %v635_v1, %v634_v7  ;;  %v638_v20 = vrot.slane %v634_v7, 4  ;;  %v1278_v21 = vrot.slane %v1276_v47, 4  ;;  %v1281_v23 = vrot.slane %v1279_v52, 5  ;;  %v370_v34 = vld [vmem:[%s5504_s23 + $0xb0] sm:$0xff]  ;;  %v330_v1 = vld [vmem:[#allocation2 + $0x98] sm:$0x1] }
  0x6d   : > { %1837 = vrot.lane.b32.xlu0 %v5780_v13, %s5435_s25  ;;  %v1647_v13 = vsel %vm5570_vm14, %v1645_v37, %v1646_v50  ;;  %v5977_v16 = vrot.slane %v640_v2, 7  ;;  %v5007_v24 = vrot.slane %v5887_v61, 9  ;;  %v5987_v25 = vrot.slane %v1285_v11, 5  ;;  %v324_v61 = vld [vmem:[#allocation2 + $0x80] sm:$0x1] }
  0x6e   : > { %v5971_v60 = vcombine.low %v1644_v63, %v1647_v13  ;;  %v864_v43 = vld [vmem:[#allocation2 + $0x78] sm:$0xf]  ;;  %v1291_v26 = vrot.slane %v1289_v14, 4  ;;  %v1274_v33 = vsel %vm5584_vm15, %v1269_v36, %v1273_v10  ;;  %v1652_v37 = vrot.slane %v1650_v12, 4  ;;  %v6002_v50 = vld [vmem:[#allocation2 + $0x68] sm:$0x1] }
  0x6f   : > { %1839 = vrot.lane.b32.xlu1 %v5821_v46, %s5435_s25  ;;  %v645_v62 = vor.u32 %v643_v59, %v5977_v16  ;;  %v1653_v39 = vrot.slane %v5932_v31, 5  ;;  %v865_v42 = vsel %vm5540_vm12, %v637_v19, %v864_v43  ;;  %v5398_v31 = vld [vmem:[%s8022_s1 + $0x10] ss:$0 sps:$4 sm:$0x33]   ;;  %v1651_v49 = vsel %vm5570_vm14, %v5007_v24, %v1650_v12  ;;  %v371_v19 = vld [vmem:[%s5504_s23 + $0xb8] sm:$0xff] }
  0x70   : > { %866 = vst [vmem:[#allocation2 + $0x78] sm:$0xf] %v865_v42  ;;  %v1292_v53 = vor.u32 %v1291_v26, %v5987_v25  ;;  %v1295_v54 = vshll.u32 %v6002_v50, 16  ;;  %v272_v22 = vsel %vm5482_vm3, 0, %v271_v30  ;;  %v5208_v55 = vpack.c.bf16 %v368_v28, %v368_v28  ;;  %5366 = vmatprep.subr.msk.bf16.mxu0 %vm8027_vm1, %v5398_v31 }
  0x71   : > { %1929 = vrot.lane.b32.xlu0 %v5863_v27, %s5440_s9  ;;  %v5975_v27 = vld [vmem:[#allocation2 + $0x70] sm:$0xf]  ;;  %v646_v41 = vsel %vm5528_vm11, %v638_v20, %v645_v62  ;;  %v5209_v57 = vpack.c.bf16 %v369_v9, %v369_v9  ;;  %v1654_v5 = vsel %vm5570_vm14, %v1652_v37, %v1653_v39  ;;  %273 = vst [vmem:[#allocation2 + $0x84] sm:$0x1] %v272_v22  ;;  %v328_v63 = vsel %vm5508_vm5, 0, %v327_v45  ;;  %v373_v39 = vld [vmem:[%s5504_s23 + $0xc8] sm:$0xff] }
  0x72   : > { %v5982_v17 = vcombine.low %v5973_v15, %v5975_v27  ;;  %867 = vst.msk [vmem:[#allocation2 + $0x7c] sm:$0xf] %vm226_vm0, %v646_v41  ;;  %v275_v13 = vsel %vm5482_vm3, 0, %v274_v48  ;;  %v649_v47 = vshrl.u32 %v5208_v55, 16  ;;  %329 = vst [vmem:[#allocation2 + $0x8c] sm:$0x1] %v328_v63  ;;  %v5210_v14 = vpack.c.bf16 %v370_v34, %v370_v34 }
  0x73   : > { %1931 = vrot.lane.b32.xlu1 %v5956_v56, %s5440_s9  ;;  %v657_v52 = vshrl.u32 %v5209_v57, 16  ;;  %276 = vst [vmem:[#allocation2 + $0x90] sm:$0x1] %v275_v13  ;;  %v6039_v7 = vrot.slane %v1292_v53, 4  ;;  %v652_v10 = vshll.u32 %v5208_v55, 16  ;;  %v2394_v11 = vsel %vm8027_vm1, %v5398_v31, 0 }
  0x74   : > { %1073 = vst.msk [vmem:[#allocation3 + $0x48] sm:$0xff] %vm1063_vm13, %v5982_v17  ;;  %v6044_v59 = vrot.slane %v1295_v54, 5  ;;  %v647_v36 = vrot.slane %v5977_v16, 4  ;;  %v651_v12 = vrot.slane %v649_v47, 7  ;;  %5295 = vmatpush3.bf16.msra.mxu0 %v2394_v11  ;;  %v331_v20 = vsel %vm5508_vm5, 0, %v330_v1 }
  0x75   : > { %2005 = vrot.lane.b32.xlu0 %v5885_v58, %s5438_s28  ;;  %v1264_v58 = vsel %vm5584_vm15, %v1259_v4, %v5934_v40  ;;  %v1282_v40 = vor.u32 %v1281_v23, %v1278_v21  ;;  %v1657_v4 = vrot.slane %v5919_v32, 5  ;;  %v6050_v21 = vcombine.low %v1651_v49, %v1654_v5  ;;  %332 = vst [vmem:[#allocation2 + $0x98] sm:$0x1] %v331_v20 }
  0x76   : > { %v6014_v51 = vcombine.low %v1264_v58, %v1274_v33  ;;  %v5008_v23 = vrot.slane %v5917_v44, 9  ;;  %v659_v62 = vrot.slane %v657_v52, 7  ;;  %v660_v28 = vshll.u32 %v5209_v57, 16  ;;  %v372_v58 = vld [vmem:[%s5504_s23 + $0xc0] sm:$0xff] }
  0x77   : > { %2007 = vrot.lane.b32.xlu1 %v5971_v60, %s5438_s28  ;;  %v6035_v2 = vrot.slane %v1282_v40, 4  ;;  %v6053_v43 = vld [vmem:[#allocation2 + $0x78] sm:$0xf]  ;;  %v6061_v16 = vrot.slane %v1657_v4, 4  ;;  %v1300_v33 = vshrl.u32 %v5973_v15, 16  ;;  %v654_v30 = vor.u32 %v652_v10, %v651_v12 }
  0x78   : > { %v5211_v9 = vpack.c.bf16 %v371_v19, %v371_v19  ;;  %v666_v37 = vshrl.u32 %v5210_v14, 16  ;;  %v1298_v42 = vsel %vm5584_vm15, %v6039_v7, %v6044_v59  ;;  %v1660_v45 = vrot.slane %v6002_v50, 5  ;;  %v871_v31 = vld [vmem:[#allocation2 + $0x84] sm:$0xf] }
  0x79   : > { %2075 = vrot.lane.b32.xlu0 %v5821_v46, %s5436_s26  ;;  %v325_v46 = vsel %vm5508_vm5, 0, %v324_v61  ;;  %v6055_v24 = vld [vmem:[#allocation2 + $0x7c] sm:$0xf]  ;;  %v1288_v41 = vsel %vm5584_vm15, %v6035_v2, %v5987_v25  ;;  %v1303_v48 = vshll.u32 %v5973_v15, 16  ;;  %v655_v49 = vrot.slane %v651_v12, 4 }
  0x7a   : > { %326 = vst [vmem:[#allocation2 + $0x80] sm:$0x1] %v325_v46  ;;  %v6065_v26 = vcombine.low %v6053_v43, %v6055_v24  ;;  %v875_v53 = vld [vmem:[#allocation2 + $0x8c] sm:$0x1]  ;;  %v669_v46 = vshll.u32 %v5210_v14, 16  ;;  %v5212_v54 = vpack.c.bf16 %v372_v58, %v372_v58  ;;  %v662_v22 = vor.u32 %v660_v28, %v659_v62 }
  0x7b   : > { %2077 = vrot.lane.b32.xlu1 %v5896_v3, %s5436_s26  ;;  %v664_v55 = vrot.slane %v659_v62, 4  ;;  %v872_v57 = vsel %vm5540_vm12, %v654_v30, %v871_v31  ;;  %v5213_v34 = vpack.c.bf16 %v373_v39, %v373_v39  ;;  %v6090_v5 = vrot.slane %v1300_v33, 4  ;;  %v878_v11 = vld [vmem:[#allocation2 + $0x90] sm:$0xf]  ;;  %v280_v28 = vld [vmem:[#allocation2 + $0xa8] sm:$0x1] }
  0x7c   : > { %1074 = vst.msk [vmem:[#allocation3 + $0x50] sm:$0xff] %vm1063_vm13, %v6065_v26  ;;  %873 = vst [vmem:[#allocation2 + $0x84] sm:$0xf] %v872_v57  ;;  %v668_v63 = vrot.slane %v666_v37, 7  ;;  %v674_v13 = vshrl.u32 %v5211_v9, 16  ;;  %v677_v1 = vshll.u32 %v5211_v9, 16  ;;  %v663_v52 = vsel %vm5528_vm11, %v655_v49, %v662_v22 }
  0x7d   : > { %2167 = vrot.lane.b32.xlu0 %v5956_v56, %s5441_s10  ;;  %v1309_v47 = vshll.u32 %v5975_v27, 16  ;;  %v876_v10 = vsel %vm5482_vm3, %v664_v55, %v875_v53  ;;  %v1313_v12 = vshrl.u32 %v5975_v27, 16  ;;  %874 = vst.msk [vmem:[#allocation2 + $0x88] sm:$0xf] %vm226_vm0, %v663_v52  ;;  %v1305_v58 = vrot.slane %v1303_v48, 5 }
  0x7e   : > { %877 = vst [vmem:[#allocation2 + $0x8c] sm:$0x1] %v876_v10  ;;  %v671_v19 = vor.u32 %v669_v46, %v668_v63  ;;  %v672_v20 = vrot.slane %v668_v63, 4  ;;  %v676_v62 = vrot.slane %v674_v13, 7  ;;  %v882_v33 = vld [vmem:[#allocation2 + $0x98] sm:$0x1]  ;;  %v1658_v63 = vsel %vm5570_vm14, %v5008_v23, %v1657_v4 }
  0x7f   : > { %2169 = vrot.lane.b32.xlu1 %v6014_v51, %s5441_s10  ;;  %v686_v30 = vshll.u32 %v5212_v54, 16  ;;  %v691_v9 = vshrl.u32 %v5213_v34, 16  ;;  %v694_v31 = vshll.u32 %v5213_v34, 16  ;;  %v281_v48 = vsel %vm5482_vm3, 0, %v280_v28  ;;  %v6113_v53 = vld [vmem:[#allocation2 + $0x74] sm:$0x1] }
  0x80   : > { %v679_v37 = vor.u32 %v677_v1, %v676_v62  ;;  %v681_v39 = vrot.slane %v676_v62, 4  ;;  %v6115_v46 = vrot.slane %v1309_v47, 5  ;;  %282 = vst [vmem:[#allocation2 + $0xa8] sm:$0x1] %v281_v48  ;;  %v1661_v44 = vsel %vm5570_vm14, %v6061_v16, %v1660_v45  ;;  %v374_v48 = vld [vmem:[%s5504_s23 + $0xd0] sm:$0xff] }
  0x81   : > { %2243 = vrot.lane.b32.xlu0 %v5971_v60, %s5439_s29  ;;  %v868_v61 = vld [vmem:[#allocation2 + $0x80] sm:$0x1]  ;;  %v693_v49 = vrot.slane %v691_v9, 7  ;;  %v1319_v32 = vshll.u32 %v6113_v53, 16  ;;  %v1306_v59 = vor.u32 %v1305_v58, %v6090_v5  ;;  %v1324_v16 = vshrl.u32 %v6053_v43, 16 }
  0x82   : > { %v869_v40 = vsel %vm5482_vm3, %v647_v36, %v868_v61  ;;  %v333_v36 = vld [vmem:[#allocation2 + $0xa4] sm:$0x1]  ;;  %v683_v61 = vshrl.u32 %v5212_v54, 16  ;;  %v1315_v54 = vrot.slane %v1313_v12, 4  ;;  %v680_v22 = vsel %vm5528_vm11, %v672_v20, %v679_v37 }
  0x83   : > { %1527 = vrot.lane.b32.xlu1 %v5956_v56, %s5437_s27  ;;  %v277_v56 = vld [vmem:[#allocation2 + $0x9c] sm:$0x1]  ;;  %870 = vst [vmem:[#allocation2 + $0x80] sm:$0x1] %v869_v40  ;;  %v879_v40 = vsel %vm5540_vm12, %v671_v19, %v878_v11  ;;  %v883_v55 = vsel %vm5482_vm3, %v681_v39, %v882_v33  ;;  %881 = vst.msk [vmem:[#allocation2 + $0x94] sm:$0xf] %vm226_vm0, %v680_v22  ;;  %v696_v34 = vor.u32 %v694_v31, %v693_v49 }
  0x84   : > { %v278_v14 = vsel %vm5482_vm3, 0, %v277_v56  ;;  %880 = vst [vmem:[#allocation2 + $0x90] sm:$0xf] %v879_v40  ;;  %v685_v56 = vrot.slane %v683_v61, 7  ;;  %884 = vst [vmem:[#allocation2 + $0x98] sm:$0x1] %v883_v55  ;;  %v1316_v25 = vor.u32 %v1315_v54, %v6115_v46  ;;  %v6173_v5 = vcombine.low %v1658_v63, %v1661_v44 }
  0x85   : > { %2245 = vrot.lane.b32.xlu0 %v6050_v21, %s5439_s29  ;;  %279 = vst [vmem:[#allocation2 + $0x9c] sm:$0x1] %v278_v14  ;;  %v6150_v4 = vld [vmem:[#allocation2 + $0x84] sm:$0xf]  ;;  %v6152_v23 = vld [vmem:[#allocation2 + $0x88] sm:$0xf]  ;;  %v5214_v44 = vpack.c.bf16 %v374_v48, %v374_v48 }
  0x86   : > { %v689_v57 = vrot.slane %v685_v56, 4  ;;  %v688_v13 = vor.u32 %v686_v30, %v685_v56  ;;  %v6160_v50 = vcombine.low %v6150_v4, %v6152_v23  ;;  %v698_v2 = vrot.slane %v693_v49, 4 }
  0x87   : > { %1529 = vrot.lane.b32.xlu1 %v6014_v51, %s5437_s27  ;;  %v1321_v1 = vrot.slane %v1319_v32, 5  ;;  %v1333_v47 = vshll.u32 %v6055_v24, 16  ;;  %v1307_v10 = vrot.slane %v1306_v59, 4  ;;  %v1317_v11 = vrot.slane %v1316_v25, 4 }
  0x88   : > { %v697_v7 = vsel %vm5528_vm11, %v689_v57, %v696_v34  ;;  %1075 = vst.msk [vmem:[#allocation3 + $0x58] sm:$0xff] %vm1063_vm13, %v6160_v50  ;;  %v1664_v62 = vrot.slane %v5975_v27, 5  ;;  %v1326_v28 = vrot.slane %v1324_v16, 4  ;;  %v5009_v9 = vrot.slane %v5973_v15, 9 }
  0x89   : > { %1771 = vrot.lane.b32.xlu0 %v5971_v60, %s5434_s24  ;;  %v334_v60 = vsel %vm5508_vm5, 0, %v333_v36  ;;  %888 = vst.msk [vmem:[#allocation2 + $0xa0] sm:$0xf] %vm226_vm0, %v697_v7  ;;  %v6192_v61 = vrot.slane %v1333_v47, 5  ;;  %v1312_v27 = vsel %vm5584_vm15, %v1307_v10, %v6115_v46  ;;  %v1667_v31 = vrot.slane %v6113_v53, 5 }
  0x8a   : > { %335 = vst [vmem:[#allocation2 + $0xa4] sm:$0x1] %v334_v60  ;;  %v6179_v36 = vld [vmem:[#allocation2 + $0x94] sm:$0xf]  ;;  %v6202_v37 = vld [vmem:[#allocation2 + $0x80] sm:$0x1]  ;;  %v1665_v22 = vsel %vm5570_vm14, %v5009_v9, %v1664_v62 }
  0x8b   : > { %1773 = vrot.lane.b32.xlu1 %v6050_v21, %s5434_s24  ;;  %v6177_v14 = vld [vmem:[#allocation2 + $0x90] sm:$0xf]  ;;  %v1666_v40 = vrot.slane %v1664_v62, 4  ;;  %v1343_v54 = vshll.u32 %v6202_v37, 16  ;;  %vm1877_vm6 = vcmask 130144   ;;  %v1671_v63 = vrot.slane %v6055_v24, 5 }
  0x8c   : > { %v6188_v33 = vcombine.low %v6177_v14, %v6179_v36  ;;  %v1348_v59 = vshrl.u32 %v6150_v4, 16  ;;  %v700_v10 = vshrl.u32 %v5214_v44, 16  ;;  %v1361_v48 = vshrl.u32 %v6152_v23, 16  ;;  %v289_v47 = vld [vmem:[#allocation2 + $0xcc] sm:$0x1] }
  0x8d   : > { %1841 = vrot.lane.b32.xlu0 %v5896_v3, %s5435_s25  ;;  %v6142_v3 = vcombine.low %v1288_v41, %v1298_v42  ;;  %v885_v41 = vld [vmem:[#allocation2 + $0x9c] sm:$0xf]  ;;  %v1327_v42 = vshll.u32 %v6053_v43, 16  ;;  %v1668_v57 = vsel %vm5570_vm14, %v1666_v40, %v1667_v31  ;;  %v6244_v7 = vrot.slane %v1343_v54, 5  ;;  %v377_v40 = vld [vmem:[%s5504_s23 + $0xe8] sm:$0xff] }
  0x8e   : > { %v886_v45 = vsel %vm5540_vm12, %v688_v13, %v885_v41  ;;  %1076 = vst.msk [vmem:[#allocation3 + $0x60] sm:$0xff] %vm1063_vm13, %v6188_v33  ;;  %v375_v13 = vld [vmem:[%s5504_s23 + $0xd8] sm:$0xff]  ;;  %v6247_v25 = vcombine.low %v1665_v22, %v1668_v57  ;;  %v1351_v41 = vshll.u32 %v6150_v4, 16  ;;  %v286_v31 = vld [vmem:[#allocation2 + $0xc0] sm:$0x1]  ;;  %vm1969_vm7 = vcmask 162944  }
  0x8f   : > { %1843 = vrot.lane.b32.xlu1 %v5926_v38, %s5435_s25  ;;  %887 = vst [vmem:[#allocation2 + $0x9c] sm:$0xf] %v886_v45  ;;  %v1329_v58 = vrot.slane %v1327_v42, 5  ;;  %v5215_v16 = vpack.c.bf16 %v375_v13, %v375_v13  ;;  %v336_v42 = vld [vmem:[#allocation2 + $0xb0] sm:$0x1]  ;;  %vm2115_vm8 = vcmask 228544  }
  0x90   : > { %v6211_v60 = vld [vmem:[#allocation2 + $0xa0] sm:$0xf]  ;;  %v337_v9 = vsel %vm5508_vm5, 0, %v336_v42  ;;  %vm2207_vm9 = vcmask 261344   ;;  %vm8029_vm10 = vcmask 294144   ;;  %vm8028_vm1 = vcmask 293888  }
  0x91   : > { %1933 = vrot.lane.b32.xlu0 %v6014_v51, %s5440_s9  ;;  %v1337_v51 = vshrl.u32 %v6055_v24, 16  ;;  %v889_v52 = vld [vmem:[#allocation2 + $0xa4] sm:$0x1]  ;;  %v1330_v56 = vor.u32 %v1329_v58, %v1326_v28  ;;  %v708_v62 = vshrl.u32 %v5215_v16, 16  ;;  %v711_v28 = vshll.u32 %v5215_v16, 16  ;;  %v379_v16 = vld [vmem:[%s5504_s23 + $0xf8] sm:$0xff] }
  0x92   : > { %v890_v12 = vsel %vm5482_vm3, %v698_v2, %v889_v52  ;;  %v5010_v2 = vrot.slane %v6053_v43, 9  ;;  %v1357_v52 = vshll.u32 %v6152_v23, 16  ;;  %v339_v58 = vld [vmem:[#allocation2 + $0xbc] sm:$0x1]  ;;  %338 = vst [vmem:[#allocation2 + $0xb0] sm:$0x1] %v337_v9 }
  0x93   : > { %1935 = vrot.lane.b32.xlu1 %v6142_v3, %s5440_s9  ;;  %v1760_v20 = vpop.permute.xlu1 %1759  ;;  %891 = vst [vmem:[#allocation2 + $0xa4] sm:$0x1] %v890_v12  ;;  %v1339_v30 = vrot.slane %v1337_v51, 4  ;;  %v6232_v34 = vrot.slane %v1330_v56, 4  ;;  %v6264_v51 = vrot.slane %v1671_v63, 4  ;;  %v376_v12 = vld [vmem:[%s5504_s23 + $0xe0] sm:$0xff] }
  0x94   : > { %v6280_v56 = vrot.slane %v1351_v41, 5  ;;  %v6291_v57 = vrot.slane %v1357_v52, 5  ;;  %v378_v41 = vld [vmem:[%s5504_s23 + $0xf0] sm:$0xff]  ;;  %v342_v9 = vld [vmem:[#allocation2 + $0xc8] sm:$0x1] }
  0x95   : > { %2009 = vrot.lane.b32.xlu0 %v6050_v21, %s5438_s28  ;;  %v1322_v21 = vsel %vm5584_vm15, %v1317_v11, %v1321_v1  ;;  %v283_v11 = vld [vmem:[#allocation2 + $0xb4] sm:$0x1]  ;;  %v8042_v6 = vsel %vm5584_vm15, %v6232_v34, %v6192_v61 }
  0x96   : > { %v1830_v19 = vpop.permute.xlu0 %1829  ;;  %v6209_v49 = vld [vmem:[#allocation2 + $0x9c] sm:$0xf]  ;;  %v6218_v46 = vcombine.low %v1312_v27, %v1322_v21  ;;  %v6275_v27 = vrot.slane %v1348_v59, 4  ;;  %v702_v21 = vrot.slane %v700_v10, 7  ;;  %v284_v54 = vsel %vm5482_vm3, 0, %v283_v11 }
  0x97   : > { %2011 = vrot.lane.b32.xlu1 %v6173_v5, %s5438_s28  ;;  %v6216_v15 = vpop.permute.xlu1 %1831  ;;  %v6224_v53 = vcombine.low %v6209_v49, %v6211_v60  ;;  %285 = vst [vmem:[#allocation2 + $0xb4] sm:$0x1] %v284_v54  ;;  %v5216_v59 = vpack.c.bf16 %v376_v12, %v376_v12  ;;  %v340_v11 = vsel %vm5508_vm5, 0, %v339_v58  ;;  %v287_v12 = vsel %vm5482_vm3, 0, %v286_v31 }
  0x98   : > { %341 = vst [vmem:[#allocation2 + $0xbc] sm:$0x1] %v340_v11  ;;  %288 = vst [vmem:[#allocation2 + $0xc0] sm:$0x1] %v287_v12  ;;  %v343_v31 = vsel %vm5508_vm5, 0, %v342_v9 }
  0x99   : > { %2079 = vrot.lane.b32.xlu0 %v5926_v38, %s5436_s26  ;;  %v1340_v38 = vor.u32 %v1339_v30, %v6192_v61  ;;  %1077 = vst.msk [vmem:[#allocation3 + $0x68] sm:$0xff] %vm1063_vm13, %v6224_v53  ;;  %344 = vst [vmem:[#allocation2 + $0xc8] sm:$0x1] %v343_v31  ;;  %v345_v11 = vld [vmem:[#allocation2 + $0xd4] sm:$0x1] }
  0x9a   : > { %v6206_v39 = vpop.permute.xlu0 %2067 }
  0x9b   : > { %2081 = vrot.lane.b32.xlu1 %v5982_v17, %s5436_s26  ;;  %v6242_v32 = vrot.slane %v1340_v38, 4  ;;  %v892_v38 = vld [vmem:[#allocation2 + $0xa8] sm:$0xf] }
  0x9d   : > { %2171 = vrot.lane.b32.xlu0 %v6142_v3, %s5441_s10  ;;  %v1346_v30 = vsel %vm5584_vm15, %v6242_v32, %v6244_v7  ;;  %v1354_v32 = vor.u32 %v6280_v56, %v6275_v27 }
  0x9e   : > { %v1516_v55 = vpop.permute.xlu0 %1515 }
  0x9f   : > { %1564 = vst.msk [vmem:[#allocation3] sm:$0xff] %vm1563_vm2, %v1516_v55  ;;  %2173 = vrot.lane.b32.xlu1 %v6218_v46, %s5441_s10  ;;  %v903_v24 = vld [vmem:[#allocation2 + $0xbc] sm:$0x1] }
  0xa0   : > { %1808 = vst.msk [vmem:[#allocation3] sm:$0xff] %vm1807_vm4, %v1760_v20  ;;  %v703_v20 = vshll.u32 %v5214_v44, 16  ;;  %v706_v44 = vrot.slane %v702_v21, 4  ;;  %v910_v56 = vld [vmem:[#allocation2 + $0xc8] sm:$0x1] }
  0xa1   : > { %1878 = vst.msk [vmem:[#allocation3] sm:$0xff] %vm1877_vm6, %v1830_v19  ;;  %v6252_v45 = vpop.permute.xlu1 %2069  ;;  %2247 = vrot.lane.b32.xlu0 %v6173_v5, %s5439_s29  ;;  %v1674_v19 = vrot.slane %v6202_v37, 5  ;;  %v6355_v37 = vcombine.low %v8042_v6, %v1346_v30 }
  0xa2   : > { %v6256_v1 = vpop.permute.xlu0 %1997  ;;  %v705_v13 = vor.u32 %v703_v20, %v702_v21  ;;  %v717_v20 = vshrl.u32 %v5216_v59, 16  ;;  %v720_v21 = vshll.u32 %v5216_v59, 16  ;;  %v6314_v59 = vrot.slane %v1361_v48, 4 }
  0xa3   : > { %1531 = vrot.lane.b32.xlu1 %v6142_v3, %s5437_s27  ;;  %v710_v3 = vrot.slane %v708_v62, 7  ;;  %v5217_v62 = vpack.c.bf16 %v377_v40, %v377_v40 }
  0xa4   : > { %v893_v52 = vsel %vm5540_vm12, %v705_v13, %v892_v38  ;;  %v719_v38 = vrot.slane %v717_v20, 7  ;;  %v5219_v13 = vpack.c.bf16 %v379_v16, %v379_v16  ;;  %v896_v16 = vld [vmem:[#allocation2 + $0xb0] sm:$0x1]  ;;  %v1364_v7 = vor.u32 %v6314_v59, %v6291_v57 }
  0xa5   : > { %v6285_v22 = vpop.permute.xlu1 %1761  ;;  %2249 = vrot.lane.b32.xlu0 %v6247_v25, %s5439_s29  ;;  %v713_v42 = vor.u32 %v711_v28, %v710_v3  ;;  %v715_v10 = vrot.slane %v710_v3, 4  ;;  %894 = vst [vmem:[#allocation2 + $0xa8] sm:$0xf] %v893_v52  ;;  %v725_v58 = vshrl.u32 %v5217_v62, 16  ;;  %v728_v40 = vshll.u32 %v5217_v62, 16 }
  0xa6   : > { %v6289_v55 = vpop.permute.xlu0 %2235  ;;  %v5218_v3 = vpack.c.bf16 %v378_v41, %v378_v41  ;;  %v722_v52 = vor.u32 %v720_v21, %v719_v38  ;;  %v723_v20 = vrot.slane %v719_v38, 4  ;;  %v742_v9 = vshrl.u32 %v5219_v13, 16  ;;  %v6330_v38 = vld [vmem:[#allocation2 + $0x8c] sm:$0x1] }
  0xa7   : > { %1533 = vrot.lane.b32.xlu1 %v6218_v46, %s5437_s27  ;;  %v714_v28 = vsel %vm5528_vm11, %v706_v44, %v713_v42  ;;  %v290_v44 = vsel %vm5482_vm3, 0, %v289_v47  ;;  %v727_v42 = vrot.slane %v725_v58, 7  ;;  %v745_v12 = vshll.u32 %v5219_v13, 16  ;;  %v899_v58 = vld [vmem:[#allocation2 + $0xb4] sm:$0xf] }
  0xa8   : > { %895 = vst.msk [vmem:[#allocation2 + $0xac] sm:$0xf] %vm226_vm0, %v714_v28  ;;  %v734_v62 = vshrl.u32 %v5218_v3, 16  ;;  %v737_v41 = vshll.u32 %v5218_v3, 16  ;;  %291 = vst [vmem:[#allocation2 + $0xcc] sm:$0x1] %v290_v44  ;;  %v897_v47 = vsel %vm5482_vm3, %v715_v10, %v896_v16  ;;  %v1672_v21 = vsel %vm5570_vm14, %v5010_v2, %v1671_v63 }
  0xa9   : > { %v6305_v54 = vpop.permute.xlu1 %1999  ;;  %1775 = vrot.lane.b32.xlu0 %v6173_v5, %s5434_s24  ;;  %v730_v48 = vor.u32 %v728_v40, %v727_v42  ;;  %v732_v28 = vrot.slane %v727_v42, 4  ;;  %898 = vst [vmem:[#allocation2 + $0xb0] sm:$0x1] %v897_v47  ;;  %v900_v10 = vsel %vm5540_vm12, %v722_v52, %v899_v58  ;;  %v744_v40 = vrot.slane %v742_v9, 7 }
  0xaa   : > { %v736_v3 = vrot.slane %v734_v62, 7  ;;  %v346_v13 = vsel %vm5508_vm5, 0, %v345_v11  ;;  %901 = vst [vmem:[#allocation2 + $0xb4] sm:$0xf] %v900_v10  ;;  %v906_v62 = vld [vmem:[#allocation2 + $0xc0] sm:$0xf] }
  0xab   : > { %1777 = vrot.lane.b32.xlu1 %v6247_v25, %s5434_s24  ;;  %v6318_v5 = vpop.permute.xlu0 %2237  ;;  %v731_v43 = vsel %vm5528_vm11, %v723_v20, %v730_v48  ;;  %347 = vst [vmem:[#allocation2 + $0xd4] sm:$0x1] %v346_v13  ;;  %v749_v42 = vrot.slane %v744_v40, 4  ;;  %v1367_v61 = vshll.u32 %v6330_v38, 16  ;;  %vm2045_vm5 = vcmask 195744  }
  0xac   : > { %v739_v63 = vor.u32 %v737_v41, %v736_v3  ;;  %v740_v2 = vrot.slane %v736_v3, 4  ;;  %902 = vst.msk [vmem:[#allocation2 + $0xb8] sm:$0xf] %vm226_vm0, %v731_v43  ;;  %v6366_v34 = vld [vmem:[#allocation2 + $0xa8] sm:$0xf]  ;;  %v1365_v52 = vrot.slane %v1364_v7, 4 }
  0xad   : > { %v1924_v31 = vpop.permute.xlu1 %1923  ;;  %1845 = vrot.lane.b32.xlu0 %v5982_v17, %s5435_s25  ;;  %v1675_v17 = vsel %vm5570_vm14, %v6264_v51, %v1674_v19  ;;  %v904_v51 = vsel %vm5482_vm3, %v732_v28, %v903_v24  ;;  %v747_v19 = vor.u32 %v745_v12, %v744_v40  ;;  %v1369_v20 = vrot.slane %v1367_v61, 5  ;;  %v951_v43 = vld [vmem:[#allocation2 + $0x98] sm:$0x1] }
  0xae   : > { %905 = vst [vmem:[#allocation2 + $0xbc] sm:$0x1] %v904_v51  ;;  %v907_v41 = vsel %vm5540_vm12, %v739_v63, %v906_v62  ;;  %v6389_v16 = vcombine.low %v1672_v21, %v1675_v17  ;;  %v1381_v3 = vshll.u32 %v6179_v36, 16 }
  0xaf   : > { %1847 = vrot.lane.b32.xlu1 %v6065_v26, %s5435_s25  ;;  %v1518_v44 = vpop.permute.xlu0 %1517  ;;  %v6368_v30 = vld [vmem:[#allocation2 + $0xac] sm:$0xf]  ;;  %908 = vst [vmem:[#allocation2 + $0xc0] sm:$0xf] %v907_v41  ;;  %v748_v59 = vsel %vm5528_vm11, %v740_v2, %v747_v19 }
  0xb0   : > { %1565 = vst.msk [vmem:[#allocation3 + $0x8] sm:$0xff] %vm1563_vm2, %v1518_v44  ;;  %v6378_v27 = vcombine.low %v6366_v34, %v6368_v30  ;;  %v1383_v24 = vrot.slane %v1381_v3, 5 }
  0xb1   : > { %1809 = vst.msk [vmem:[#allocation3 + $0x8] sm:$0xff] %vm1807_vm4, %v6285_v22  ;;  %v2162_v11 = vpop.permute.xlu1 %2161  ;;  %1937 = vrot.lane.b32.xlu0 %v6218_v46, %s5440_s9  ;;  %v911_v22 = vsel %vm5482_vm3, %v749_v42, %v910_v56  ;;  %v6408_v12 = vld [vmem:[#allocation2 + $0xb4] sm:$0xf]  ;;  %v1391_v42 = vshll.u32 %v951_v43, 16 }
  0xb2   : > { %1879 = vst.msk [vmem:[#allocation3 + $0x8] sm:$0xff] %vm1877_vm6, %v6216_v15  ;;  %912 = vst [vmem:[#allocation2 + $0xc8] sm:$0x1] %v911_v22  ;;  %v1355_v15 = vrot.slane %v1354_v32, 4  ;;  %v1405_v22 = vshll.u32 %v6211_v60, 16 }
  0xb3   : > { %1971 = vst.msk [vmem:[#allocation3 + $0x8] sm:$0xff] %vm1969_vm7, %v1924_v31  ;;  %1939 = vrot.lane.b32.xlu1 %v6355_v37, %s5440_s9  ;;  %v1922_v46 = vpop.permute.xlu0 %1921  ;;  %v6410_v47 = vld [vmem:[#allocation2 + $0xb8] sm:$0xf]  ;;  %v1385_v31 = vshrl.u32 %v6179_v36, 16  ;;  %v1393_v41 = vrot.slane %v1391_v42, 5  ;;  %v1420_v42 = vshrl.u32 %v6366_v34, 16 }
  0xb4   : > { %1078 = vst.msk [vmem:[#allocation3 + $0x70] sm:$0xff] %vm1063_vm13, %v6378_v27 }
  0xb5   : > { %909 = vst.msk [vmem:[#allocation2 + $0xc4] sm:$0xf] %vm226_vm0, %v748_v59  ;;  %v1520_v9 = vpop.permute.xlu1 %1519  ;;  %2013 = vrot.lane.b32.xlu0 %v6247_v25, %s5438_s28  ;;  %v1387_v63 = vrot.slane %v1385_v31, 4  ;;  %v1399_v59 = vshll.u32 %v6209_v49, 16 }
  0xb6   : > { %2047 = vst.msk [vmem:[#allocation3 + $0x8] sm:$0xff] %vm2045_vm5, %v6305_v54  ;;  %v1678_v54 = vrot.slane %v6152_v23, 5  ;;  %v1360_v23 = vsel %vm5584_vm15, %v1355_v15, %v6291_v57  ;;  %v1681_v57 = vrot.slane %v6330_v38, 5 }
  0xb7   : > { %1970 = vst.msk [vmem:[#allocation3] sm:$0xff] %vm1969_vm7, %v1922_v46  ;;  %2015 = vrot.lane.b32.xlu1 %v6389_v16, %s5438_s28  ;;  %v2160_v25 = vpop.permute.xlu0 %2159  ;;  %v1388_v62 = vor.u32 %v1387_v63, %v1383_v24  ;;  %v1409_v46 = vshrl.u32 %v6211_v60, 16 }
  0xb8   : > { %2117 = vst.msk [vmem:[#allocation3 + $0x8] sm:$0xff] %vm2115_vm8, %v6252_v45  ;;  %v6418_v45 = vcombine.low %v6408_v12, %v6410_v47  ;;  %v1680_v48 = vrot.slane %v1678_v54, 4 }
  0xb9   : > { %2046 = vst.msk [vmem:[#allocation3] sm:$0xff] %vm2045_vm5, %v6256_v1  ;;  %v1522_v1 = vpop.permute.xlu1 %1521  ;;  %2083 = vrot.lane.b32.xlu0 %v6065_v26, %s5436_s26  ;;  %v1375_v26 = vshll.u32 %v6177_v14, 16  ;;  %v1389_v56 = vrot.slane %v1388_v62, 4  ;;  %v1423_v62 = vshll.u32 %v6366_v34, 16 }
  0xba   : > { %2209 = vst.msk [vmem:[#allocation3 + $0x8] sm:$0xff] %vm2207_vm9, %v2162_v11  ;;  %v1682_v38 = vsel %vm5570_vm14, %v1680_v48, %v1681_v57  ;;  %v1685_v11 = vrot.slane %v6179_v36, 5 }
  0xbb   : > { %2116 = vst.msk [vmem:[#allocation3] sm:$0xff] %vm2115_vm8, %v6206_v39  ;;  %v1370_v39 = vsel %vm5584_vm15, %v1365_v52, %v1369_v20  ;;  %2085 = vrot.lane.b32.xlu1 %v6160_v50, %s5436_s26  ;;  %v1764_v28 = vpop.permute.xlu0 %1763  ;;  %v1377_v13 = vrot.slane %v1375_v26, 5  ;;  %v5012_v52 = vrot.slane %v6177_v14, 9 }
  0xbc   : > { %1566 = vst.msk [vmem:[#allocation3 + $0x10] sm:$0xff] %vm1563_vm2, %v1520_v9  ;;  %1567 = vst.msk [vmem:[#allocation3 + $0x18] sm:$0xff] %vm1563_vm2, %v1522_v1  ;;  %v6437_v58 = vcombine.low %v1360_v23, %v1370_v39  ;;  %v1687_v9 = vrot.slane %v1685_v11, 4  ;;  %v1394_v23 = vsel %vm5584_vm15, %v1389_v56, %v1393_v41  ;;  %v1401_v39 = vrot.slane %v1399_v59, 5 }
  0xbd   : > { %2285 = vst.msk [vmem:[#allocation3 + $0x8] sm:$0xff] %vm8029_vm10, %v6318_v5  ;;  %v5011_v5 = vrot.slane %v6150_v4, 9  ;;  %v1766_v4 = vpop.permute.xlu1 %1765  ;;  %2175 = vrot.lane.b32.xlu0 %v6355_v37, %s5441_s10  ;;  %v1411_v1 = vrot.slane %v1409_v46, 4  ;;  %v1425_v56 = vrot.slane %v1423_v62, 5 }
  0xbe   : > { %2208 = vst.msk [vmem:[#allocation3] sm:$0xff] %vm2207_vm9, %v2160_v25 }
  0xbf   : > { %2284 = vst.msk [vmem:[#allocation3] sm:$0xff] %vm8029_vm10, %v6289_v55  ;;  %v1372_v55 = vshrl.u32 %v6177_v14, 16  ;;  %v1679_v21 = vsel %vm5570_vm14, %v5011_v5, %v1678_v54  ;;  %2177 = vrot.lane.b32.xlu1 %v6437_v58, %s5441_s10  ;;  %v1834_v10 = vpop.permute.xlu0 %1833  ;;  %v1688_v54 = vrot.slane %v951_v43, 5  ;;  %v954_v14 = vld [vmem:[#allocation2 + $0xa4] sm:$0x1] }
  0xc0   : > { %1079 = vst.msk [vmem:[#allocation3 + $0x78] sm:$0xff] %vm1063_vm13, %v6418_v45  ;;  %v5027_v6 = vcombine.low %v1679_v21, %v1682_v38  ;;  %v1415_v31 = vshll.u32 %v954_v14, 16 }
  0xc1   : > { %1810 = vst.msk [vmem:[#allocation3 + $0x10] sm:$0xff] %vm1807_vm4, %v1764_v28  ;;  %1811 = vst.msk [vmem:[#allocation3 + $0x18] sm:$0xff] %vm1807_vm4, %v1766_v4  ;;  %v1374_v40 = vrot.slane %v1372_v55, 4  ;;  %v1836_v2 = vpop.permute.xlu1 %1835  ;;  %2251 = vrot.lane.b32.xlu0 %v6389_v16, %s5439_s29  ;;  %v1686_v28 = vsel %vm5570_vm14, %v5012_v52, %v1685_v11  ;;  %v1689_v55 = vsel %vm5570_vm14, %v1687_v9, %v1688_v54  ;;  %v957_v52 = vld [vmem:[#allocation2 + $0xb0] sm:$0x1] }
  0xc2   : > { %1880 = vst.msk [vmem:[#allocation3 + $0x10] sm:$0xff] %vm1877_vm6, %v1834_v10  ;;  %1881 = vst.msk [vmem:[#allocation3 + $0x18] sm:$0xff] %vm1877_vm6, %v1836_v2  ;;  %v6496_v21 = vcombine.low %v1686_v28, %v1689_v55  ;;  %v1439_v54 = vshll.u32 %v957_v52, 16  ;;  %v1457_v28 = vshrl.u32 %v6410_v47, 16 }
  0xc3   : > { %1535 = vrot.lane.b32.xlu1 %v6355_v37, %s5437_s27  ;;  %v1926_v51 = vpop.permute.xlu0 %1925  ;;  %v1378_v19 = vor.u32 %v1377_v13, %v1374_v40  ;;  %v1396_v37 = vshrl.u32 %v6209_v49, 16  ;;  %v1417_v40 = vrot.slane %v1415_v31, 5 }
  0xc4   : > { %v2301_v44 = vld [vmem:[#allocation3 + $0x8] sm:$0xff]  ;;  %1972 = vst.msk [vmem:[#allocation3 + $0x10] sm:$0xff] %vm1969_vm7, %v1926_v51 }
  0xc5   : > { %v1928_v32 = vpop.permute.xlu1 %1927  ;;  %2253 = vrot.lane.b32.xlu0 %v5027_v6, %s5439_s29  ;;  %v1379_v61 = vrot.slane %v1378_v19, 4  ;;  %v1398_v25 = vrot.slane %v1396_v37, 4  ;;  %v1422_v37 = vrot.slane %v1420_v42, 4 }
  0xc6   : > { %v2300_v17 = vld [vmem:[#allocation3] sm:$0xff]  ;;  %1973 = vst.msk [vmem:[#allocation3 + $0x18] sm:$0xff] %vm1969_vm7, %v1928_v32 }
  0xc7   : > { %5296 = vmatprep.mubr.msk.bf16.mxu0 %vm8028_vm1, %v2300_v17  ;;  %1537 = vrot.lane.b32.xlu1 %v6437_v58, %s5437_s27  ;;  %v2002_v7 = vpop.permute.xlu0 %2001  ;;  %v1384_v20 = vsel %vm5584_vm15, %v1379_v61, %v1383_v24  ;;  %v1402_v26 = vor.u32 %v1401_v39, %v1398_v25  ;;  %v1692_v17 = vrot.slane %v6211_v60, 5  ;;  %v5013_v60 = vrot.slane %v6209_v49, 9 }
  0xc8   : > { %5297 = vmatmul.mubr.msk.bf16.vlgmr.msra.gmra.mrb[0].mxu0 %vm8028_vm1, %v2301_v44  ;;  %2048 = vst.msk [vmem:[#allocation3 + $0x10] sm:$0xff] %vm2045_vm5, %v2002_v7  ;;  %v4996_v57 = vcombine.low %v1384_v20, %v1394_v23  ;;  %v1695_v44 = vrot.slane %v954_v14, 5  ;;  %v1433_v49 = vshrl.u32 %v6368_v30, 16  ;;  %v1426_v20 = vor.u32 %v1425_v56, %v1422_v37 }
  0xc9   : > { %v2004_v15 = vpop.permute.xlu1 %2003  ;;  %1779 = vrot.lane.b32.xlu0 %v6389_v16, %s5434_s24  ;;  %v1407_v16 = vrot.slane %v1405_v22, 5  ;;  %v1403_v38 = vrot.slane %v1402_v26, 4  ;;  %v1694_v2 = vrot.slane %v1692_v17, 4  ;;  %v1693_v7 = vsel %vm5570_vm14, %v5013_v60, %v1692_v17 }
  0xca   : > { %2049 = vst.msk [vmem:[#allocation3 + $0x18] sm:$0xff] %vm2045_vm5, %v2004_v15  ;;  %v1435_v22 = vrot.slane %v1433_v49, 4  ;;  %v1427_v39 = vrot.slane %v1426_v20, 4 }
  0xcb   : > { %1781 = vrot.lane.b32.xlu1 %v5027_v6, %s5434_s24  ;;  %v2072_v36 = vpop.permute.xlu0 %2071  ;;  %v1412_v3 = vor.u32 %v1411_v1, %v1407_v16  ;;  %v1408_v43 = vsel %vm5584_vm15, %v1403_v38, %v1407_v16  ;;  %v1696_v61 = vsel %vm5570_vm14, %v1694_v2, %v1695_v44  ;;  %v1699_v16 = vrot.slane %v6368_v30, 5 }
  0xcc   : > { %2118 = vst.msk [vmem:[#allocation3 + $0x10] sm:$0xff] %vm2115_vm8, %v2072_v36  ;;  %v5029_v15 = vcombine.low %v1693_v7, %v1696_v61  ;;  %v1444_v1 = vshrl.u32 %v6408_v12, 16 }
  0xcd   : > { %v2074_v5 = vpop.permute.xlu1 %2073  ;;  %1849 = vrot.lane.b32.xlu0 %v6160_v50, %s5435_s25  ;;  %v1413_v10 = vrot.slane %v1412_v3, 4  ;;  %v1701_v31 = vrot.slane %v1699_v16, 4 }
  0xce   : > { %2119 = vst.msk [vmem:[#allocation3 + $0x18] sm:$0xff] %vm2115_vm8, %v2074_v5  ;;  %v1447_v5 = vshll.u32 %v6408_v12, 16 }
  0xcf   : > { %1851 = vrot.lane.b32.xlu1 %v6188_v33, %s5435_s25  ;;  %v2164_v48 = vpop.permute.xlu0 %2163  ;;  %v1418_v24 = vsel %vm5584_vm15, %v1413_v10, %v1417_v40  ;;  %v1459_v40 = vrot.slane %v1457_v28, 4  ;;  %v6624_v28 = vld [vmem:[#allocation2 + $0xd0] sm:$0xf] }
  0xd0   : > { %2210 = vst.msk [vmem:[#allocation3 + $0x10] sm:$0xff] %vm2207_vm9, %v2164_v48  ;;  %v6515_v19 = vcombine.low %v1408_v43, %v1418_v24  ;;  %v1441_v48 = vrot.slane %v1439_v54, 5  ;;  %v1449_v10 = vrot.slane %v1447_v5, 5 }
  0xd1   : > { %v2166_v50 = vpop.permute.xlu1 %2165  ;;  %1941 = vrot.lane.b32.xlu0 %v6437_v58, %s5440_s9 }
  0xd2   : > { %2211 = vst.msk [vmem:[#allocation3 + $0x18] sm:$0xff] %vm2207_vm9, %v2166_v50  ;;  %v1702_v50 = vrot.slane %v957_v52, 5 }
  0xd3   : > { %1943 = vrot.lane.b32.xlu1 %v4996_v57, %s5440_s9  ;;  %v2240_v4 = vpop.permute.xlu0 %2239 }
  0xd4   : > { %2286 = vst.msk [vmem:[#allocation3 + $0x10] sm:$0xff] %vm8029_vm10, %v2240_v4  ;;  %v1446_v4 = vrot.slane %v1444_v1, 4  ;;  %v1703_v24 = vsel %vm5570_vm14, %v1701_v31, %v1702_v50  ;;  %v2146_v50 = vshrl.u32 %v6624_v28, 16 }
  0xd5   : > { %v1524_v13 = vpop.permute.xlu1 %1523  ;;  %2017 = vrot.lane.b32.xlu0 %v5027_v6, %s5438_s28 }
  0xd6   : > { %1568 = vst.msk [vmem:[#allocation3 + $0x20] sm:$0xff] %vm1563_vm2, %v1524_v13 }
  0xd7   : > { %2019 = vrot.lane.b32.xlu1 %v6496_v21, %s5438_s28  ;;  %v2242_v58 = vpop.permute.xlu0 %2241 }
  0xd8   : > { %2287 = vst.msk [vmem:[#allocation3 + $0x18] sm:$0xff] %vm8029_vm10, %v2242_v58 }
  0xd9   : > { %v1526_v63 = vpop.permute.xlu1 %1525  ;;  %2087 = vrot.lane.b32.xlu0 %v6188_v33, %s5436_s26  ;;  %v1429_v33 = vshll.u32 %v6368_v30, 16  ;;  %v5014_v30 = vrot.slane %v6366_v34, 9  ;;  %v960_v34 = vld [vmem:[#allocation2 + $0xbc] sm:$0x1] }
  0xda   : > { %1569 = vst.msk [vmem:[#allocation3 + $0x28] sm:$0xff] %vm1563_vm2, %v1526_v63  ;;  %v1450_v63 = vor.u32 %v1449_v10, %v1446_v4  ;;  %v1709_v56 = vrot.slane %v960_v34, 5  ;;  %v2142_v4 = vshll.u32 %v6624_v28, 16 }
  0xdb   : > { %2089 = vrot.lane.b32.xlu1 %v6224_v53, %s5436_s26  ;;  %v1768_v6 = vpop.permute.xlu0 %1767  ;;  %v2302_v51 = vld [vmem:[#allocation3 + $0x10] sm:$0xff]  ;;  %v1431_v59 = vrot.slane %v1429_v33, 5  ;;  %v1700_v43 = vsel %vm5570_vm14, %v5014_v30, %v1699_v16 }
  0xdc   : > { %1812 = vst.msk [vmem:[#allocation3 + $0x20] sm:$0xff] %vm1807_vm4, %v1768_v6  ;;  %5300 = vmatprep.mubr.msk.bf16.mxu0 %vm8028_vm1, %v2302_v51  ;;  %v6575_v6 = vcombine.low %v1700_v43, %v1703_v24  ;;  %v1451_v51 = vrot.slane %v1450_v63, 4  ;;  %v2144_v43 = vrot.slane %v2142_v4, 5  ;;  %v2148_v24 = vrot.slane %v2146_v50, 4 }
  0xdd   : > { %v1770_v32 = vpop.permute.xlu1 %1769  ;;  %2179 = vrot.lane.b32.xlu0 %v4996_v57, %s5441_s10  ;;  %v1436_v9 = vor.u32 %v1435_v22, %v1431_v59  ;;  %v1432_v3 = vsel %vm5584_vm15, %v1427_v39, %v1431_v59 }
  0xde   : > { %1813 = vst.msk [vmem:[#allocation3 + $0x28] sm:$0xff] %vm1807_vm4, %v1770_v32 }
  0xdf   : > { %2181 = vrot.lane.b32.xlu1 %v6515_v19, %s5441_s10  ;;  %v1838_v41 = vpop.permute.xlu0 %1837  ;;  %v2303_v11 = vld [vmem:[#allocation3 + $0x18] sm:$0xff]  ;;  %v1437_v14 = vrot.slane %v1436_v9, 4 }
  0xe0   : > { %1882 = vst.msk [vmem:[#allocation3 + $0x20] sm:$0xff] %vm1877_vm6, %v1838_v41  ;;  %5301 = vmatmul.mubr.msk.bf16.gmra.mrb[4].mxu0 %vm8028_vm1, %v2303_v11  ;;  %v6590_v41 = vld [vmem:[#allocation2 + $0xc0] sm:$0xf]  ;;  %v6592_v11 = vld [vmem:[#allocation2 + $0xc4] sm:$0xf] }
  0xe1   : > { %v1840_v46 = vpop.permute.xlu1 %1839  ;;  %2255 = vrot.lane.b32.xlu0 %v6496_v21, %s5439_s29  ;;  %v1442_v38 = vsel %vm5584_vm15, %v1437_v14, %v1441_v48  ;;  %v1904_v52 = vshll.u32 %v6592_v11, 16  ;;  %v963_v48 = vld [vmem:[#allocation2 + $0xc8] sm:$0x1] }
  0xe2   : > { %1883 = vst.msk [vmem:[#allocation3 + $0x28] sm:$0xff] %vm1877_vm6, %v1840_v46  ;;  %v6563_v58 = vcombine.low %v1432_v3, %v1442_v38  ;;  %v6627_v3 = vld [vmem:[#allocation2 + $0xcc] sm:$0xf] }
  0xe3   : > { %1539 = vrot.lane.b32.xlu1 %v4996_v57, %s5437_s27  ;;  %v1930_v36 = vpop.permute.xlu0 %1929  ;;  %v1453_v57 = vshll.u32 %v6410_v47, 16  ;;  %v1906_v16 = vrot.slane %v1904_v52, 5  ;;  %v2133_v10 = vshrl.u32 %v6627_v3, 16 }
  0xe4   : > { %1974 = vst.msk [vmem:[#allocation3 + $0x20] sm:$0xff] %vm1969_vm7, %v1930_v36 }
  0xe5   : > { %v1932_v25 = vpop.permute.xlu1 %1931  ;;  %2257 = vrot.lane.b32.xlu0 %v5029_v15, %s5439_s29 }
  0xe6   : > { %1975 = vst.msk [vmem:[#allocation3 + $0x28] sm:$0xff] %vm1969_vm7, %v1932_v25 }
  0xe7   : > { %1541 = vrot.lane.b32.xlu1 %v6515_v19, %s5437_s27  ;;  %v2006_v23 = vpop.permute.xlu0 %2005 }
  0xe8   : > { %2050 = vst.msk [vmem:[#allocation3 + $0x20] sm:$0xff] %vm2045_vm5, %v2006_v23 }
  0xe9   : > { %v2008_v55 = vpop.permute.xlu1 %2007  ;;  %1783 = vrot.lane.b32.xlu0 %v6496_v21, %s5434_s24  ;;  %v1455_v21 = vrot.slane %v1453_v57, 5 }
  0xea   : > { %2051 = vst.msk [vmem:[#allocation3 + $0x28] sm:$0xff] %vm2045_vm5, %v2008_v55 }
  0xeb   : > { %1785 = vrot.lane.b32.xlu1 %v5029_v15, %s5434_s24  ;;  %v2076_v26 = vpop.permute.xlu0 %2075  ;;  %v1460_v60 = vor.u32 %v1459_v40, %v1455_v21  ;;  %v1456_v32 = vsel %vm5584_vm15, %v1451_v51, %v1455_v21  ;;  %v2136_v21 = vshll.u32 %v6627_v3, 16 }
  0xec   : > { %2120 = vst.msk [vmem:[#allocation3 + $0x20] sm:$0xff] %vm2115_vm8, %v2076_v26  ;;  %v1914_v26 = vshll.u32 %v963_v48, 16 }
  0xed   : > { %v2078_v13 = vpop.permute.xlu1 %2077  ;;  %1853 = vrot.lane.b32.xlu0 %v6224_v53, %s5435_s25  ;;  %v1463_v53 = vshll.u32 %v960_v34, 16  ;;  %v1461_v42 = vrot.slane %v1460_v60, 4  ;;  %v5032_v60 = vcombine.low %v6590_v41, %v6592_v11 }
  0xee   : > { %2121 = vst.msk [vmem:[#allocation3 + $0x28] sm:$0xff] %vm2115_vm8, %v2078_v13  ;;  %v1916_v34 = vrot.slane %v1914_v26, 5 }
  0xef   : > { %1855 = vrot.lane.b32.xlu1 %v6378_v27, %s5435_s25  ;;  %v2168_v17 = vpop.permute.xlu0 %2167  ;;  %v1465_v62 = vrot.slane %v1463_v53, 5  ;;  %v5034_v53 = vrot.slane %v6590_v41, 9 }
  0xf0   : > { %2212 = vst.msk [vmem:[#allocation3 + $0x20] sm:$0xff] %vm2207_vm9, %v2168_v17  ;;  %v1989_v17 = vrot.slane %v6592_v11, 5 }
  0xf1   : > { %v2170_v2 = vpop.permute.xlu1 %2169  ;;  %1945 = vrot.lane.b32.xlu0 %v6515_v19, %s5440_s9  ;;  %v1706_v19 = vrot.slane %v6410_v47, 5  ;;  %v1466_v7 = vsel %vm5584_vm15, %v1461_v42, %v1465_v62  ;;  %v5015_v47 = vrot.slane %v6408_v12, 9  ;;  %v1908_v12 = vshrl.u32 %v6592_v11, 16 }
  0xf2   : > { %2213 = vst.msk [vmem:[#allocation3 + $0x28] sm:$0xff] %vm2207_vm9, %v2170_v2  ;;  %v6598_v46 = vcombine.low %v1456_v32, %v1466_v7  ;;  %v1992_v2 = vrot.slane %v963_v48, 5  ;;  %v1991_v42 = vrot.slane %v1989_v17, 4  ;;  %v2138_v62 = vrot.slane %v2136_v21, 5  ;;  %v6689_v48 = vld [vmem:[#allocation2] sm:$0xf] }
  0xf3   : > { %1947 = vrot.lane.b32.xlu1 %v6563_v58, %s5440_s9  ;;  %v2244_v44 = vpop.permute.xlu0 %2243  ;;  %v1708_v37 = vrot.slane %v1706_v19, 4  ;;  %v1707_v20 = vsel %vm5570_vm14, %v5015_v47, %v1706_v19  ;;  %v1910_v1 = vrot.slane %v1908_v12, 4  ;;  %v966_v19 = vld [vmem:[#allocation2 + $0xd4] sm:$0x1]  ;;  %v2149_v7 = vor.u32 %v2148_v24, %v2144_v43 }
  0xf4   : > { %2288 = vst.msk [vmem:[#allocation3 + $0x20] sm:$0xff] %vm8029_vm10, %v2244_v44  ;;  %v2135_v44 = vrot.slane %v2133_v10, 4  ;;  %v2152_v47 = vshll.u32 %v966_v19, 16  ;;  %v5036_v12 = vcombine.low %v6627_v3, %v6624_v28 }
  0xf5   : > { %v1528_v33 = vpop.permute.xlu1 %1527  ;;  %2021 = vrot.lane.b32.xlu0 %v5029_v15, %s5438_s28  ;;  %v1898_v15 = vshll.u32 %v6590_v41, 16  ;;  %v1710_v9 = vsel %vm5570_vm14, %v1708_v37, %v1709_v56  ;;  %v1911_v30 = vor.u32 %v1910_v1, %v1906_v16 }
  0xf6   : > { %1570 = vst.msk [vmem:[#allocation3 + $0x30] sm:$0xff] %vm1563_vm2, %v1528_v33  ;;  %v6619_v14 = vcombine.low %v1707_v20, %v1710_v9  ;;  %v2139_v11 = vor.u32 %v2138_v62, %v2135_v44  ;;  %v2230_v9 = vrot.slane %v966_v19, 5  ;;  %v5124_v62 = vrot.slane %v6689_v48, 9 }
  0xf7   : > { %2023 = vrot.lane.b32.xlu1 %v6575_v6, %s5438_s28  ;;  %v2246_v49 = vpop.permute.xlu0 %2245  ;;  %v1900_v39 = vrot.slane %v1898_v15, 5  ;;  %v1912_v13 = vrot.slane %v1911_v30, 4  ;;  %v2154_v15 = vrot.slane %v2152_v47, 5  ;;  %v3287_v30 = vshll.u32 %v6689_v48, 16 }
  0xf8   : > { %2289 = vst.msk [vmem:[#allocation3 + $0x28] sm:$0xff] %vm8029_vm10, %v2246_v49 }
  0xf9   : > { %v1530_v61 = vpop.permute.xlu1 %1529  ;;  %2091 = vrot.lane.b32.xlu0 %v6378_v27, %s5436_s26  ;;  %v1895_v27 = vshrl.u32 %v6590_v41, 16  ;;  %v1917_v51 = vsel %vm5584_vm15, %v1912_v13, %v1916_v34  ;;  %v1993_v41 = vsel %vm5570_vm14, %v1991_v42, %v1992_v2  ;;  %v3289_v10 = vrot.slane %v3287_v30, 5  ;;  %v3119_v13 = vld [vmem:[#allocation2 + $0x8] sm:$0x1] }
  0xfa   : > { %1571 = vst.msk [vmem:[#allocation3 + $0x38] sm:$0xff] %vm1563_vm2, %v1530_v61  ;;  %v1990_v61 = vsel %vm5570_vm14, %v5034_v53, %v1989_v17 }
  0xfb   : > { %2093 = vrot.lane.b32.xlu1 %v6418_v45, %s5436_s26  ;;  %v1772_v59 = vpop.permute.xlu0 %1771  ;;  %v2304_v22 = vld [vmem:[#allocation3 + $0x20] sm:$0xff]  ;;  %v1897_v23 = vrot.slane %v1895_v27, 4  ;;  %v5035_v56 = vcombine.low %v1990_v61, %v1993_v41  ;;  %v2150_v27 = vrot.slane %v2149_v7, 4 }
  0xfc   : > { %1814 = vst.msk [vmem:[#allocation3 + $0x30] sm:$0xff] %vm1807_vm4, %v1772_v59  ;;  %5304 = vmatprep.mubr.msk.bf16.mxu0 %vm8028_vm1, %v2304_v22  ;;  %v2227_v59 = vrot.slane %v6624_v28, 5  ;;  %v2140_v22 = vrot.slane %v2139_v11, 4 }
  0xfd   : > { %v1774_v36 = vpop.permute.xlu1 %1773  ;;  %2183 = vrot.lane.b32.xlu0 %v6563_v58, %s5441_s10  ;;  %v1901_v55 = vor.u32 %v1900_v39, %v1897_v23 }
  0xfe   : > { %1815 = vst.msk [vmem:[#allocation3 + $0x38] sm:$0xff] %vm1807_vm4, %v1774_v36  ;;  %v5038_v36 = vrot.slane %v6627_v3, 9  ;;  %v2229_v20 = vrot.slane %v2227_v59, 4 }
  0xff   : > { %2185 = vrot.lane.b32.xlu1 %v6598_v46, %s5441_s10  ;;  %v1842_v54 = vpop.permute.xlu0 %1841  ;;  %v2305_v25 = vld [vmem:[#allocation3 + $0x28] sm:$0xff]  ;;  %v1902_v40 = vrot.slane %v1901_v55, 4  ;;  %v3284_v55 = vshrl.u32 %v6689_v48, 16 }
 0x100   : > { %1884 = vst.msk [vmem:[#allocation3 + $0x30] sm:$0xff] %vm1877_vm6, %v1842_v54  ;;  %5305 = vmatmul.mubr.msk.bf16.gmra.mrb[8].mxu0 %vm8028_vm1, %v2305_v25  ;;  %v2145_v54 = vsel %vm5584_vm15, %v2140_v22, %v2144_v43  ;;  %v2155_v25 = vsel %vm5584_vm15, %v2150_v27, %v2154_v15  ;;  %v3303_v43 = vshll.u32 %v3119_v13, 16 }
 0x101   : > { %v1844_v5 = vpop.permute.xlu1 %1843  ;;  %2259 = vrot.lane.b32.xlu0 %v6575_v6, %s5439_s29  ;;  %v5037_v1 = vcombine.low %v2145_v54, %v2155_v25 }
 0x102   : > { %1885 = vst.msk [vmem:[#allocation3 + $0x38] sm:$0xff] %vm1877_vm6, %v1844_v5  ;;  %v2228_v5 = vsel %vm5570_vm14, %v5038_v36, %v2227_v59  ;;  %v3305_v53 = vrot.slane %v3303_v43, 5 }
 0x103   : > { %1543 = vrot.lane.b32.xlu1 %v6563_v58, %s5437_s27  ;;  %v1934_v57 = vpop.permute.xlu0 %1933 }
 0x104   : > { %1976 = vst.msk [vmem:[#allocation3 + $0x30] sm:$0xff] %vm1969_vm7, %v1934_v57  ;;  %v6691_v57 = vld [vmem:[#allocation2 + $0x4] sm:$0xf] }
 0x105   : > { %v1936_v31 = vpop.permute.xlu1 %1935  ;;  %2261 = vrot.lane.b32.xlu0 %v6619_v14, %s5439_s29  ;;  %v3293_v26 = vshll.u32 %v6691_v57, 16  ;;  %v3297_v3 = vshrl.u32 %v6691_v57, 16 }
 0x106   : > { %1977 = vst.msk [vmem:[#allocation3 + $0x38] sm:$0xff] %vm1969_vm7, %v1936_v31 }
 0x107   : > { %1545 = vrot.lane.b32.xlu1 %v6598_v46, %s5437_s27  ;;  %v2010_v38 = vpop.permute.xlu0 %2009  ;;  %v3295_v21 = vrot.slane %v3293_v26, 5 }
 0x108   : > { %2052 = vst.msk [vmem:[#allocation3 + $0x30] sm:$0xff] %vm2045_vm5, %v2010_v38  ;;  %v3286_v38 = vrot.slane %v3284_v55, 4 }
 0x109   : > { %v2012_v58 = vpop.permute.xlu1 %2011  ;;  %1787 = vrot.lane.b32.xlu0 %v6575_v6, %s5434_s24  ;;  %v1907_v6 = vsel %vm5584_vm15, %v1902_v40, %v1906_v16  ;;  %v3299_v40 = vrot.slane %v3297_v3, 4 }
 0x10a   : > { %2053 = vst.msk [vmem:[#allocation3 + $0x38] sm:$0xff] %vm2045_vm5, %v2012_v58  ;;  %v5033_v32 = vcombine.low %v1907_v6, %v1917_v51  ;;  %v3290_v17 = vor.u32 %v3289_v10, %v3286_v38  ;;  %v3797_v51 = vrot.slane %v6691_v57, 5 }
 0x10b   : > { %1789 = vrot.lane.b32.xlu1 %v6619_v14, %s5434_s24  ;;  %v2080_v63 = vpop.permute.xlu0 %2079  ;;  %v3300_v58 = vor.u32 %v3299_v40, %v3295_v21 }
 0x10c   : > { %2122 = vst.msk [vmem:[#allocation3 + $0x30] sm:$0xff] %vm2115_vm8, %v2080_v63  ;;  %v3291_v63 = vrot.slane %v3290_v17, 4 }
 0x10d   : > { %v2082_v33 = vpop.permute.xlu1 %2081  ;;  %1857 = vrot.lane.b32.xlu0 %v6418_v45, %s5435_s25 }
 0x10e   : > { %2123 = vst.msk [vmem:[#allocation3 + $0x38] sm:$0xff] %vm2115_vm8, %v2082_v33  ;;  %v3296_v44 = vsel %vm5584_vm15, %v3291_v63, %v3295_v21  ;;  %v3800_v33 = vrot.slane %v3119_v13, 5 }
 0x10f   : > { %1859 = vrot.lane.b32.xlu1 %v5032_v60, %s5435_s25  ;;  %v2172_v49 = vpop.permute.xlu0 %2171 }
 0x110   : > { %2214 = vst.msk [vmem:[#allocation3 + $0x30] sm:$0xff] %vm2207_vm9, %v2172_v49  ;;  %v3799_v49 = vrot.slane %v3797_v51, 4 }
 0x111   : > { %v2174_v37 = vpop.permute.xlu1 %2173  ;;  %1949 = vrot.lane.b32.xlu0 %v6598_v46, %s5440_s9 }
 0x112   : > { %2215 = vst.msk [vmem:[#allocation3 + $0x38] sm:$0xff] %vm2207_vm9, %v2174_v37  ;;  %v3801_v61 = vsel %vm5570_vm14, %v3799_v49, %v3800_v33 }
 0x113   : > { %1951 = vrot.lane.b32.xlu1 %v5033_v32, %s5440_s9  ;;  %v2248_v45 = vpop.permute.xlu0 %2247 }
 0x114   : > { %2290 = vst.msk [vmem:[#allocation3 + $0x30] sm:$0xff] %vm8029_vm10, %v2248_v45 }
 0x115   : > { %v1532_v52 = vpop.permute.xlu1 %1531  ;;  %2025 = vrot.lane.b32.xlu0 %v6619_v14, %s5438_s28  ;;  %v2231_v14 = vsel %vm5570_vm14, %v2229_v20, %v2230_v9 }
 0x116   : > { %1572 = vst.msk [vmem:[#allocation3 + $0x40] sm:$0xff] %vm1563_vm2, %v1532_v52  ;;  %v5039_v31 = vcombine.low %v2228_v5, %v2231_v14 }
 0x117   : > { %2027 = vrot.lane.b32.xlu1 %v5035_v56, %s5438_s28  ;;  %v2250_v46 = vpop.permute.xlu0 %2249 }
 0x118   : > { %2291 = vst.msk [vmem:[#allocation3 + $0x38] sm:$0xff] %vm8029_vm10, %v2250_v46 }
 0x119   : > { %v1534_v23 = vpop.permute.xlu1 %1533  ;;  %2095 = vrot.lane.b32.xlu0 %v5032_v60, %s5436_s26  ;;  %v3301_v60 = vrot.slane %v3300_v58, 4 }
 0x11a   : > { %1573 = vst.msk [vmem:[#allocation3 + $0x48] sm:$0xff] %vm1563_vm2, %v1534_v23 }
 0x11b   : > { %2097 = vrot.lane.b32.xlu1 %v5036_v12, %s5436_s26  ;;  %v1776_v39 = vpop.permute.xlu0 %1775  ;;  %v2306_v16 = vld [vmem:[#allocation3 + $0x30] sm:$0xff]  ;;  %v3306_v6 = vsel %vm5584_vm15, %v3301_v60, %v3305_v53 }
 0x11c   : > { %1816 = vst.msk [vmem:[#allocation3 + $0x40] sm:$0xff] %vm1807_vm4, %v1776_v39  ;;  %5308 = vmatprep.mubr.msk.bf16.mxu0 %vm8028_vm1, %v2306_v16  ;;  %v5108_v42 = vcombine.low %v3296_v44, %v3306_v6 }
 0x11d   : > { %v1778_v28 = vpop.permute.xlu1 %1777  ;;  %2187 = vrot.lane.b32.xlu0 %v5033_v32, %s5441_s10  ;;  %v3798_v32 = vsel %vm5570_vm14, %v5124_v62, %v3797_v51 }
 0x11e   : > { %1817 = vst.msk [vmem:[#allocation3 + $0x48] sm:$0xff] %vm1807_vm4, %v1778_v28  ;;  %v5140_v41 = vcombine.low %v3798_v32, %v3801_v61 }
 0x11f   : > { %2189 = vrot.lane.b32.xlu1 %v5037_v1, %s5441_s10  ;;  %v1846_v50 = vpop.permute.xlu0 %1845  ;;  %v2307_v4 = vld [vmem:[#allocation3 + $0x38] sm:$0xff] }
 0x120   : > { %1886 = vst.msk [vmem:[#allocation3 + $0x40] sm:$0xff] %vm1877_vm6, %v1846_v50  ;;  %5309 = vmatmul.mubr.msk.bf16.gmra.mrb[12].mxu0 %vm8028_vm1, %v2307_v4 }
 0x121   : > { %v1848_v34 = vpop.permute.xlu1 %1847  ;;  %2263 = vrot.lane.b32.xlu0 %v5035_v56, %s5439_s29 }
 0x122   : > { %1887 = vst.msk [vmem:[#allocation3 + $0x48] sm:$0xff] %vm1877_vm6, %v1848_v34 }
 0x123   : > { %2265 = vrot.lane.b32.xlu1 %v5039_v31, %s5439_s29  ;;  %v1938_v24 = vpop.permute.xlu0 %1937 }
 0x124   : > { %1978 = vst.msk [vmem:[#allocation3 + $0x40] sm:$0xff] %vm1969_vm7, %v1938_v24 }
 0x125   : > { %v1940_v2 = vpop.permute.xlu1 %1939  ;;  %3715 = vrot.lane.b32.xlu0 %v5108_v42, %s5437_s27 }
 0x126   : > { %1979 = vst.msk [vmem:[#allocation3 + $0x48] sm:$0xff] %vm1969_vm7, %v1940_v2 }
 0x127   : > { %v2014_v19 = vpop.permute.xlu0 %2013 }
 0x128   : > { %2054 = vst.msk [vmem:[#allocation3 + $0x40] sm:$0xff] %vm2045_vm5, %v2014_v19 }
 0x129   : > { %v2016_v7 = vpop.permute.xlu1 %2015  ;;  %3955 = vrot.lane.b32.xlu0 %v5140_v41, %s5434_s24 }
 0x12a   : > { %2055 = vst.msk [vmem:[#allocation3 + $0x48] sm:$0xff] %vm2045_vm5, %v2016_v7 }
 0x12b   : > { %v2084_v11 = vpop.permute.xlu0 %2083 }
 0x12c   : > { %2124 = vst.msk [vmem:[#allocation3 + $0x40] sm:$0xff] %vm2115_vm8, %v2084_v11 }
 0x12d   : > { %v2086_v47 = vpop.permute.xlu1 %2085 }
 0x12e   : > { %2125 = vst.msk [vmem:[#allocation3 + $0x48] sm:$0xff] %vm2115_vm8, %v2086_v47 }
 0x12f   : > { %v2176_v37 = vpop.permute.xlu0 %2175 }
 0x130   : > { %2216 = vst.msk [vmem:[#allocation3 + $0x40] sm:$0xff] %vm2207_vm9, %v2176_v37  ;;  %v6782_v37 = vld [vmem:[%s8024_s3] ss:$0 sm:$0xff] }
 0x131   : > { %v2178_v45 = vpop.permute.xlu1 %2177 }
 0x132   : > { %2217 = vst.msk [vmem:[#allocation3 + $0x48] sm:$0xff] %vm2207_vm9, %v2178_v45 }
 0x133   : > { %v2252_v56 = vpop.permute.xlu0 %2251 }
 0x134   : > { %2292 = vst.msk [vmem:[#allocation3 + $0x40] sm:$0xff] %vm8029_vm10, %v2252_v56 }
 0x135   : > { %v1536_v59 = vpop.permute.xlu1 %1535 }
 0x136   : > { %1574 = vst.msk [vmem:[#allocation3 + $0x50] sm:$0xff] %vm1563_vm2, %v1536_v59 }
 0x137   : > { %v2254_v22 = vpop.permute.xlu0 %2253 }
 0x138   : > { %2293 = vst.msk [vmem:[#allocation3 + $0x48] sm:$0xff] %vm8029_vm10, %v2254_v22 }
 0x139   : > { %v1538_v27 = vpop.permute.xlu1 %1537 }
 0x13a   : > { %1575 = vst.msk [vmem:[#allocation3 + $0x58] sm:$0xff] %vm1563_vm2, %v1538_v27 }
 0x13b   : > { %v1780_v15 = vpop.permute.xlu0 %1779  ;;  %v2308_v52 = vld [vmem:[#allocation3 + $0x40] sm:$0xff] }
 0x13c   : > { %1818 = vst.msk [vmem:[#allocation3 + $0x50] sm:$0xff] %vm1807_vm4, %v1780_v15  ;;  %5312 = vmatprep.mubr.msk.bf16.mxu0 %vm8028_vm1, %v2308_v52 }
 0x13d   : > { %v1782_v46 = vpop.permute.xlu1 %1781 }
 0x13e   : > { %1819 = vst.msk [vmem:[#allocation3 + $0x58] sm:$0xff] %vm1807_vm4, %v1782_v46 }
 0x13f   : > { %v1850_v12 = vpop.permute.xlu0 %1849  ;;  %v2309_v36 = vld [vmem:[#allocation3 + $0x48] sm:$0xff] }
 0x140   : > { %1888 = vst.msk [vmem:[#allocation3 + $0x50] sm:$0xff] %vm1877_vm6, %v1850_v12  ;;  %5313 = vmatmul.mubr.msk.bf16.gmra.mrb[16].mxu0 %vm8028_vm1, %v2309_v36 }
 0x141   : > { %v1852_v20 = vpop.permute.xlu1 %1851 }
 0x142   : > { %1889 = vst.msk [vmem:[#allocation3 + $0x58] sm:$0xff] %vm1877_vm6, %v1852_v20 }
 0x143   : > { %v1942_v9 = vpop.permute.xlu0 %1941 }
 0x144   : > { %1980 = vst.msk [vmem:[#allocation3 + $0x50] sm:$0xff] %vm1969_vm7, %v1942_v9 }
 0x145   : > { %v1944_v54 = vpop.permute.xlu1 %1943 }
 0x146   : > { %1981 = vst.msk [vmem:[#allocation3 + $0x58] sm:$0xff] %vm1969_vm7, %v1944_v54 }
 0x147   : > { %v2018_v25 = vpop.permute.xlu0 %2017 }
 0x148   : > { %2056 = vst.msk [vmem:[#allocation3 + $0x50] sm:$0xff] %vm2045_vm5, %v2018_v25 }
 0x149   : > { %v2020_v23 = vpop.permute.xlu1 %2019 }
 0x14a   : > { %2057 = vst.msk [vmem:[#allocation3 + $0x58] sm:$0xff] %vm2045_vm5, %v2020_v23 }
 0x14b   : > { %v2088_v39 = vpop.permute.xlu0 %2087 }
 0x14c   : > { %2126 = vst.msk [vmem:[#allocation3 + $0x50] sm:$0xff] %vm2115_vm8, %v2088_v39 }
 0x14d   : > { %v2090_v16 = vpop.permute.xlu1 %2089 }
 0x14e   : > { %2127 = vst.msk [vmem:[#allocation3 + $0x58] sm:$0xff] %vm2115_vm8, %v2090_v16 }
 0x14f   : > { %v2180_v1 = vpop.permute.xlu0 %2179 }
 0x150   : > { %2218 = vst.msk [vmem:[#allocation3 + $0x50] sm:$0xff] %vm2207_vm9, %v2180_v1 }
 0x151   : > { %v2182_v5 = vpop.permute.xlu1 %2181 }
 0x152   : > { %2219 = vst.msk [vmem:[#allocation3 + $0x58] sm:$0xff] %vm2207_vm9, %v2182_v5 }
 0x153   : > { %v2256_v14 = vpop.permute.xlu0 %2255 }
 0x154   : > { %2294 = vst.msk [vmem:[#allocation3 + $0x50] sm:$0xff] %vm8029_vm10, %v2256_v14 }
 0x155   : > { %v1540_v28 = vpop.permute.xlu1 %1539 }
 0x156   : > { %1576 = vst.msk [vmem:[#allocation3 + $0x60] sm:$0xff] %vm1563_vm2, %v1540_v28 }
 0x157   : > { %v2258_v55 = vpop.permute.xlu0 %2257 }
 0x158   : > { %2295 = vst.msk [vmem:[#allocation3 + $0x58] sm:$0xff] %vm8029_vm10, %v2258_v55 }
 0x159   : > { %v1542_v30 = vpop.permute.xlu1 %1541 }
 0x15a   : > { %1577 = vst.msk [vmem:[#allocation3 + $0x68] sm:$0xff] %vm1563_vm2, %v1542_v30 }
 0x15b   : > { %v1784_v26 = vpop.permute.xlu0 %1783  ;;  %v2310_v3 = vld [vmem:[#allocation3 + $0x50] sm:$0xff] }
 0x15c   : > { %1820 = vst.msk [vmem:[#allocation3 + $0x60] sm:$0xff] %vm1807_vm4, %v1784_v26  ;;  %5316 = vmatprep.mubr.msk.bf16.mxu0 %vm8028_vm1, %v2310_v3  ;;  %v3012_v3 = vld [vmem:[#allocation2 + $0x18] sm:$0xf] }
 0x15d   : > { %v1786_v31 = vpop.permute.xlu1 %1785 }
 0x15e   : > { %1821 = vst.msk [vmem:[#allocation3 + $0x68] sm:$0xff] %vm1807_vm4, %v1786_v31 }
 0x15f   : > { %v1854_v50 = vpop.permute.xlu0 %1853  ;;  %v2311_v4 = vld [vmem:[#allocation3 + $0x58] sm:$0xff] }
 0x160   : > { %1890 = vst.msk [vmem:[#allocation3 + $0x60] sm:$0xff] %vm1877_vm6, %v1854_v50  ;;  %5317 = vmatmul.mubr.msk.bf16.gmra.mrb[20].mxu0 %vm8028_vm1, %v2311_v4 }
 0x161   : > { %v1856_v38 = vpop.permute.xlu1 %1855 }
 0x162   : > { %1891 = vst.msk [vmem:[#allocation3 + $0x68] sm:$0xff] %vm1877_vm6, %v1856_v38 }
 0x163   : > { %v1946_v10 = vpop.permute.xlu0 %1945 }
 0x164   : > { %1982 = vst.msk [vmem:[#allocation3 + $0x60] sm:$0xff] %vm1969_vm7, %v1946_v10  ;;  %v3005_v10 = vld [vmem:[#allocation2 + $0xc] sm:$0xf] }
 0x165   : > { %v1948_v21 = vpop.permute.xlu1 %1947 }
 0x166   : > { %1983 = vst.msk [vmem:[#allocation3 + $0x68] sm:$0xff] %vm1969_vm7, %v1948_v21 }
 0x167   : > { %v2022_v40 = vpop.permute.xlu0 %2021 }
 0x168   : > { %2058 = vst.msk [vmem:[#allocation3 + $0x60] sm:$0xff] %vm2045_vm5, %v2022_v40 }
 0x169   : > { %v2024_v13 = vpop.permute.xlu1 %2023 }
 0x16a   : > { %2059 = vst.msk [vmem:[#allocation3 + $0x68] sm:$0xff] %vm2045_vm5, %v2024_v13 }
 0x16b   : > { %v2092_v34 = vpop.permute.xlu0 %2091 }
 0x16c   : > { %2128 = vst.msk [vmem:[#allocation3 + $0x60] sm:$0xff] %vm2115_vm8, %v2092_v34  ;;  %v3016_v34 = vld [vmem:[#allocation2 + $0x20] sm:$0x1] }
 0x16d   : > { %v2094_v17 = vpop.permute.xlu1 %2093 }
 0x16e   : > { %2129 = vst.msk [vmem:[#allocation3 + $0x68] sm:$0xff] %vm2115_vm8, %v2094_v17 }
 0x16f   : > { %v2184_v58 = vpop.permute.xlu0 %2183 }
 0x170   : > { %2220 = vst.msk [vmem:[#allocation3 + $0x60] sm:$0xff] %vm2207_vm9, %v2184_v58 }
 0x171   : > { %v2186_v43 = vpop.permute.xlu1 %2185 }
 0x172   : > { %2221 = vst.msk [vmem:[#allocation3 + $0x68] sm:$0xff] %vm2207_vm9, %v2186_v43 }
 0x173   : > { %v2260_v24 = vpop.permute.xlu0 %2259 }
 0x174   : > { %2296 = vst.msk [vmem:[#allocation3 + $0x60] sm:$0xff] %vm8029_vm10, %v2260_v24 }
 0x175   : > { %v1544_v63 = vpop.permute.xlu1 %1543 }
 0x176   : > { %1578 = vst.msk [vmem:[#allocation3 + $0x70] sm:$0xff] %vm1563_vm2, %v1544_v63 }
 0x177   : > { %v2262_v60 = vpop.permute.xlu0 %2261 }
 0x178   : > { %2297 = vst.msk [vmem:[#allocation3 + $0x68] sm:$0xff] %vm8029_vm10, %v2262_v60 }
 0x179   : > { %v1546_v53 = vpop.permute.xlu1 %1545 }
 0x17a   : > { %1579 = vst.msk [vmem:[#allocation3 + $0x78] sm:$0xff] %vm1563_vm2, %v1546_v53 }
 0x17b   : > { %v1788_v2 = vpop.permute.xlu0 %1787  ;;  %v2312_v44 = vld [vmem:[#allocation3 + $0x60] sm:$0xff] }
 0x17c   : > { %1822 = vst.msk [vmem:[#allocation3 + $0x70] sm:$0xff] %vm1807_vm4, %v1788_v2  ;;  %5320 = vmatprep.mubr.msk.bf16.mxu0 %vm8028_vm1, %v2312_v44  ;;  %v3009_v2 = vld [vmem:[#allocation2 + $0x14] sm:$0x1] }
 0x17d   : > { %v1790_v6 = vpop.permute.xlu1 %1789 }
 0x17e   : > { %1823 = vst.msk [vmem:[#allocation3 + $0x78] sm:$0xff] %vm1807_vm4, %v1790_v6 }
 0x17f   : > { %v1858_v51 = vpop.permute.xlu0 %1857  ;;  %v2313_v42 = vld [vmem:[#allocation3 + $0x68] sm:$0xff] }
 0x180   : > { %1892 = vst.msk [vmem:[#allocation3 + $0x70] sm:$0xff] %vm1877_vm6, %v1858_v51  ;;  %5321 = vmatmul.mubr.msk.bf16.gmra.mrb[24].mxu0 %vm8028_vm1, %v2313_v42 }
 0x181   : > { %v1860_v62 = vpop.permute.xlu1 %1859 }
 0x182   : > { %1893 = vst.msk [vmem:[#allocation3 + $0x78] sm:$0xff] %vm1877_vm6, %v1860_v62 }
 0x183   : > { %v1950_v33 = vpop.permute.xlu0 %1949 }
 0x184   : > { %1984 = vst.msk [vmem:[#allocation3 + $0x70] sm:$0xff] %vm1969_vm7, %v1950_v33 }
 0x185   : > { %v1952_v19 = vpop.permute.xlu1 %1951 }
 0x186   : > { %1985 = vst.msk [vmem:[#allocation3 + $0x78] sm:$0xff] %vm1969_vm7, %v1952_v19  ;;  %v5092_v19 = vcombine.low %v6689_v48, %v6691_v57 }
 0x187   : > { %v2026_v49 = vpop.permute.xlu0 %2025 }
 0x188   : > { %2060 = vst.msk [vmem:[#allocation3 + $0x70] sm:$0xff] %vm2045_vm5, %v2026_v49 }
 0x189   : > { %v2028_v32 = vpop.permute.xlu1 %2027  ;;  %3267 = vst.msk [vmem:[#allocation3] sm:$0xff] %vm1063_vm13, %v5092_v19 }
 0x18a   : > { %2061 = vst.msk [vmem:[#allocation3 + $0x78] sm:$0xff] %vm2045_vm5, %v2028_v32 }
 0x18b   : > { %v2096_v7 = vpop.permute.xlu0 %2095 }
 0x18c   : > { %2130 = vst.msk [vmem:[#allocation3 + $0x70] sm:$0xff] %vm2115_vm8, %v2096_v7 }
 0x18d   : > { %v2098_v61 = vpop.permute.xlu1 %2097 }
 0x18e   : > { %2131 = vst.msk [vmem:[#allocation3 + $0x78] sm:$0xff] %vm2115_vm8, %v2098_v61 }
 0x18f   : > { %v2188_v41 = vpop.permute.xlu0 %2187 }
 0x190   : > { %2222 = vst.msk [vmem:[#allocation3 + $0x70] sm:$0xff] %vm2207_vm9, %v2188_v41 }
 0x191   : > { %v2190_v11 = vpop.permute.xlu1 %2189 }
 0x192   : > { %2223 = vst.msk [vmem:[#allocation3 + $0x78] sm:$0xff] %vm2207_vm9, %v2190_v11 }
 0x193   : > { %v2264_v47 = vpop.permute.xlu0 %2263 }
 0x194   : > { %2298 = vst.msk [vmem:[#allocation3 + $0x70] sm:$0xff] %vm8029_vm10, %v2264_v47 }
 0x195   : > { %v2266_v45 = vpop.permute.xlu1 %2265 }
 0x196   : > { %2299 = vst.msk [vmem:[#allocation3 + $0x78] sm:$0xff] %vm8029_vm10, %v2266_v45 }
 0x197   : > { %v3716_v43 = vpop.permute.xlu0 %3715 }
 0x198   : > { %3763 = vst.msk [vmem:[#allocation3] sm:$0xff] %vm1563_vm2, %v3716_v43 }
 0x19b   : > { %v5298_v56 = vpop.f32.mrb[0].mxu0  ;;  %v2314_v39 = vld [vmem:[#allocation3 + $0x70] sm:$0xff]  ;;  %v3956_v7 = vpop.permute.xlu0 %3955 }
 0x19c   : > { %v2439_v59 = vadd.f32 %v5298_v56, %v6782_v37  ;;  %v2430_v22 = vpop.f32.mrb[1].mxu0  ;;  %5324 = vmatprep.mubr.msk.bf16.mxu0 %vm8028_vm1, %v2314_v39  ;;  %4003 = vst.msk [vmem:[#allocation3] sm:$0xff] %vm1807_vm4, %v3956_v7 }
 0x19d   : > { %v2431_v27 = vadd.f32 %v6782_v37, %v2430_v22  ;;  %v5299_v15 = vpop.f32.mrb[2].mxu0  ;;  %v2315_v28 = vld [vmem:[#allocation3 + $0x78] sm:$0xff] }
 0x19e   : > { %v2559_v52 = vmax.f32 %v2439_v59, 0.0  ;;  %v2442_v46 = vadd.f32 %v5299_v15, %v6782_v37  ;;  %v2433_v12 = vpop.f32.mrb[3].mxu0  ;;  %5325 = vmatmul.mubr.msk.bf16.gmra.mrb[28].mxu0 %vm8028_vm1, %v2315_v28  ;;  %vm8043_vm1 = vcmask 1041408  }
 0x19f   : > { %v2557_v36 = vmax.f32 %v2431_v27, 0.0  ;;  %v2434_v20 = vadd.f32 %v6782_v37, %v2433_v12  ;;  %vm8044_vm10 = vmmov %vm8043_vm1 }
 0x1a0   : > { %v5222_v9 = vpack.c.bf16 %v2559_v52, %v2559_v52  ;;  %v2560_v54 = vmax.f32 %v2442_v46, 0.0 }
 0x1a1   : > { %v5220_v25 = vpack.c.bf16 %v2557_v36, %v2557_v36  ;;  %v2558_v23 = vmax.f32 %v2434_v20, 0.0 }
 0x1a2   : > { %v2703_v16 = vshrl.u32 %v5222_v9, 16  ;;  %v5223_v1 = vpack.c.bf16 %v2560_v54, %v2560_v54  ;;  %v2706_v30 = vshll.u32 %v5222_v9, 16 }
 0x1a3   : > { %v2686_v5 = vshrl.u32 %v5220_v25, 16  ;;  %v5221_v14 = vpack.c.bf16 %v2558_v23, %v2558_v23  ;;  %v2689_v50 = vshll.u32 %v5220_v25, 16 }
 0x1a4   : > { %v2705_v55 = vrot.slane %v2703_v16, 7  ;;  %v2711_v26 = vshrl.u32 %v5223_v1, 16  ;;  %v2714_v40 = vshll.u32 %v5223_v1, 16 }
 0x1a5   : > { %v2688_v31 = vrot.slane %v2686_v5, 7  ;;  %v2694_v4 = vshrl.u32 %v5221_v14, 16  ;;  %v2697_v58 = vshll.u32 %v5221_v14, 16 }
 0x1a6   : > { %v2708_v38 = vor.u32 %v2706_v30, %v2705_v55  ;;  %v2713_v21 = vrot.slane %v2711_v26, 7  ;;  %v2709_v24 = vrot.slane %v2705_v55, 4 }
 0x1a7   : > { %v2691_v13 = vor.u32 %v2689_v50, %v2688_v31  ;;  %v2696_v17 = vrot.slane %v2694_v4, 7  ;;  %v2692_v44 = vrot.slane %v2688_v31, 4 }
 0x1a8   : > { %v3013_v63 = vsel %vm5540_vm12, %v2708_v38, %v3012_v3  ;;  %v2716_v60 = vor.u32 %v2714_v40, %v2713_v21  ;;  %v2718_v53 = vrot.slane %v2713_v21, 4 }
 0x1a9   : > { %3014 = vst [vmem:[#allocation2 + $0x18] sm:$0xf] %v3013_v63  ;;  %v3006_v6 = vsel %vm5540_vm12, %v2691_v13, %v3005_v10  ;;  %v2699_v51 = vor.u32 %v2697_v58, %v2696_v17  ;;  %v2701_v42 = vrot.slane %v2696_v17, 4 }
 0x1aa   : > { %3007 = vst [vmem:[#allocation2 + $0xc] sm:$0xf] %v3006_v6  ;;  %v2717_v62 = vsel %vm5528_vm11, %v2709_v24, %v2716_v60  ;;  %v3017_v33 = vsel %vm5482_vm3, %v2718_v53, %v3016_v34 }
 0x1ab   : > { %3015 = vst.msk [vmem:[#allocation2 + $0x1c] sm:$0xf] %vm226_vm0, %v2717_v62  ;;  %3018 = vst [vmem:[#allocation2 + $0x20] sm:$0x1] %v3017_v33  ;;  %v2700_v49 = vsel %vm5528_vm11, %v2692_v44, %v2699_v51  ;;  %v3010_v32 = vsel %vm5482_vm3, %v2701_v42, %v3009_v2  ;;  %v3026_v51 = vld [vmem:[#allocation2 + $0x30] sm:$0xf] }
 0x1ac   : > { %3008 = vst.msk [vmem:[#allocation2 + $0x10] sm:$0xf] %vm226_vm0, %v2700_v49  ;;  %3011 = vst [vmem:[#allocation2 + $0x14] sm:$0x1] %v3010_v32  ;;  %v3019_v32 = vld [vmem:[#allocation2 + $0x24] sm:$0xf] }
 0x1b0   : > { %v6811_v48 = vld [vmem:[#allocation2 + $0x18] sm:$0xf] }
 0x1b1   : > { %v6819_v11 = vld [vmem:[#allocation2 + $0xc] sm:$0xf]  ;;  %v5126_v27 = vrot.slane %v6811_v48, 9  ;;  %v3332_v38 = vshrl.u32 %v6811_v48, 16  ;;  %v3335_v13 = vshll.u32 %v6811_v48, 16 }
 0x1b2   : > { %v6813_v57 = vld [vmem:[#allocation2 + $0x1c] sm:$0xf]  ;;  %v6815_v61 = vld [vmem:[#allocation2 + $0x20] sm:$0x1]  ;;  %v5125_v25 = vrot.slane %v6819_v11, 9  ;;  %v3308_v43 = vshrl.u32 %v6819_v11, 16 }
 0x1b3   : > { %v5094_v41 = vcombine.low %v6811_v48, %v6813_v57  ;;  %v6821_v47 = vld [vmem:[#allocation2 + $0x10] sm:$0xf]  ;;  %v3811_v45 = vrot.slane %v6813_v57, 5  ;;  %v6826_v59 = vld [vmem:[#allocation2 + $0x14] sm:$0x1]  ;;  %v3814_v52 = vrot.slane %v6815_v61, 5 }
 0x1b4   : > { %v5093_v56 = vcombine.low %v6819_v11, %v6821_v47  ;;  %v3804_v22 = vrot.slane %v6821_v47, 5  ;;  %v3807_v20 = vrot.slane %v6826_v59, 5  ;;  %v5302_v54 = vpop.f32.mrb[4].mxu0  ;;  %v3345_v10 = vshrl.u32 %v6813_v57, 16 }
 0x1b5   : > { %4259 = vrot.lane.b32.xlu0 %v5094_v41, %s5436_s26  ;;  %3269 = vst.msk [vmem:[#allocation3 + $0x10] sm:$0xff] %vm1063_vm13, %v5094_v41  ;;  %4026 = vrot.lane.b32.xlu1 %v5094_v41, %s5435_s25  ;;  %v3813_v15 = vrot.slane %v3811_v45, 4  ;;  %v3812_v12 = vsel %vm5570_vm14, %v5126_v27, %v3811_v45  ;;  %v2455_v39 = vadd.f32 %v5302_v54, %v6782_v37  ;;  %v2446_v16 = vpop.f32.mrb[5].mxu0  ;;  %v3341_v58 = vshll.u32 %v6813_v57, 16 }
 0x1b6   : > { %3268 = vst.msk [vmem:[#allocation3 + $0x8] sm:$0xff] %vm1063_vm13, %v5093_v56  ;;  %v3806_v46 = vrot.slane %v3804_v22, 4  ;;  %v2447_v1 = vadd.f32 %v6782_v37, %v2446_v16  ;;  %v5303_v5 = vpop.f32.mrb[6].mxu0  ;;  %v3805_v14 = vsel %vm5570_vm14, %v5125_v25, %v3804_v22  ;;  %v3311_v24 = vshll.u32 %v6819_v11, 16  ;;  %v3030_v11 = vld [vmem:[#allocation2 + $0x38] sm:$0x1] }
 0x1b7   : > { %v3815_v36 = vsel %vm5570_vm14, %v3813_v15, %v3814_v52  ;;  %v2563_v28 = vmax.f32 %v2455_v39, 0.0  ;;  %v2458_v55 = vadd.f32 %v5303_v5, %v6782_v37  ;;  %v2449_v30 = vpop.f32.mrb[7].mxu0  ;;  %v3321_v44 = vshrl.u32 %v6821_v47, 16 }
 0x1b8   : > { %v5142_v9 = vcombine.low %v3812_v12, %v3815_v36  ;;  %v3808_v23 = vsel %vm5570_vm14, %v3806_v46, %v3807_v20  ;;  %v2561_v3 = vmax.f32 %v2447_v1, 0.0  ;;  %v2450_v31 = vadd.f32 %v6782_v37, %v2449_v30  ;;  %v3023_v12 = vld [vmem:[#allocation2 + $0x2c] sm:$0x1] }
 0x1b9   : > { %4024 = vrot.lane.b32.xlu0 %v5093_v56, %s5435_s25  ;;  %v5141_v26 = vcombine.low %v3805_v14, %v3808_v23  ;;  %v5226_v50 = vpack.c.bf16 %v2563_v28, %v2563_v28  ;;  %v2564_v4 = vmax.f32 %v2458_v55, 0.0  ;;  %v3347_v19 = vrot.slane %v3345_v10, 4 }
 0x1ba   : > { %4192 = vrot.lane.b32.xlu1 %v5142_v9, %s5438_s28  ;;  %v5224_v21 = vpack.c.bf16 %v2561_v3, %v2561_v3  ;;  %v2562_v40 = vmax.f32 %v2450_v31, 0.0  ;;  %v3343_v57 = vrot.slane %v3341_v58, 5  ;;  %v3317_v22 = vshll.u32 %v6821_v47, 16 }
 0x1bb   : > { %v2737_v34 = vshrl.u32 %v5226_v50, 16  ;;  %v5227_v17 = vpack.c.bf16 %v2564_v4, %v2564_v4  ;;  %v2740_v2 = vshll.u32 %v5226_v50, 16  ;;  %v3334_v23 = vrot.slane %v3332_v38, 4 }
 0x1bc   : > { %v2720_v63 = vshrl.u32 %v5224_v21, 16  ;;  %v5225_v60 = vpack.c.bf16 %v2562_v40, %v2562_v40  ;;  %v2723_v62 = vshll.u32 %v5224_v21, 16  ;;  %v3337_v39 = vrot.slane %v3335_v13, 5 }
 0x1bd   : > { %4425 = vrot.lane.b32.xlu0 %v5142_v9, %s5439_s29  ;;  %v2739_v53 = vrot.slane %v2737_v34, 7  ;;  %v2745_v6 = vshrl.u32 %v5227_v17, 16  ;;  %v2748_v48 = vshll.u32 %v5227_v17, 16  ;;  %v3348_v5 = vor.u32 %v3347_v19, %v3343_v57 }
 0x1be   : > { %3957 = vrot.lane.b32.xlu1 %v5141_v26, %s5434_s24  ;;  %v2722_v42 = vrot.slane %v2720_v63, 7  ;;  %v2728_v33 = vshrl.u32 %v5225_v60, 16  ;;  %v2731_v56 = vshll.u32 %v5225_v60, 16  ;;  %v3319_v14 = vrot.slane %v3317_v22, 5 }
 0x1bf   : > { %v2742_v49 = vor.u32 %v2740_v2, %v2739_v53  ;;  %v2747_v7 = vrot.slane %v2745_v6, 7  ;;  %v2743_v27 = vrot.slane %v2739_v53, 4  ;;  %v3323_v28 = vrot.slane %v3321_v44, 4 }
 0x1c0   : > { %v2725_v41 = vor.u32 %v2723_v62, %v2722_v42  ;;  %v2730_v45 = vrot.slane %v2728_v33, 7  ;;  %v2726_v36 = vrot.slane %v2722_v42, 4  ;;  %v3351_v55 = vshll.u32 %v6815_v61, 16 }
 0x1c1   : > { %3959 = vrot.lane.b32.xlu0 %v5142_v9, %s5434_s24  ;;  %v3027_v15 = vsel %vm5540_vm12, %v2742_v49, %v3026_v51  ;;  %v2750_v52 = vor.u32 %v2748_v48, %v2747_v7  ;;  %v2752_v46 = vrot.slane %v2747_v7, 4  ;;  %v3338_v30 = vor.u32 %v3337_v39, %v3334_v23 }
 0x1c2   : > { %3028 = vst [vmem:[#allocation2 + $0x30] sm:$0xf] %v3027_v15  ;;  %v3020_v20 = vsel %vm5540_vm12, %v2725_v41, %v3019_v32  ;;  %v2733_v9 = vor.u32 %v2731_v56, %v2730_v45  ;;  %v2735_v54 = vrot.slane %v2730_v45, 4  ;;  %v3313_v3 = vrot.slane %v3311_v24, 5 }
 0x1c3   : > { %3021 = vst [vmem:[#allocation2 + $0x24] sm:$0xf] %v3020_v20  ;;  %v2751_v25 = vsel %vm5528_vm11, %v2743_v27, %v2750_v52  ;;  %v3031_v47 = vsel %vm5482_vm3, %v2752_v46, %v3030_v11  ;;  %v3349_v31 = vrot.slane %v3348_v5, 4  ;;  %v3324_v50 = vor.u32 %v3323_v28, %v3319_v14 }
 0x1c4   : > { %3029 = vst.msk [vmem:[#allocation2 + $0x34] sm:$0xf] %vm226_vm0, %v2751_v25  ;;  %3032 = vst [vmem:[#allocation2 + $0x38] sm:$0x1] %v3031_v47  ;;  %v2734_v16 = vsel %vm5528_vm11, %v2726_v36, %v2733_v9  ;;  %v3024_v1 = vsel %vm5482_vm3, %v2735_v54, %v3023_v12  ;;  %v3353_v4 = vrot.slane %v3351_v55, 5  ;;  %v3339_v21 = vrot.slane %v3338_v30, 4 }
 0x1c5   : > { %4190 = vrot.lane.b32.xlu0 %v5141_v26, %s5438_s28  ;;  %3022 = vst.msk [vmem:[#allocation2 + $0x28] sm:$0xf] %vm226_vm0, %v2734_v16  ;;  %3025 = vst [vmem:[#allocation2 + $0x2c] sm:$0x1] %v3024_v1  ;;  %v3310_v26 = vrot.slane %v3308_v43, 4  ;;  %v3327_v13 = vshll.u32 %v6826_v59, 16 }
 0x1c6   : > { %v3354_v58 = vsel %vm5584_vm15, %v3349_v31, %v3353_v4  ;;  %v3325_v24 = vrot.slane %v3324_v50, 4  ;;  %v3344_v59 = vsel %vm5584_vm15, %v3339_v21, %v3343_v57 }
 0x1c7   : > { %v3314_v40 = vor.u32 %v3313_v3, %v3310_v26  ;;  %v3329_v60 = vrot.slane %v3327_v13, 5  ;;  %v5110_v53 = vcombine.low %v3344_v59, %v3354_v58 }
 0x1c9   : > { %v6878_v38 = vld [vmem:[#allocation2 + $0x30] sm:$0xf]  ;;  %v3315_v63 = vrot.slane %v3314_v40, 4  ;;  %v3330_v2 = vsel %vm5584_vm15, %v3325_v24, %v3329_v60 }
 0x1ca   : > { %v6885_v17 = vld [vmem:[#allocation2 + $0x24] sm:$0xf]  ;;  %v3380_v33 = vshrl.u32 %v6878_v38, 16  ;;  %v3383_v19 = vshll.u32 %v6878_v38, 16  ;;  %v5128_v11 = vrot.slane %v6878_v38, 9 }
 0x1cb   : > { %v6880_v10 = vld [vmem:[#allocation2 + $0x34] sm:$0xf]  ;;  %v3320_v6 = vsel %vm5584_vm15, %v3315_v63, %v3319_v14  ;;  %v6906_v62 = vld [vmem:[#allocation2 + $0x38] sm:$0x1]  ;;  %v3356_v41 = vshrl.u32 %v6885_v17, 16  ;;  %v3359_v27 = vshll.u32 %v6885_v17, 16 }
 0x1cc   : > { %v5096_v34 = vcombine.low %v6878_v38, %v6880_v10  ;;  %v6887_v61 = vld [vmem:[#allocation2 + $0x28] sm:$0xf]  ;;  %v3825_v44 = vrot.slane %v6880_v10, 5  ;;  %v5109_v42 = vcombine.low %v3320_v6, %v3330_v2  ;;  %v3828_v52 = vrot.slane %v6906_v62, 5  ;;  %v6923_v9 = vld [vmem:[#allocation2 + $0x2c] sm:$0x1] }
 0x1cd   : > { %v5095_v43 = vcombine.low %v6885_v17, %v6887_v61  ;;  %v3818_v45 = vrot.slane %v6887_v61, 5  ;;  %v3393_v46 = vshrl.u32 %v6880_v10, 16  ;;  %v3369_v36 = vshrl.u32 %v6887_v61, 16  ;;  %v3033_v63 = vld [vmem:[#allocation2 + $0x3c] sm:$0xf] }
 0x1ce   : > { %4030 = vrot.lane.b32.xlu1 %v5096_v34, %s5435_s25  ;;  %3271 = vst.msk [vmem:[#allocation3 + $0x20] sm:$0xff] %vm1063_vm13, %v5096_v34  ;;  %4263 = vrot.lane.b32.xlu0 %v5096_v34, %s5436_s26  ;;  %v3827_v7 = vrot.slane %v3825_v44, 4  ;;  %v5127_v23 = vrot.slane %v6885_v17, 9  ;;  %v3826_v1 = vsel %vm5570_vm14, %v5128_v11, %v3825_v44  ;;  %v3821_v55 = vrot.slane %v6923_v9, 5  ;;  %v3040_v34 = vld [vmem:[#allocation2 + $0x48] sm:$0xf] }
 0x1cf   : > { %3270 = vst.msk [vmem:[#allocation3 + $0x18] sm:$0xff] %vm1063_vm13, %v5095_v43  ;;  %v3820_v5 = vrot.slane %v3818_v45, 4  ;;  %v3389_v30 = vshll.u32 %v6880_v10, 16  ;;  %v3382_v50 = vrot.slane %v3380_v33, 4  ;;  %v3395_v13 = vrot.slane %v3393_v46, 4 }
 0x1d0   : > { %v3829_v47 = vsel %vm5570_vm14, %v3827_v7, %v3828_v52  ;;  %v3044_v6 = vld [vmem:[#allocation2 + $0x50] sm:$0x1]  ;;  %v3399_v38 = vshll.u32 %v6906_v62, 16  ;;  %v3375_v62 = vshll.u32 %v6923_v9, 16 }
 0x1d1   : > { %v5144_v31 = vcombine.low %v3826_v1, %v3829_v47  ;;  %v3822_v59 = vsel %vm5570_vm14, %v3820_v5, %v3821_v55  ;;  %v3391_v2 = vrot.slane %v3389_v30, 5  ;;  %v3361_v1 = vrot.slane %v3359_v27, 5 }
 0x1d2   : > { %4117 = vrot.lane.b32.xlu1 %v5110_v53, %s5440_s9  ;;  %4350 = vrot.lane.b32.xlu0 %v5110_v53, %s5441_s10 }
 0x1d3   : > { %v5306_v51 = vpop.f32.mrb[8].mxu0 }
 0x1d4   : > { %v2471_v49 = vadd.f32 %v5306_v51, %v6782_v37  ;;  %v2462_v32 = vpop.f32.mrb[9].mxu0 }
 0x1d5   : > { %v2463_v48 = vadd.f32 %v6782_v37, %v2462_v32  ;;  %v5307_v57 = vpop.f32.mrb[10].mxu0 }
 0x1d6   : > { %4261 = vrot.lane.b32.xlu1 %v5095_v43, %s5436_s26  ;;  %4028 = vrot.lane.b32.xlu0 %v5095_v43, %s5435_s25  ;;  %v2567_v56 = vmax.f32 %v2471_v49, 0.0  ;;  %v2474_v22 = vadd.f32 %v5307_v57, %v6782_v37  ;;  %v2465_v15 = vpop.f32.mrb[11].mxu0  ;;  %v3365_v49 = vshll.u32 %v6887_v61, 16  ;;  %v3037_v57 = vld [vmem:[#allocation2 + $0x44] sm:$0x1] }
 0x1d7   : > { %v2565_v12 = vmax.f32 %v2463_v48, 0.0  ;;  %v2466_v20 = vadd.f32 %v6782_v37, %v2465_v15 }
 0x1d8   : > { %v5230_v54 = vpack.c.bf16 %v2567_v56, %v2567_v56  ;;  %v2568_v25 = vmax.f32 %v2474_v22, 0.0 }
 0x1d9   : > { %v5228_v39 = vpack.c.bf16 %v2565_v12, %v2565_v12  ;;  %v2566_v16 = vmax.f32 %v2466_v20, 0.0  ;;  %v3819_v12 = vsel %vm5570_vm14, %v5127_v23, %v3818_v45  ;;  %v3385_v20 = vrot.slane %v3383_v19, 5 }
 0x1da   : > { %3719 = vrot.lane.b32.xlu1 %v5110_v53, %s5437_s27  ;;  %4115 = vrot.lane.b32.xlu0 %v5109_v42, %s5440_s9  ;;  %v2771_v14 = vshrl.u32 %v5230_v54, 16  ;;  %v5231_v28 = vpack.c.bf16 %v2568_v25, %v2568_v25  ;;  %v2774_v21 = vshll.u32 %v5230_v54, 16  ;;  %v5143_v47 = vcombine.low %v3819_v12, %v3822_v59  ;;  %v5419_v12 = vld [vmem:[%s8023_s2 + $0x8] sm:$0xff]  }
 0x1db   : > { %v2754_v26 = vshrl.u32 %v5228_v39, 16  ;;  %v5229_v3 = vpack.c.bf16 %v2566_v16, %v2566_v16  ;;  %v2757_v43 = vshll.u32 %v5228_v39, 16  ;;  %v3396_v39 = vor.u32 %v3395_v13, %v3391_v2 }
 0x1dc   : > { %v2773_v4 = vrot.slane %v2771_v14, 7  ;;  %v2779_v40 = vshrl.u32 %v5231_v28, 16  ;;  %v2782_v53 = vshll.u32 %v5231_v28, 16  ;;  %v3367_v16 = vrot.slane %v3365_v49, 5 }
 0x1dd   : > { %v2756_v58 = vrot.slane %v2754_v26, 7  ;;  %v2762_v24 = vshrl.u32 %v5229_v3, 16  ;;  %v2765_v33 = vshll.u32 %v5229_v3, 16  ;;  %v3371_v45 = vrot.slane %v3369_v36, 4 }
 0x1de   : > { %3717 = vrot.lane.b32.xlu1 %v5109_v42, %s5437_s27  ;;  %4429 = vrot.lane.b32.xlu0 %v5144_v31, %s5439_s29  ;;  %v2776_v10 = vor.u32 %v2774_v21, %v2773_v4  ;;  %v2781_v60 = vrot.slane %v2779_v40, 7  ;;  %v2777_v32 = vrot.slane %v2773_v4, 4  ;;  %v3386_v19 = vor.u32 %v3385_v20, %v3382_v50 }
 0x1df   : > { %v2759_v44 = vor.u32 %v2757_v43, %v2756_v58  ;;  %v2764_v51 = vrot.slane %v2762_v24, 7  ;;  %v2760_v11 = vrot.slane %v2756_v58, 4  ;;  %v3358_v23 = vrot.slane %v3356_v41, 4 }
 0x1e0   : > { %v3041_v42 = vsel %vm5540_vm12, %v2776_v10, %v3040_v34  ;;  %v2784_v7 = vor.u32 %v2782_v53, %v2781_v60  ;;  %v2786_v48 = vrot.slane %v2781_v60, 4  ;;  %v3397_v5 = vrot.slane %v3396_v39, 4  ;;  %v5417_v34 = vld [vmem:[%s8023_s2] sm:$0xff]  }
 0x1e1   : > { %3042 = vst [vmem:[#allocation2 + $0x48] sm:$0xf] %v3041_v42  ;;  %v3034_v56 = vsel %vm5540_vm12, %v2759_v44, %v3033_v63  ;;  %v2767_v22 = vor.u32 %v2765_v33, %v2764_v51  ;;  %v2769_v15 = vrot.slane %v2764_v51, 4  ;;  %v3372_v14 = vor.u32 %v3371_v45, %v3367_v16  ;;  %5328 = vmatprep.subr.bf16.mxu1 %v5417_v34 }
 0x1e2   : > { %4196 = vrot.lane.b32.xlu1 %v5144_v31, %s5438_s28  ;;  %3963 = vrot.lane.b32.xlu0 %v5144_v31, %s5434_s24  ;;  %3035 = vst [vmem:[#allocation2 + $0x3c] sm:$0xf] %v3034_v56  ;;  %v2785_v52 = vsel %vm5528_vm11, %v2777_v32, %v2784_v7  ;;  %v3045_v46 = vsel %vm5482_vm3, %v2786_v48, %v3044_v6  ;;  %v3401_v28 = vrot.slane %v3399_v38, 5  ;;  %v3387_v55 = vrot.slane %v3386_v19, 4 }
 0x1e3   : > { %3043 = vst.msk [vmem:[#allocation2 + $0x4c] sm:$0xf] %vm226_vm0, %v2785_v52  ;;  %3046 = vst [vmem:[#allocation2 + $0x50] sm:$0x1] %v3045_v46  ;;  %v2768_v54 = vsel %vm5528_vm11, %v2760_v11, %v2767_v22  ;;  %v3038_v25 = vsel %vm5482_vm3, %v2769_v15, %v3037_v57  ;;  %v3362_v30 = vor.u32 %v3361_v1, %v3358_v23  ;;  %v3373_v31 = vrot.slane %v3372_v14, 4 }
 0x1e4   : > { %3036 = vst.msk [vmem:[#allocation2 + $0x40] sm:$0xf] %vm226_vm0, %v2768_v54  ;;  %3039 = vst [vmem:[#allocation2 + $0x44] sm:$0x1] %v3038_v25  ;;  %v3402_v27 = vsel %vm5584_vm15, %v3397_v5, %v3401_v28  ;;  %v3392_v9 = vsel %vm5584_vm15, %v3387_v55, %v3391_v2  ;;  %v3377_v4 = vrot.slane %v3375_v62, 5  ;;  %5329 = vmatpush3.bf16.msra.mxu1 %v5417_v34 }
 0x1e5   : > { %v3363_v50 = vrot.slane %v3362_v30, 4  ;;  %v5112_v21 = vcombine.low %v3392_v9, %v3402_v27  ;;  %5330 = vmatprep.subr.bf16.mxu1 %v5419_v12  ;;  %v5421_v62 = vld [vmem:[%s8023_s2 + $0x10] ss:$0 sps:$4 sm:$0x33]   ;;  %v3054_v9 = vld [vmem:[#allocation2 + $0x60] sm:$0xf] }
 0x1e6   : > { %3961 = vrot.lane.b32.xlu1 %v5143_v47, %s5434_s24  ;;  %4427 = vrot.lane.b32.xlu0 %v5143_v47, %s5439_s29  ;;  %v3378_v40 = vsel %vm5584_vm15, %v3373_v31, %v3377_v4 }
 0x1e7   : > { %v3368_v58 = vsel %vm5584_vm15, %v3363_v50, %v3367_v16 }
 0x1e8   : > { %v6973_v61 = vld [vmem:[#allocation2 + $0x48] sm:$0xf]  ;;  %v7005_v59 = vcombine.low %v3368_v58, %v3378_v40  ;;  %5331 = vmatpush3.bf16.msra.mxu1 %v5419_v12 }
 0x1e9   : > { %v6980_v41 = vld [vmem:[#allocation2 + $0x3c] sm:$0xf]  ;;  %v3428_v43 = vshrl.u32 %v6973_v61, 16  ;;  %v3431_v63 = vshll.u32 %v6973_v61, 16  ;;  %v5130_v32 = vrot.slane %v6973_v61, 9  ;;  %5367 = vmatprep.subr.msk.bf16.mxu1 %vm8044_vm10, %v5421_v62  ;;  %vm8046_vm10 = vcmask 293888  }
 0x1ea   : > { %4194 = vrot.lane.b32.xlu0 %v5143_v47, %s5438_s28  ;;  %v6975_v36 = vld [vmem:[#allocation2 + $0x4c] sm:$0xf]  ;;  %v7007_v10 = vld [vmem:[#allocation2 + $0x50] sm:$0x1]  ;;  %v3404_v33 = vshrl.u32 %v6980_v41, 16  ;;  %v3407_v49 = vshll.u32 %v6980_v41, 16 }
 0x1eb   : > { %v5098_v26 = vcombine.low %v6973_v61, %v6975_v36  ;;  %v6982_v17 = vld [vmem:[#allocation2 + $0x40] sm:$0xf]  ;;  %v3839_v13 = vrot.slane %v6975_v36, 5  ;;  %v3441_v42 = vshrl.u32 %v6975_v36, 16  ;;  %v3842_v11 = vrot.slane %v7007_v10, 5 }
 0x1ec   : > { %v5097_v3 = vcombine.low %v6980_v41, %v6982_v17  ;;  %v3832_v44 = vrot.slane %v6982_v17, 5  ;;  %v7021_v56 = vld [vmem:[#allocation2 + $0x44] sm:$0x1]  ;;  %v3417_v15 = vshrl.u32 %v6982_v17, 16  ;;  %v5129_v46 = vrot.slane %v6980_v41, 9 }
 0x1ed   : > { %4034 = vrot.lane.b32.xlu1 %v5098_v26, %s5435_s25  ;;  %3273 = vst.msk [vmem:[#allocation3 + $0x30] sm:$0xff] %vm1063_vm13, %v5098_v26  ;;  %v3841_v2 = vrot.slane %v3839_v13, 4  ;;  %v3840_v45 = vsel %vm5570_vm14, %v5130_v32, %v3839_v13  ;;  %v3835_v38 = vrot.slane %v7021_v56, 5  ;;  %v7039_v1 = vrot.slane %v3428_v43, 4  ;;  %v3047_v13 = vld [vmem:[#allocation2 + $0x54] sm:$0xf] }
 0x1ee   : > { %4267 = vrot.lane.b32.xlu0 %v5098_v26, %s5436_s26  ;;  %3272 = vst.msk [vmem:[#allocation3 + $0x28] sm:$0xff] %vm1063_vm13, %v5097_v3  ;;  %v3834_v47 = vrot.slane %v3832_v44, 4  ;;  %v3437_v5 = vshll.u32 %v6975_v36, 16  ;;  %v3443_v30 = vrot.slane %v3441_v42, 4  ;;  %v3419_v61 = vrot.slane %v3417_v15, 4 }
 0x1ef   : > { %v3843_v25 = vsel %vm5570_vm14, %v3841_v2, %v3842_v11 }
 0x1f0   : > { %v5146_v55 = vcombine.low %v3840_v45, %v3843_v25  ;;  %v3836_v31 = vsel %vm5570_vm14, %v3834_v47, %v3835_v38  ;;  %v7051_v43 = vrot.slane %v3437_v5, 5  ;;  %v3433_v25 = vrot.slane %v3431_v63, 5 }
 0x1f1   : > { %4121 = vrot.lane.b32.xlu1 %v5112_v21, %s5440_s9  ;;  %v3447_v63 = vshll.u32 %v7007_v10, 16  ;;  %v3409_v38 = vrot.slane %v3407_v49, 5 }
 0x1f2   : > { %4354 = vrot.lane.b32.xlu0 %v5112_v21, %s5441_s10 }
 0x1f3   : > { %v5310_v24 = vpop.f32.mrb[12].mxu0 }
 0x1f4   : > { %v2487_v60 = vadd.f32 %v5310_v24, %v6782_v37  ;;  %v2478_v53 = vpop.f32.mrb[13].mxu0 }
 0x1f5   : > { %v2479_v6 = vadd.f32 %v6782_v37, %v2478_v53  ;;  %v5311_v51 = vpop.f32.mrb[14].mxu0  ;;  %4265 = vrot.lane.b32.xlu1 %v5097_v3, %s5436_s26 }
 0x1f6   : > { %4032 = vrot.lane.b32.xlu0 %v5097_v3, %s5435_s25  ;;  %v2571_v7 = vmax.f32 %v2487_v60, 0.0  ;;  %v2490_v48 = vadd.f32 %v5311_v51, %v6782_v37  ;;  %v2481_v57 = vpop.f32.mrb[15].mxu0  ;;  %v3058_v60 = vld [vmem:[#allocation2 + $0x68] sm:$0x1] }
 0x1f7   : > { %v2569_v22 = vmax.f32 %v2479_v6, 0.0  ;;  %v2482_v52 = vadd.f32 %v6782_v37, %v2481_v57  ;;  %v3413_v6 = vshll.u32 %v6982_v17, 16  ;;  %v3449_v17 = vrot.slane %v3447_v63, 5 }
 0x1f8   : > { %v5234_v20 = vpack.c.bf16 %v2571_v7, %v2571_v7  ;;  %v2572_v54 = vmax.f32 %v2490_v48, 0.0  ;;  %v3051_v48 = vld [vmem:[#allocation2 + $0x5c] sm:$0x1] }
 0x1f9   : > { %v5232_v39 = vpack.c.bf16 %v2569_v22, %v2569_v22  ;;  %v2570_v16 = vmax.f32 %v2482_v52, 0.0  ;;  %3723 = vrot.lane.b32.xlu1 %v5112_v21, %s5437_s27  ;;  %v4581_v21 = vsel %vm8043_vm1, %v5421_v62, 0  ;;  %v3415_v45 = vrot.slane %v3413_v6, 5 }
 0x1fa   : > { %4119 = vrot.lane.b32.xlu0 %v7005_v59, %s5440_s9  ;;  %v2805_v19 = vshrl.u32 %v5234_v20, 16  ;;  %v5235_v23 = vpack.c.bf16 %v2572_v54, %v2572_v54  ;;  %v2808_v27 = vshll.u32 %v5234_v20, 16  ;;  %5333 = vmatpush3.bf16.msra.mxu1 %v4581_v21  ;;  %v3833_v54 = vsel %vm5570_vm14, %v5129_v46, %v3832_v44 }
 0x1fb   : > { %v2788_v14 = vshrl.u32 %v5232_v39, 16  ;;  %v5233_v28 = vpack.c.bf16 %v2570_v16, %v2570_v16  ;;  %v2791_v4 = vshll.u32 %v5232_v39, 16  ;;  %v5145_v39 = vcombine.low %v3833_v54, %v3836_v31 }
 0x1fc   : > { %v2807_v26 = vrot.slane %v2805_v19, 7  ;;  %v2813_v3 = vshrl.u32 %v5235_v23, 16  ;;  %v2816_v58 = vshll.u32 %v5235_v23, 16  ;;  %v3444_v16 = vor.u32 %v3443_v30, %v7051_v43 }
 0x1fd   : > { %v2790_v50 = vrot.slane %v2788_v14, 7  ;;  %v2796_v36 = vshrl.u32 %v5233_v28, 16  ;;  %4352 = vrot.lane.b32.xlu1 %v7005_v59, %s5441_s10  ;;  %v2799_v2 = vshll.u32 %v5233_v28, 16  ;;  %v3434_v44 = vor.u32 %v3433_v25, %v7039_v1 }
 0x1fe   : > { %4433 = vrot.lane.b32.xlu0 %v5146_v55, %s5439_s29  ;;  %v2810_v40 = vor.u32 %v2808_v27, %v2807_v26  ;;  %v2815_v34 = vrot.slane %v2813_v3, 7  ;;  %v2811_v51 = vrot.slane %v2807_v26, 4  ;;  %v3406_v46 = vrot.slane %v3404_v33, 4 }
 0x1ff   : > { %v2793_v24 = vor.u32 %v2791_v4, %v2790_v50  ;;  %v2798_v53 = vrot.slane %v2796_v36, 7  ;;  %v2794_v57 = vrot.slane %v2790_v50, 4  ;;  %v3445_v19 = vrot.slane %v3444_v16, 4 }
 0x200   : > { %v3055_v32 = vsel %vm5540_vm12, %v2810_v40, %v3054_v9  ;;  %v2818_v42 = vor.u32 %v2816_v58, %v2815_v34  ;;  %v2820_v7 = vrot.slane %v2815_v34, 4  ;;  %v3420_v23 = vor.u32 %v3419_v61, %v3415_v45 }
 0x201   : > { %3056 = vst [vmem:[#allocation2 + $0x60] sm:$0xf] %v3055_v32  ;;  %v3048_v11 = vsel %vm5540_vm12, %v2793_v24, %v3047_v13  ;;  %v2801_v22 = vor.u32 %v2799_v2, %v2798_v53  ;;  %v2803_v52 = vrot.slane %v2798_v53, 4  ;;  %3721 = vrot.lane.b32.xlu1 %v7005_v59, %s5437_s27  ;;  %v3435_v10 = vrot.slane %v3434_v44, 4 }
 0x202   : > { %3967 = vrot.lane.b32.xlu0 %v5146_v55, %s5434_s24  ;;  %3049 = vst [vmem:[#allocation2 + $0x54] sm:$0xf] %v3048_v11  ;;  %v2819_v12 = vsel %vm5528_vm11, %v2811_v51, %v2818_v42  ;;  %v3059_v20 = vsel %vm5482_vm3, %v2820_v7, %v3058_v60  ;;  %v3410_v14 = vor.u32 %v3409_v38, %v3406_v46  ;;  %v3423_v1 = vshll.u32 %v7021_v56, 16 }
 0x203   : > { %3057 = vst.msk [vmem:[#allocation2 + $0x64] sm:$0xf] %vm226_vm0, %v2819_v12  ;;  %3060 = vst [vmem:[#allocation2 + $0x68] sm:$0x1] %v3059_v20  ;;  %v2802_v59 = vsel %vm5528_vm11, %v2794_v57, %v2801_v22  ;;  %v3052_v47 = vsel %vm5482_vm3, %v2803_v52, %v3051_v48  ;;  %v3450_v28 = vsel %vm5584_vm15, %v3445_v19, %v3449_v17  ;;  %v3421_v30 = vrot.slane %v3420_v23, 4 }
 0x204   : > { %3050 = vst.msk [vmem:[#allocation2 + $0x58] sm:$0xf] %vm226_vm0, %v2802_v59  ;;  %3053 = vst [vmem:[#allocation2 + $0x5c] sm:$0x1] %v3052_v47  ;;  %v3440_v56 = vsel %vm5584_vm15, %v3435_v10, %v7051_v43  ;;  %v3411_v62 = vrot.slane %v3410_v14, 4  ;;  %v3425_v26 = vrot.slane %v3423_v1, 5 }
 0x205   : > { %4200 = vrot.lane.b32.xlu1 %v5146_v55, %s5438_s28  ;;  %v5114_v27 = vcombine.low %v3440_v56, %v3450_v28  ;;  %v3068_v1 = vld [vmem:[#allocation2 + $0x78] sm:$0xf]  ;;  %v3061_v56 = vld [vmem:[#allocation2 + $0x6c] sm:$0xf]  ;;  %vm8045_vm1 = vcmask 294144  }
 0x206   : > { %4431 = vrot.lane.b32.xlu0 %v5145_v39, %s5439_s29  ;;  %v3426_v3 = vsel %vm5584_vm15, %v3421_v30, %v3425_v26  ;;  %v3416_v9 = vsel %vm5584_vm15, %v3411_v62, %v3415_v45 }
 0x207   : > { %v7120_v4 = vcombine.low %v3416_v9, %v3426_v3 }
 0x208   : > { %v7091_v15 = vld [vmem:[#allocation2 + $0x60] sm:$0xf] }
 0x209   : > { %3965 = vrot.lane.b32.xlu1 %v5145_v39, %s5434_s24  ;;  %v7098_v41 = vld [vmem:[#allocation2 + $0x54] sm:$0xf]  ;;  %v3476_v21 = vshrl.u32 %v7091_v15, 16  ;;  %v3479_v40 = vshll.u32 %v7091_v15, 16  ;;  %v5132_v53 = vrot.slane %v7091_v15, 9 }
 0x20a   : > { %4198 = vrot.lane.b32.xlu0 %v5145_v39, %s5438_s28  ;;  %v7093_v5 = vld [vmem:[#allocation2 + $0x64] sm:$0xf]  ;;  %v7122_v36 = vld [vmem:[#allocation2 + $0x68] sm:$0x1]  ;;  %v3452_v60 = vshrl.u32 %v7098_v41, 16  ;;  %v3455_v32 = vshll.u32 %v7098_v41, 16 }
 0x20b   : > { %v5100_v33 = vcombine.low %v7091_v15, %v7093_v5  ;;  %v7100_v49 = vld [vmem:[#allocation2 + $0x58] sm:$0xf]  ;;  %v3853_v31 = vrot.slane %v7093_v5, 5  ;;  %v3856_v7 = vrot.slane %v7122_v36, 5  ;;  %v3489_v48 = vshrl.u32 %v7093_v5, 16 }
 0x20c   : > { %v5099_v55 = vcombine.low %v7098_v41, %v7100_v49  ;;  %v3846_v2 = vrot.slane %v7100_v49, 5  ;;  %v3465_v11 = vshrl.u32 %v7100_v49, 16  ;;  %v7139_v52 = vld [vmem:[#allocation2 + $0x5c] sm:$0x1]  ;;  %v5131_v25 = vrot.slane %v7098_v41, 9 }
 0x20d   : > { %4038 = vrot.lane.b32.xlu1 %v5100_v33, %s5435_s25  ;;  %3275 = vst.msk [vmem:[#allocation3 + $0x40] sm:$0xff] %vm1063_vm13, %v5100_v33  ;;  %v3855_v58 = vrot.slane %v3853_v31, 4  ;;  %v3854_v39 = vsel %vm5570_vm14, %v5132_v53, %v3853_v31  ;;  %v3849_v61 = vrot.slane %v7139_v52, 5  ;;  %v3485_v63 = vshll.u32 %v7093_v5, 16  ;;  %v3072_v31 = vld [vmem:[#allocation2 + $0x80] sm:$0x1] }
 0x20e   : > { %4271 = vrot.lane.b32.xlu0 %v5100_v33, %s5436_s26  ;;  %3274 = vst.msk [vmem:[#allocation3 + $0x38] sm:$0xff] %vm1063_vm13, %v5099_v55  ;;  %v7153_v19 = vrot.slane %v3476_v21, 4  ;;  %v3491_v14 = vrot.slane %v3489_v48, 4  ;;  %v3461_v21 = vshll.u32 %v7100_v49, 16  ;;  %v3467_v15 = vrot.slane %v3465_v11, 4 }
 0x20f   : > { %v3857_v54 = vsel %vm5570_vm14, %v3855_v58, %v3856_v7 }
 0x210   : > { %v5148_v38 = vcombine.low %v3854_v39, %v3857_v54  ;;  %v3454_v39 = vrot.slane %v3452_v60, 4 }
 0x211   : > { %4125 = vrot.lane.b32.xlu1 %v5114_v27, %s5440_s9 }
 0x212   : > { %4358 = vrot.lane.b32.xlu0 %v5114_v27, %s5441_s10 }
 0x213   : > { %v5314_v50 = vpop.f32.mrb[16].mxu0 }
 0x214   : > { %v2503_v13 = vadd.f32 %v5314_v50, %v6782_v37  ;;  %v2494_v34 = vpop.f32.mrb[17].mxu0 }
 0x215   : > { %v2495_v43 = vadd.f32 %v6782_v37, %v2494_v34  ;;  %v5315_v24 = vpop.f32.mrb[18].mxu0  ;;  %4269 = vrot.lane.b32.xlu1 %v5099_v55, %s5436_s26 }
 0x216   : > { %4036 = vrot.lane.b32.xlu0 %v5099_v55, %s5435_s25  ;;  %v2575_v6 = vmax.f32 %v2503_v13, 0.0  ;;  %v2506_v51 = vadd.f32 %v5315_v24, %v6782_v37  ;;  %v2497_v42 = vpop.f32.mrb[19].mxu0  ;;  %v3065_v24 = vld [vmem:[#allocation2 + $0x74] sm:$0x1] }
 0x217   : > { %v2573_v57 = vmax.f32 %v2495_v43, 0.0  ;;  %v2498_v22 = vadd.f32 %v6782_v37, %v2497_v42  ;;  %v3848_v37 = vrot.slane %v3846_v2, 4 }
 0x218   : > { %v5238_v12 = vpack.c.bf16 %v2575_v6, %v2575_v6  ;;  %v2576_v20 = vmax.f32 %v2506_v51, 0.0 }
 0x219   : > { %v5236_v59 = vpack.c.bf16 %v2573_v57, %v2573_v57  ;;  %v2574_v47 = vmax.f32 %v2498_v22, 0.0  ;;  %3727 = vrot.lane.b32.xlu1 %v5114_v27, %s5437_s27  ;;  %v3850_v5 = vsel %vm5570_vm14, %v3848_v37, %v3849_v61  ;;  %v7160_v27 = vrot.slane %v3485_v63, 5 }
 0x21a   : > { %4123 = vrot.lane.b32.xlu0 %v7120_v4, %s5440_s9  ;;  %v2839_v16 = vshrl.u32 %v5238_v12, 16  ;;  %v5239_v45 = vpack.c.bf16 %v2576_v20, %v2576_v20  ;;  %v2842_v17 = vshll.u32 %v5238_v12, 16  ;;  %v3847_v22 = vsel %vm5570_vm14, %v5131_v25, %v3846_v2 }
 0x21b   : > { %v2822_v44 = vshrl.u32 %v5236_v59, 16  ;;  %v5237_v46 = vpack.c.bf16 %v2574_v47, %v2574_v47  ;;  %v2825_v28 = vshll.u32 %v5236_v59, 16  ;;  %v3481_v12 = vrot.slane %v3479_v40, 5 }
 0x21c   : > { %v2841_v23 = vrot.slane %v2839_v16, 7  ;;  %v2847_v10 = vshrl.u32 %v5239_v45, 16  ;;  %v2850_v26 = vshll.u32 %v5239_v45, 16  ;;  %v5147_v54 = vcombine.low %v3847_v22, %v3850_v5 }
 0x21d   : > { %v2824_v33 = vrot.slane %v2822_v44, 7  ;;  %v2830_v55 = vshrl.u32 %v5237_v46, 16  ;;  %4356 = vrot.lane.b32.xlu1 %v7120_v4, %s5441_s10  ;;  %v2833_v50 = vshll.u32 %v5237_v46, 16  ;;  %v3492_v59 = vor.u32 %v3491_v14, %v7160_v27 }
 0x21e   : > { %4437 = vrot.lane.b32.xlu0 %v5148_v38, %s5439_s29  ;;  %v2844_v30 = vor.u32 %v2842_v17, %v2841_v23  ;;  %v2849_v62 = vrot.slane %v2847_v10, 7  ;;  %v2845_v13 = vrot.slane %v2841_v23, 4  ;;  %v3463_v47 = vrot.slane %v3461_v21, 5 }
 0x21f   : > { %v2827_v3 = vor.u32 %v2825_v28, %v2824_v33  ;;  %v2832_v9 = vrot.slane %v2830_v55, 7  ;;  %v2828_v53 = vrot.slane %v2824_v33, 4  ;;  %v3495_v2 = vshll.u32 %v7122_v36, 16 }
 0x220   : > { %v3069_v34 = vsel %vm5540_vm12, %v2844_v30, %v3068_v1  ;;  %v2852_v58 = vor.u32 %v2850_v26, %v2849_v62  ;;  %v2854_v43 = vrot.slane %v2849_v62, 4  ;;  %v3482_v25 = vor.u32 %v3481_v12, %v7153_v19 }
 0x221   : > { %3070 = vst [vmem:[#allocation2 + $0x78] sm:$0xf] %v3069_v34  ;;  %v3062_v6 = vsel %vm5540_vm12, %v2827_v3, %v3061_v56  ;;  %v2835_v51 = vor.u32 %v2833_v50, %v2832_v9  ;;  %v2837_v42 = vrot.slane %v2832_v9, 4  ;;  %3725 = vrot.lane.b32.xlu1 %v7120_v4, %s5437_s27  ;;  %v3457_v37 = vrot.slane %v3455_v32, 5  ;;  %v7246_v3 = vld [vmem:[%s8024_s3] ss:$0 sm:$0xff] }
 0x222   : > { %3971 = vrot.lane.b32.xlu0 %v5148_v38, %s5434_s24  ;;  %3063 = vst [vmem:[#allocation2 + $0x6c] sm:$0xf] %v3062_v6  ;;  %v2853_v48 = vsel %vm5528_vm11, %v2845_v13, %v2852_v58  ;;  %v3073_v57 = vsel %vm5482_vm3, %v2854_v43, %v3072_v31  ;;  %v3493_v16 = vrot.slane %v3492_v59, 4  ;;  %v3468_v49 = vor.u32 %v3467_v15, %v3463_v47 }
 0x223   : > { %3071 = vst.msk [vmem:[#allocation2 + $0x7c] sm:$0xf] %vm226_vm0, %v2853_v48  ;;  %3074 = vst [vmem:[#allocation2 + $0x80] sm:$0x1] %v3073_v57  ;;  %v2836_v4 = vsel %vm5528_vm11, %v2828_v53, %v2835_v51  ;;  %v3066_v20 = vsel %vm5482_vm3, %v2837_v42, %v3065_v24  ;;  %v3497_v11 = vrot.slane %v3495_v2, 5  ;;  %v3483_v61 = vrot.slane %v3482_v25, 4 }
 0x224   : > { %3064 = vst.msk [vmem:[#allocation2 + $0x70] sm:$0xf] %vm226_vm0, %v2836_v4  ;;  %3067 = vst [vmem:[#allocation2 + $0x74] sm:$0x1] %v3066_v20  ;;  %v3458_v63 = vor.u32 %v3457_v37, %v3454_v39  ;;  %v3471_v44 = vshll.u32 %v7139_v52, 16  ;;  %v3469_v19 = vrot.slane %v3468_v49, 4 }
 0x225   : > { %4204 = vrot.lane.b32.xlu1 %v5148_v38, %s5438_s28  ;;  %v3498_v46 = vsel %vm5584_vm15, %v3493_v16, %v3497_v11  ;;  %v3488_v23 = vsel %vm5584_vm15, %v3483_v61, %v7160_v27 }
 0x226   : > { %4435 = vrot.lane.b32.xlu0 %v5147_v54, %s5439_s29  ;;  %v3459_v17 = vrot.slane %v3458_v63, 4  ;;  %v3473_v10 = vrot.slane %v3471_v44, 5  ;;  %v5116_v1 = vcombine.low %v3488_v23, %v3498_v46 }
 0x227   : > { %v7167_v7 = vpop.permute.xlu0 %4259  ;;  %v7220_v52 = vpop.permute.xlu1 %4026 }
 0x228   : > { %v7202_v45 = vld [vmem:[#allocation2 + $0x78] sm:$0xf]  ;;  %v3474_v33 = vsel %vm5584_vm15, %v3469_v19, %v3473_v10  ;;  %v3464_v55 = vsel %vm5584_vm15, %v3459_v17, %v3463_v47 }
 0x229   : > { %3969 = vrot.lane.b32.xlu1 %v5147_v54, %s5434_s24  ;;  %v7209_v41 = vld [vmem:[#allocation2 + $0x6c] sm:$0xf]  ;;  %v3524_v5 = vshrl.u32 %v7202_v45, 16  ;;  %v7236_v56 = vcombine.low %v3464_v55, %v3474_v33  ;;  %v3527_v27 = vshll.u32 %v7202_v45, 16  ;;  %v5134_v50 = vrot.slane %v7202_v45, 9 }
 0x22a   : > { %4202 = vrot.lane.b32.xlu0 %v5147_v54, %s5438_s28  ;;  %v7204_v36 = vld [vmem:[#allocation2 + $0x7c] sm:$0xf]  ;;  %v7238_v62 = vld [vmem:[#allocation2 + $0x80] sm:$0x1]  ;;  %v3500_v43 = vshrl.u32 %v7209_v41, 16  ;;  %v3503_v24 = vshll.u32 %v7209_v41, 16 }
 0x22b   : > { %v4025_v40 = vpop.permute.xlu0 %4024  ;;  %v5102_v60 = vcombine.low %v7202_v45, %v7204_v36  ;;  %v7211_v32 = vld [vmem:[#allocation2 + $0x70] sm:$0xf]  ;;  %v3867_v28 = vrot.slane %v7204_v36, 5  ;;  %v3537_v6 = vshrl.u32 %v7204_v36, 16  ;;  %v3870_v57 = vrot.slane %v7238_v62, 5 }
 0x22c   : > { %4072 = vst.msk [vmem:[#allocation3] sm:$0xff] %vm1877_vm6, %v4025_v40  ;;  %v5101_v38 = vcombine.low %v7209_v41, %v7211_v32  ;;  %v7240_v26 = vpop.permute.xlu1 %4192  ;;  %v3860_v53 = vrot.slane %v7211_v32, 5  ;;  %v7261_v22 = vld [vmem:[#allocation2 + $0x74] sm:$0x1]  ;;  %v3513_v4 = vshrl.u32 %v7211_v32, 16  ;;  %v5133_v54 = vrot.slane %v7209_v41, 9 }
 0x22d   : > { %4042 = vrot.lane.b32.xlu1 %v5102_v60, %s5435_s25  ;;  %3277 = vst.msk [vmem:[#allocation3 + $0x50] sm:$0xff] %vm1063_vm13, %v5102_v60  ;;  %v3869_v21 = vrot.slane %v3867_v28, 4  ;;  %v3868_v15 = vsel %vm5570_vm14, %v5134_v50, %v3867_v28  ;;  %v3863_v37 = vrot.slane %v7261_v22, 5  ;;  %v7274_v11 = vrot.slane %v3524_v5, 4  ;;  %v3082_v33 = vld [vmem:[#allocation2 + $0x90] sm:$0xf] }
 0x22e   : > { %4275 = vrot.lane.b32.xlu0 %v5102_v60, %s5436_s26  ;;  %3276 = vst.msk [vmem:[#allocation3 + $0x48] sm:$0xff] %vm1063_vm13, %v5101_v38  ;;  %v3862_v39 = vrot.slane %v3860_v53, 4  ;;  %v3533_v61 = vshll.u32 %v7204_v36, 16  ;;  %v3861_v19 = vsel %vm5570_vm14, %v5133_v54, %v3860_v53 }
 0x22f   : > { %v7226_v14 = vpop.permute.xlu0 %4425  ;;  %v3871_v40 = vsel %vm5570_vm14, %v3869_v21, %v3870_v57 }
 0x230   : > { %v7277_v63 = vpop.permute.xlu1 %3957  ;;  %v3864_v36 = vsel %vm5570_vm14, %v3862_v39, %v3863_v37  ;;  %v7288_v21 = vrot.slane %v3533_v61, 5 }
 0x231   : > { %4129 = vrot.lane.b32.xlu1 %v5116_v1, %s5440_s9  ;;  %v5149_v37 = vcombine.low %v3861_v19, %v3864_v36  ;;  %v3505_v19 = vrot.slane %v3503_v24, 5 }
 0x232   : > { %4362 = vrot.lane.b32.xlu0 %v5116_v1, %s5441_s10 }
 0x233   : > { %v5318_v30 = vpop.f32.mrb[20].mxu0  ;;  %v7250_v13 = vpop.permute.xlu0 %3959 }
 0x234   : > { %v2519_v31 = vadd.f32 %v7246_v3, %v5318_v30  ;;  %v2510_v9 = vpop.f32.mrb[21].mxu0 }
 0x235   : > { %v2511_v34 = vadd.f32 %v7246_v3, %v2510_v9  ;;  %v5319_v58 = vpop.f32.mrb[22].mxu0  ;;  %4273 = vrot.lane.b32.xlu1 %v5101_v38, %s5436_s26 }
 0x236   : > { %4040 = vrot.lane.b32.xlu0 %v5101_v38, %s5435_s25  ;;  %v2579_v51 = vmax.f32 %v2519_v31, 0.0  ;;  %v2522_v42 = vadd.f32 %v7246_v3, %v5319_v58  ;;  %v2513_v48 = vpop.f32.mrb[23].mxu0  ;;  %v5150_v38 = vcombine.low %v3868_v15, %v3871_v40  ;;  %v3075_v31 = vld [vmem:[#allocation2 + $0x84] sm:$0xf]  ;;  %v3086_v58 = vld [vmem:[#allocation2 + $0x98] sm:$0x1] }
 0x237   : > { %v2577_v12 = vmax.f32 %v2511_v34, 0.0  ;;  %v2514_v20 = vadd.f32 %v7246_v3, %v2513_v48  ;;  %v7279_v44 = vpop.permute.xlu0 %4190  ;;  %v3509_v48 = vshll.u32 %v7211_v32, 16  ;;  %v3543_v32 = vshll.u32 %v7238_v62, 16 }
 0x238   : > { %v5242_v59 = vpack.c.bf16 %v2579_v51, %v2579_v51  ;;  %v2580_v47 = vmax.f32 %v2522_v42, 0.0 }
 0x239   : > { %v5240_v2 = vpack.c.bf16 %v2577_v12, %v2577_v12  ;;  %v2578_v25 = vmax.f32 %v2514_v20, 0.0  ;;  %3731 = vrot.lane.b32.xlu1 %v5116_v1, %s5437_s27  ;;  %v3539_v1 = vrot.slane %v3537_v6, 4 }
 0x23a   : > { %4127 = vrot.lane.b32.xlu0 %v7236_v56, %s5440_s9  ;;  %v2873_v16 = vshrl.u32 %v5242_v59, 16  ;;  %v5243_v49 = vpack.c.bf16 %v2580_v47, %v2580_v47  ;;  %v2876_v17 = vshll.u32 %v5242_v59, 16  ;;  %v3079_v59 = vld [vmem:[#allocation2 + $0x8c] sm:$0x1] }
 0x23b   : > { %v2856_v60 = vshrl.u32 %v5240_v2, 16  ;;  %v5241_v46 = vpack.c.bf16 %v2578_v25, %v2578_v25  ;;  %v2859_v55 = vshll.u32 %v5240_v2, 16  ;;  %v3540_v45 = vor.u32 %v3539_v1, %v7288_v21 }
 0x23c   : > { %v2875_v23 = vrot.slane %v2873_v16, 7  ;;  %v2881_v10 = vshrl.u32 %v5243_v49, 16  ;;  %v2884_v50 = vshll.u32 %v5243_v49, 16  ;;  %v3529_v16 = vrot.slane %v3527_v27, 5 }
 0x23d   : > { %v2858_v28 = vrot.slane %v2856_v60, 7  ;;  %v2864_v5 = vshrl.u32 %v5241_v46, 16  ;;  %4360 = vrot.lane.b32.xlu1 %v7236_v56, %s5441_s10  ;;  %v2867_v6 = vshll.u32 %v5241_v46, 16  ;;  %v3511_v46 = vrot.slane %v3509_v48, 5 }
 0x23e   : > { %4441 = vrot.lane.b32.xlu0 %v5150_v38, %s5439_s29  ;;  %v2878_v30 = vor.u32 %v2876_v17, %v2875_v23  ;;  %v2883_v9 = vrot.slane %v2881_v10, 7  ;;  %v2879_v57 = vrot.slane %v2875_v23, 4  ;;  %v3515_v23 = vrot.slane %v3513_v4, 4 }
 0x23f   : > { %v2861_v34 = vor.u32 %v2859_v55, %v2858_v28  ;;  %v2866_v53 = vrot.slane %v2864_v5, 7  ;;  %v2862_v47 = vrot.slane %v2858_v28, 4  ;;  %v3502_v27 = vrot.slane %v3500_v43, 4 }
 0x240   : > { %v7290_v51 = vpop.permute.xlu1 %4030  ;;  %v7292_v42 = vpop.permute.xlu0 %4263  ;;  %v3083_v12 = vsel %vm5540_vm12, %v2878_v30, %v3082_v33  ;;  %v2886_v20 = vor.u32 %v2884_v50, %v2883_v9  ;;  %v2888_v54 = vrot.slane %v2883_v9, 4  ;;  %v3530_v17 = vor.u32 %v3529_v16, %v7274_v11 }
 0x241   : > { %3084 = vst [vmem:[#allocation2 + $0x90] sm:$0xf] %v3083_v12  ;;  %v3076_v15 = vsel %vm5540_vm12, %v2861_v34, %v3075_v31  ;;  %v2869_v40 = vor.u32 %v2867_v6, %v2866_v53  ;;  %v2871_v2 = vrot.slane %v2866_v53, 4  ;;  %3729 = vrot.lane.b32.xlu1 %v7236_v56, %s5437_s27  ;;  %v3516_v33 = vor.u32 %v3515_v23, %v3511_v46 }
 0x242   : > { %3975 = vrot.lane.b32.xlu0 %v5150_v38, %s5434_s24  ;;  %3077 = vst [vmem:[#allocation2 + $0x84] sm:$0xf] %v3076_v15  ;;  %v2887_v25 = vsel %vm5528_vm11, %v2879_v57, %v2886_v20  ;;  %v3087_v39 = vsel %vm5482_vm3, %v2888_v54, %v3086_v58  ;;  %v3541_v28 = vrot.slane %v3540_v45, 4  ;;  %v3519_v1 = vshll.u32 %v7261_v22, 16 }
 0x243   : > { %3085 = vst.msk [vmem:[#allocation2 + $0x94] sm:$0xf] %vm226_vm0, %v2887_v25  ;;  %3088 = vst [vmem:[#allocation2 + $0x98] sm:$0x1] %v3087_v39  ;;  %v2870_v49 = vsel %vm5528_vm11, %v2862_v47, %v2869_v40  ;;  %v3080_v56 = vsel %vm5482_vm3, %v2871_v2, %v3079_v59  ;;  %v3531_v24 = vrot.slane %v3530_v17, 4  ;;  %v3545_v11 = vrot.slane %v3543_v32, 5 }
 0x244   : > { %v7313_v61 = vpop.permute.xlu1 %4117  ;;  %v4351_v60 = vpop.permute.xlu0 %4350  ;;  %3078 = vst.msk [vmem:[#allocation2 + $0x88] sm:$0xf] %vm226_vm0, %v2870_v49  ;;  %3081 = vst [vmem:[#allocation2 + $0x8c] sm:$0x1] %v3080_v56  ;;  %v3517_v31 = vrot.slane %v3516_v33, 4  ;;  %v3521_v34 = vrot.slane %v3519_v1, 5 }
 0x245   : > { %4208 = vrot.lane.b32.xlu1 %v5150_v38, %s5438_s28  ;;  %v3506_v38 = vor.u32 %v3505_v19, %v3502_v27  ;;  %v3546_v22 = vsel %vm5584_vm15, %v3541_v28, %v3545_v11 }
 0x246   : > { %4439 = vrot.lane.b32.xlu0 %v5149_v37, %s5439_s29  ;;  %v3522_v6 = vsel %vm5584_vm15, %v3517_v31, %v3521_v34 }
 0x247   : > { %v3507_v50 = vrot.slane %v3506_v38, 4 }
 0x248   : > { %v7327_v4 = vpop.permute.xlu1 %4261  ;;  %v4029_v10 = vpop.permute.xlu0 %4028  ;;  %v7332_v43 = vld [vmem:[#allocation2 + $0x90] sm:$0xf] }
 0x249   : > { %3973 = vrot.lane.b32.xlu1 %v5149_v37, %s5434_s24  ;;  %v7338_v36 = vld [vmem:[#allocation2 + $0x84] sm:$0xf]  ;;  %v3572_v48 = vshrl.u32 %v7332_v43, 16  ;;  %v3575_v12 = vshll.u32 %v7332_v43, 16  ;;  %v5136_v59 = vrot.slane %v7332_v43, 9 }
 0x24a   : > { %4206 = vrot.lane.b32.xlu0 %v5149_v37, %s5438_s28  ;;  %v7334_v41 = vld [vmem:[#allocation2 + $0x94] sm:$0xf]  ;;  %v7382_v57 = vld [vmem:[#allocation2 + $0x98] sm:$0x1]  ;;  %v3548_v20 = vshrl.u32 %v7338_v36, 16  ;;  %v3551_v54 = vshll.u32 %v7338_v36, 16 }
 0x24b   : > { %v5104_v5 = vcombine.low %v7332_v43, %v7334_v41  ;;  %v7340_v30 = vld [vmem:[#allocation2 + $0x88] sm:$0xf]  ;;  %v3585_v47 = vshrl.u32 %v7334_v41, 16  ;;  %v7396_v25 = vld [vmem:[#allocation2 + $0x8c] sm:$0x1]  ;;  %v3884_v56 = vrot.slane %v7382_v57, 5 }
 0x24c   : > { %v3720_v55 = vpop.permute.xlu1 %3719  ;;  %v4116_v62 = vpop.permute.xlu0 %4115  ;;  %v5103_v9 = vcombine.low %v7338_v36, %v7340_v30  ;;  %v3874_v39 = vrot.slane %v7340_v30, 5  ;;  %v5135_v27 = vrot.slane %v7338_v36, 9 }
 0x24d   : > { %3765 = vst.msk [vmem:[#allocation3 + $0x10] sm:$0xff] %vm1563_vm2, %v3720_v55  ;;  %4046 = vrot.lane.b32.xlu1 %v5104_v5, %s5435_s25  ;;  %v3587_v55 = vrot.slane %v3585_v47, 4 }
 0x24e   : > { %4163 = vst.msk [vmem:[#allocation3] sm:$0xff] %vm1969_vm7, %v4116_v62  ;;  %4279 = vrot.lane.b32.xlu0 %v5104_v5, %s5436_s26  ;;  %v3876_v43 = vrot.slane %v3874_v39, 4  ;;  %v3875_v31 = vsel %vm5570_vm14, %v5135_v27, %v3874_v39 }
 0x24f   : > { %4005 = vst.msk [vmem:[#allocation3 + $0x10] sm:$0xff] %vm1807_vm4, %v7250_v13  ;;  %v3536_v13 = vsel %vm5584_vm15, %v3531_v24, %v7288_v21  ;;  %v3512_v21 = vsel %vm5584_vm15, %v3507_v50, %v3511_v46 }
 0x250   : > { %4238 = vst.msk [vmem:[#allocation3] sm:$0xff] %vm2045_vm5, %v7279_v44  ;;  %v3718_v44 = vpop.permute.xlu1 %3717  ;;  %v7363_v58 = vpop.permute.xlu0 %4429  ;;  %v5118_v53 = vcombine.low %v3536_v13, %v3546_v22  ;;  %v3577_v22 = vrot.slane %v3575_v12, 5 }
 0x251   : > { %3279 = vst.msk [vmem:[#allocation3 + $0x60] sm:$0xff] %vm1063_vm13, %v5104_v5  ;;  %3278 = vst.msk [vmem:[#allocation3 + $0x58] sm:$0xff] %vm1063_vm13, %v5103_v9 }
 0x252   : > { %4074 = vst.msk [vmem:[#allocation3 + $0x10] sm:$0xff] %vm1877_vm6, %v4029_v10  ;;  %4133 = vrot.lane.b32.xlu1 %v5118_v53, %s5440_s9  ;;  %4366 = vrot.lane.b32.xlu0 %v5118_v53, %s5441_s10  ;;  %v7415_v10 = vrot.slane %v3572_v48, 4 }
 0x253   : > { %4307 = vst.msk [vmem:[#allocation3] sm:$0xff] %vm2115_vm8, %v7167_v7  ;;  %v3881_v7 = vrot.slane %v7334_v41, 5 }
 0x254   : > { %4398 = vst.msk [vmem:[#allocation3] sm:$0xff] %vm2207_vm9, %v4351_v60  ;;  %v7394_v15 = vpop.permute.xlu0 %3963  ;;  %v7401_v37 = vpop.permute.xlu1 %4196 }
 0x255   : > { %4473 = vst.msk [vmem:[#allocation3] sm:$0xff] %vm8045_vm1, %v7226_v14  ;;  %v7380_v14 = vcombine.low %v3512_v21, %v3522_v6  ;;  %v3883_v2 = vrot.slane %v3881_v7, 4  ;;  %v3882_v45 = vsel %vm5570_vm14, %v5136_v59, %v3881_v7 }
 0x256   : > { %3764 = vst.msk [vmem:[#allocation3 + $0x8] sm:$0xff] %vm1563_vm2, %v3718_v44  ;;  %4277 = vrot.lane.b32.xlu1 %v5103_v9, %s5436_s26  ;;  %4044 = vrot.lane.b32.xlu0 %v5103_v9, %s5435_s25  ;;  %v3557_v44 = vshll.u32 %v7340_v30, 16 }
 0x257   : > { %4004 = vst.msk [vmem:[#allocation3 + $0x8] sm:$0xff] %vm1807_vm4, %v7277_v63  ;;  %v5322_v63 = vpop.f32.mrb[24].mxu0  ;;  %v3885_v1 = vsel %vm5570_vm14, %v3883_v2, %v3884_v56  ;;  %v3100_v56 = vld [vmem:[#allocation2 + $0xb0] sm:$0x1] }
 0x258   : > { %4073 = vst.msk [vmem:[#allocation3 + $0x8] sm:$0xff] %vm1877_vm6, %v7220_v52  ;;  %v2535_v52 = vadd.f32 %v7246_v3, %v5322_v63  ;;  %v2526_v40 = vpop.f32.mrb[25].mxu0  ;;  %v7417_v38 = vpop.permute.xlu0 %4427  ;;  %v5152_v13 = vcombine.low %v3882_v45, %v3885_v1  ;;  %v3096_v63 = vld [vmem:[#allocation2 + $0xa8] sm:$0xf] }
 0x259   : > { %4164 = vst.msk [vmem:[#allocation3 + $0x8] sm:$0xff] %vm1969_vm7, %v7313_v61  ;;  %v2527_v16 = vadd.f32 %v7246_v3, %v2526_v40  ;;  %v5323_v49 = vpop.f32.mrb[26].mxu0  ;;  %v3581_v61 = vshll.u32 %v7334_v41, 16  ;;  %v7429_v34 = vpop.permute.xlu1 %3961  ;;  %v3089_v40 = vld [vmem:[#allocation2 + $0x9c] sm:$0xf] }
 0x25a   : > { %4239 = vst.msk [vmem:[#allocation3 + $0x8] sm:$0xff] %vm2045_vm5, %v7240_v26  ;;  %v3561_v26 = vshrl.u32 %v7340_v30, 16  ;;  %v2583_v60 = vmax.f32 %v2535_v52, 0.0  ;;  %v2538_v46 = vadd.f32 %v7246_v3, %v5323_v49  ;;  %v2529_v23 = vpop.f32.mrb[27].mxu0  ;;  %3735 = vrot.lane.b32.xlu1 %v5118_v53, %s5437_s27  ;;  %4131 = vrot.lane.b32.xlu0 %v7380_v14, %s5440_s9 }
 0x25b   : > { %4308 = vst.msk [vmem:[#allocation3 + $0x8] sm:$0xff] %vm2115_vm8, %v7327_v4  ;;  %v2581_v19 = vmax.f32 %v2527_v16, 0.0  ;;  %v2530_v17 = vadd.f32 %v7246_v3, %v2529_v23  ;;  %v3877_v4 = vrot.slane %v7396_v25, 5  ;;  %v7425_v11 = vrot.slane %v3581_v61, 5 }
 0x25c   : > { %v4489_v32 = vld [vmem:[#allocation3] sm:$0xff]  ;;  %v5246_v33 = vpack.c.bf16 %v2583_v60, %v2583_v60  ;;  %v2584_v28 = vmax.f32 %v2538_v46, 0.0  ;;  %v7432_v21 = vpop.permute.xlu0 %4194  ;;  %v3563_v16 = vrot.slane %v3561_v26, 4  ;;  %v7442_v23 = vrot.slane %v3557_v44, 5 }
 0x25d   : > { %5334 = vmatprep.mubr.msk.bf16.mxu1 %vm8046_vm10, %v4489_v32  ;;  %v5244_v41 = vpack.c.bf16 %v2581_v19, %v2581_v19  ;;  %v2582_v24 = vmax.f32 %v2530_v17, 0.0  ;;  %v3878_v48 = vsel %vm5570_vm14, %v3876_v43, %v3877_v4  ;;  %v3588_v12 = vor.u32 %v3587_v55, %v7425_v11  ;;  %v3093_v32 = vld [vmem:[#allocation2 + $0xa4] sm:$0x1]  ;;  %vm8047_vm10 = vmmov %vm8045_vm1 }
 0x25e   : > { %v2907_v62 = vshrl.u32 %v5246_v33, 16  ;;  %v5247_v5 = vpack.c.bf16 %v2584_v28, %v2584_v28  ;;  %v2910_v6 = vshll.u32 %v5246_v33, 16  ;;  %4364 = vrot.lane.b32.xlu1 %v7380_v14, %s5441_s10  ;;  %4445 = vrot.lane.b32.xlu0 %v5152_v13, %s5439_s29  ;;  %v3591_v55 = vshll.u32 %v7382_v57, 16 }
 0x25f   : > { %v2890_v9 = vshrl.u32 %v5244_v41, 16  ;;  %v5245_v50 = vpack.c.bf16 %v2582_v24, %v2582_v24  ;;  %v2893_v47 = vshll.u32 %v5244_v41, 16  ;;  %v7440_v46 = vpop.permute.xlu1 %4034  ;;  %v3578_v24 = vor.u32 %v3577_v22, %v7415_v10 }
 0x260   : > { %v2909_v53 = vrot.slane %v2907_v62, 7  ;;  %v2915_v7 = vshrl.u32 %v5247_v5, 16  ;;  %v2918_v39 = vshll.u32 %v5247_v5, 16  ;;  %v7446_v4 = vpop.permute.xlu0 %4267  ;;  %v3589_v44 = vrot.slane %v3588_v12, 4 }
 0x261   : > { %v2892_v59 = vrot.slane %v2890_v9, 7  ;;  %v2898_v52 = vshrl.u32 %v5245_v50, 16  ;;  %v2901_v60 = vshll.u32 %v5245_v50, 16  ;;  %v5151_v9 = vcombine.low %v3875_v31, %v3878_v48 }
 0x262   : > { %v2912_v30 = vor.u32 %v2910_v6, %v2909_v53  ;;  %v2917_v2 = vrot.slane %v2915_v7, 7  ;;  %v2913_v45 = vrot.slane %v2909_v53, 4  ;;  %3733 = vrot.lane.b32.xlu1 %v7380_v14, %s5437_s27  ;;  %3979 = vrot.lane.b32.xlu0 %v5152_v13, %s5434_s24  ;;  %v3550_v57 = vrot.slane %v3548_v20, 4 }
 0x263   : > { %v2895_v49 = vor.u32 %v2893_v47, %v2892_v59  ;;  %v2900_v61 = vrot.slane %v2898_v52, 7  ;;  %v2896_v33 = vrot.slane %v2892_v59, 4  ;;  %v7464_v5 = vpop.permute.xlu1 %4121  ;;  %v3553_v10 = vrot.slane %v3551_v54, 5 }
 0x264   : > { %v3097_v27 = vsel %vm5540_vm12, %v2912_v30, %v3096_v63  ;;  %v2920_v19 = vor.u32 %v2918_v39, %v2917_v2  ;;  %v2922_v17 = vrot.slane %v2917_v2, 4  ;;  %v4355_v50 = vpop.permute.xlu0 %4354  ;;  %v3564_v22 = vor.u32 %v3563_v16, %v7442_v23 }
 0x265   : > { %3098 = vst [vmem:[#allocation2 + $0xa8] sm:$0xf] %v3097_v27  ;;  %v3090_v26 = vsel %vm5540_vm12, %v2895_v49, %v3089_v40  ;;  %v2903_v28 = vor.u32 %v2901_v60, %v2900_v61  ;;  %v2905_v1 = vrot.slane %v2900_v61, 4  ;;  %v3579_v53 = vrot.slane %v3578_v24, 4 }
 0x266   : > { %3091 = vst [vmem:[#allocation2 + $0x9c] sm:$0xf] %v3090_v26  ;;  %v2921_v43 = vsel %vm5528_vm11, %v2913_v45, %v2920_v19  ;;  %v3101_v41 = vsel %vm5482_vm3, %v2922_v17, %v3100_v56  ;;  %4212 = vrot.lane.b32.xlu1 %v5152_v13, %s5438_s28  ;;  %4443 = vrot.lane.b32.xlu0 %v5151_v9, %s5439_s29  ;;  %v3593_v6 = vrot.slane %v3591_v55, 5  ;;  %v3567_v7 = vshll.u32 %v7396_v25, 16 }
 0x267   : > { %3099 = vst.msk [vmem:[#allocation2 + $0xac] sm:$0xf] %vm226_vm0, %v2921_v43  ;;  %3102 = vst [vmem:[#allocation2 + $0xb0] sm:$0x1] %v3101_v41  ;;  %v2904_v62 = vsel %vm5528_vm11, %v2896_v33, %v2903_v28  ;;  %v3094_v14 = vsel %vm5482_vm3, %v2905_v1, %v3093_v32  ;;  %v7474_v31 = vpop.permute.xlu1 %4265  ;;  %v3554_v20 = vor.u32 %v3553_v10, %v3550_v57  ;;  %v3565_v54 = vrot.slane %v3564_v22, 4 }
 0x268   : > { %3092 = vst.msk [vmem:[#allocation2 + $0xa0] sm:$0xf] %vm226_vm0, %v2904_v62  ;;  %3095 = vst [vmem:[#allocation2 + $0xa4] sm:$0x1] %v3094_v14  ;;  %v4033_v48 = vpop.permute.xlu0 %4032  ;;  %v3594_v63 = vsel %vm5584_vm15, %v3589_v44, %v3593_v6  ;;  %v3584_v25 = vsel %vm5584_vm15, %v3579_v53, %v7425_v11  ;;  %v3569_v39 = vrot.slane %v3567_v7, 5 }
 0x269   : > { %v7496_v40 = vcombine.low %v3584_v25, %v3594_v63  ;;  %v3555_v56 = vrot.slane %v3554_v20, 4 }
 0x26a   : > { %3977 = vrot.lane.b32.xlu1 %v5151_v9, %s5434_s24  ;;  %4210 = vrot.lane.b32.xlu0 %v5151_v9, %s5438_s28 }
 0x26b   : > { %v3724_v12 = vpop.permute.xlu1 %3723  ;;  %v3560_v28 = vsel %vm5584_vm15, %v3555_v56, %v7442_v23 }
 0x26c   : > { %v7483_v13 = vld [vmem:[#allocation2 + $0xa8] sm:$0xf]  ;;  %3767 = vst.msk [vmem:[#allocation3 + $0x20] sm:$0xff] %vm1563_vm2, %v3724_v12  ;;  %v4120_v16 = vpop.permute.xlu0 %4119 }
 0x26d   : > { %v7481_v36 = vld [vmem:[#allocation2 + $0x9c] sm:$0xf]  ;;  %4007 = vst.msk [vmem:[#allocation3 + $0x20] sm:$0xff] %vm1807_vm4, %v7394_v15  ;;  %v3570_v15 = vsel %vm5584_vm15, %v3565_v54, %v3569_v39  ;;  %v3620_v32 = vshrl.u32 %v7483_v13, 16 }
 0x26e   : > { %v7485_v59 = vld [vmem:[#allocation2 + $0xac] sm:$0xf]  ;;  %v3596_v47 = vshrl.u32 %v7481_v36, 16  ;;  %v3599_v52 = vshll.u32 %v7481_v36, 16  ;;  %4165 = vst.msk [vmem:[#allocation3 + $0x10] sm:$0xff] %vm1969_vm7, %v4120_v16  ;;  %4370 = vrot.lane.b32.xlu0 %v7496_v40, %s5441_s10  ;;  %v7541_v41 = vcombine.low %v3560_v28, %v3570_v15  ;;  %v5137_v57 = vrot.slane %v7481_v36, 9 }
 0x26f   : > { %v7494_v30 = vcombine.low %v7483_v13, %v7485_v59  ;;  %v7498_v2 = vld [vmem:[#allocation2 + $0xa0] sm:$0xf]  ;;  %4076 = vst.msk [vmem:[#allocation3 + $0x20] sm:$0xff] %vm1877_vm6, %v4033_v48  ;;  %v3158_v45 = vld [vmem:[#allocation2 + $0xa4] sm:$0x1]  ;;  %v4353_v33 = vpop.permute.xlu1 %4352  ;;  %v3633_v55 = vshrl.u32 %v7485_v59, 16 }
 0x270   : > { %v5105_v11 = vcombine.low %v7481_v36, %v7498_v2  ;;  %v3609_v49 = vshrl.u32 %v7498_v2, 16  ;;  %v3888_v61 = vrot.slane %v7498_v2, 5  ;;  %v3605_v60 = vshll.u32 %v7498_v2, 16  ;;  %4240 = vst.msk [vmem:[#allocation3 + $0x10] sm:$0xff] %vm2045_vm5, %v7432_v21  ;;  %v7528_v21 = vpop.permute.xlu0 %4433 }
 0x271   : > { %4050 = vrot.lane.b32.xlu1 %v7494_v30, %s5435_s25  ;;  %3281 = vst.msk [vmem:[#allocation3 + $0x70] sm:$0xff] %vm1063_vm13, %v7494_v30  ;;  %v3598_v27 = vrot.slane %v3596_v47, 4  ;;  %v3601_v19 = vrot.slane %v3599_v52, 5  ;;  %v5326_v43 = vpop.f32.mrb[28].mxu0  ;;  %v3615_v23 = vshll.u32 %v3158_v45, 16  ;;  %v3891_v14 = vrot.slane %v3158_v45, 5 }
 0x272   : > { %3280 = vst.msk [vmem:[#allocation3 + $0x68] sm:$0xff] %vm1063_vm13, %v5105_v11  ;;  %v3611_v17 = vrot.slane %v3609_v49, 4  ;;  %v7524_v26 = vrot.slane %v3605_v60, 5  ;;  %v3890_v1 = vrot.slane %v3888_v61, 4  ;;  %4048 = vrot.lane.b32.xlu0 %v5105_v11, %s5435_s25  ;;  %v2542_v62 = vpop.f32.mrb[29].mxu0  ;;  %v7548_v10 = vrot.slane %v3620_v32, 4 }
 0x273   : > { %4309 = vst.msk [vmem:[#allocation3 + $0x10] sm:$0xff] %vm2115_vm8, %v7292_v42  ;;  %v3623_v42 = vshll.u32 %v7483_v13, 16  ;;  %v3602_v9 = vor.u32 %v3601_v19, %v3598_v27  ;;  %v3722_v44 = vpop.permute.xlu1 %3721  ;;  %v3629_v22 = vshll.u32 %v7485_v59, 16  ;;  %v3889_v36 = vsel %vm5570_vm14, %v5137_v57, %v3888_v61  ;;  %v3110_v32 = vld [vmem:[#allocation2 + $0xc0] sm:$0xf] }
 0x274   : > { %4400 = vst.msk [vmem:[#allocation3 + $0x10] sm:$0xff] %vm2207_vm9, %v4355_v50  ;;  %4399 = vst.msk [vmem:[#allocation3 + $0x8] sm:$0xff] %vm2207_vm9, %v4353_v33  ;;  %v3612_v24 = vor.u32 %v3611_v17, %v7524_v26  ;;  %v5327_v50 = vpop.f32.mrb[30].mxu0  ;;  %v7553_v48 = vpop.permute.xlu0 %3967  ;;  %v3892_v63 = vsel %vm5570_vm14, %v3890_v1, %v3891_v14  ;;  %v3617_v47 = vrot.slane %v3615_v23, 5  ;;  %v3635_v39 = vrot.slane %v3633_v55, 4 }
 0x275   : > { %4475 = vst.msk [vmem:[#allocation3 + $0x10] sm:$0xff] %vm8045_vm1, %v7363_v58  ;;  %4137 = vrot.lane.b32.xlu1 %v7496_v40, %s5440_s9  ;;  %v2551_v58 = vadd.f32 %v7246_v3, %v5326_v43  ;;  %v2554_v6 = vadd.f32 %v7246_v3, %v5327_v50  ;;  %v2545_v7 = vpop.f32.mrb[31].mxu0  ;;  %v3603_v2 = vrot.slane %v3602_v9, 4  ;;  %v7573_v49 = vrot.slane %v3629_v22, 5  ;;  %v3103_v14 = vld [vmem:[#allocation2 + $0xb4] sm:$0xf] }
 0x276   : > { %4474 = vst.msk [vmem:[#allocation3 + $0x8] sm:$0xff] %vm8047_vm10, %v7417_v38  ;;  %v2543_v38 = vadd.f32 %v7246_v3, %v2542_v62  ;;  %v3613_v20 = vrot.slane %v3612_v24, 4  ;;  %v2546_v25 = vadd.f32 %v7246_v3, %v2545_v7  ;;  %4135 = vrot.lane.b32.xlu0 %v7541_v41, %s5440_s9  ;;  %v3625_v17 = vrot.slane %v3623_v42, 5  ;;  %v3161_v42 = vld [vmem:[#allocation2 + $0xb0] sm:$0x1] }
 0x277   : > { %v2587_v53 = vmax.f32 %v2551_v58, 0.0  ;;  %3766 = vst.msk [vmem:[#allocation3 + $0x18] sm:$0xff] %vm1563_vm2, %v3722_v44  ;;  %v2588_v12 = vmax.f32 %v2554_v6, 0.0  ;;  %vm8048_vm1 = vcmask 293888   ;;  %v3608_v43 = vsel %vm5584_vm15, %v3603_v2, %v7524_v26  ;;  %v3114_v57 = vld [vmem:[#allocation2 + $0xc8] sm:$0x1] }
 0x278   : > { %v2585_v54 = vmax.f32 %v2543_v38, 0.0  ;;  %4006 = vst.msk [vmem:[#allocation3 + $0x18] sm:$0xff] %vm1807_vm4, %v7429_v34  ;;  %v2586_v16 = vmax.f32 %v2546_v25, 0.0  ;;  %v7569_v34 = vpop.permute.xlu1 %4200  ;;  %v3618_v45 = vsel %vm5584_vm15, %v3613_v20, %v3617_v47  ;;  %vm8049_vm10 = vmmov %vm8048_vm1  ;;  %v3636_v50 = vor.u32 %v3635_v39, %v7573_v49  ;;  %v3107_v20 = vld [vmem:[#allocation2 + $0xbc] sm:$0x1] }
 0x279   : > { %4281 = vrot.lane.b32.xlu1 %v5105_v11, %s5436_s26  ;;  %v5250_v52 = vpack.c.bf16 %v2587_v53, %v2587_v53  ;;  %4075 = vst.msk [vmem:[#allocation3 + $0x18] sm:$0xff] %vm1877_vm6, %v7290_v51  ;;  %v7571_v11 = vcombine.low %v3889_v36, %v3892_v63  ;;  %v5251_v60 = vpack.c.bf16 %v2588_v12, %v2588_v12  ;;  %v7577_v51 = vpop.permute.xlu0 %4431 }
 0x27a   : > { %v5248_v3 = vpack.c.bf16 %v2585_v54, %v2585_v54  ;;  %4166 = vst.msk [vmem:[#allocation3 + $0x18] sm:$0xff] %vm1969_vm7, %v7464_v5  ;;  %v5249_v19 = vpack.c.bf16 %v2586_v16, %v2586_v16  ;;  %v7594_v55 = vcombine.low %v3608_v43, %v3618_v45  ;;  %v3626_v53 = vor.u32 %v3625_v17, %v7548_v10 }
 0x27b   : > { %v2941_v56 = vshrl.u32 %v5250_v52, 16  ;;  %v2944_v61 = vshll.u32 %v5250_v52, 16  ;;  %4241 = vst.msk [vmem:[#allocation3 + $0x18] sm:$0xff] %vm2045_vm5, %v7401_v37  ;;  %4447 = vrot.lane.b32.xlu0 %v7571_v11, %s5439_s29  ;;  %v2949_v33 = vshrl.u32 %v5251_v60, 16  ;;  %v2952_v28 = vshll.u32 %v5251_v60, 16 }
 0x27c   : > { %v2924_v27 = vshrl.u32 %v5248_v3, 16  ;;  %v2927_v5 = vshll.u32 %v5248_v3, 16  ;;  %4310 = vst.msk [vmem:[#allocation3 + $0x18] sm:$0xff] %vm2115_vm8, %v7474_v31  ;;  %v4491_v1 = vld [vmem:[#allocation3 + $0x10] sm:$0xff]  ;;  %v2932_v31 = vshrl.u32 %v5249_v19, 16  ;;  %v2935_v23 = vshll.u32 %v5249_v19, 16 }
 0x27d   : > { %v4490_v15 = vld [vmem:[#allocation3 + $0x8] sm:$0xff]  ;;  %3739 = vrot.lane.b32.xlu1 %v7496_v40, %s5437_s27  ;;  %v2943_v37 = vrot.slane %v2941_v56, 7  ;;  %v7592_v40 = vpop.permute.xlu1 %3965  ;;  %v2951_v9 = vrot.slane %v2949_v33, 7  ;;  %v7596_v38 = vpop.permute.xlu0 %4198  ;;  %v3639_v54 = vshll.u32 %v3161_v42, 16  ;;  %v3637_v39 = vrot.slane %v3636_v50, 4 }
 0x27e   : > { %5335 = vmatmul.mubr.msk.bf16.vlgmr.msra.gmra.mrb[0].mxu1 %vm8048_vm1, %v4490_v15  ;;  %v2926_v24 = vrot.slane %v2924_v27, 7  ;;  %v2934_v22 = vrot.slane %v2932_v31, 7  ;;  %v3895_v3 = vrot.slane %v7485_v59, 5  ;;  %v3627_v56 = vrot.slane %v3626_v53, 4 }
 0x27f   : > { %5338 = vmatprep.mubr.msk.bf16.mxu1 %vm8049_vm10, %v4491_v1  ;;  %v2946_v58 = vor.u32 %v2944_v61, %v2943_v37  ;;  %v2947_v62 = vrot.slane %v2943_v37, 4  ;;  %4139 = vrot.lane.b32.xlu0 %v7594_v55, %s5440_s9  ;;  %v2954_v7 = vor.u32 %v2952_v28, %v2951_v9  ;;  %v2956_v63 = vrot.slane %v2951_v9, 4 }
 0x280   : > { %v2929_v44 = vor.u32 %v2927_v5, %v2926_v24  ;;  %v2930_v26 = vrot.slane %v2926_v24, 4  ;;  %v2937_v36 = vor.u32 %v2935_v23, %v2934_v22  ;;  %v2939_v47 = vrot.slane %v2934_v22, 4 }
 0x281   : > { %4368 = vrot.lane.b32.xlu1 %v7541_v41, %s5441_s10  ;;  %v3111_v6 = vsel %vm5540_vm12, %v2946_v58, %v3110_v32  ;;  %v7608_v52 = vpop.permute.xlu1 %4038  ;;  %v2955_v12 = vsel %vm5528_vm11, %v2947_v62, %v2954_v7  ;;  %v3115_v10 = vsel %vm5482_vm3, %v2956_v63, %v3114_v57  ;;  %v7614_v2 = vpop.permute.xlu0 %4271  ;;  %v3641_v59 = vrot.slane %v3639_v54, 5 }
 0x282   : > { %3112 = vst [vmem:[#allocation2 + $0xc0] sm:$0xf] %v3111_v6  ;;  %v3104_v25 = vsel %vm5540_vm12, %v2929_v44, %v3103_v14  ;;  %3113 = vst.msk [vmem:[#allocation2 + $0xc4] sm:$0xf] %vm226_vm0, %v2955_v12  ;;  %v2938_v35 = vsel %vm5528_vm11, %v2930_v26, %v2937_v36  ;;  %v3108_v16 = vsel %vm5482_vm3, %v2939_v47, %v3107_v20  ;;  %v3897_v15 = vrot.slane %v3895_v3, 4 }
 0x283   : > { %3105 = vst [vmem:[#allocation2 + $0xb4] sm:$0xf] %v3104_v25  ;;  %3116 = vst [vmem:[#allocation2 + $0xc8] sm:$0x1] %v3115_v10  ;;  %4214 = vrot.lane.b32.xlu0 %v7571_v11, %s5438_s28  ;;  %v3642_v29 = vsel %vm5584_vm15, %v3637_v39, %v3641_v59  ;;  %v3632_v0 = vsel %vm5584_vm15, %v3627_v56, %v7573_v49  ;;  %v5138_v5 = vrot.slane %v7483_v13, 9 }
 0x284   : > { %3106 = vst.msk [vmem:[#allocation2 + $0xb8] sm:$0xf] %vm226_vm0, %v2938_v35  ;;  %3109 = vst [vmem:[#allocation2 + $0xbc] sm:$0x1] %v3108_v16  ;;  %v7640_v27 = vcombine.low %v3632_v0, %v3642_v29  ;;  %vm8050_vm0 = vcmask 294144  }
 0x285   : > { %3737 = vrot.lane.b32.xlu1 %v7541_v41, %s5437_s27  ;;  %v7627_v61 = vpop.permute.xlu1 %4125  ;;  %v4359_v60 = vpop.permute.xlu0 %4358  ;;  %v3898_v41 = vrot.slane %v3161_v42, 5  ;;  %v3896_v28 = vsel %vm5570_vm14, %v5138_v5, %v3895_v3  ;;  %vm8051_vm3 = vmmov %vm8050_vm0 }
 0x286   : > { %vm8052_vm11 = vmmov %vm8048_vm1 }
 0x287   : > { %4283 = vrot.lane.b32.xlu0 %v7494_v30, %s5436_s26  ;;  %v3899_v37 = vsel %vm5570_vm14, %v3897_v15, %v3898_v41  ;;  %vm8053_vm12 = vmmov %vm8048_vm1 }
 0x288   : > { %v5154_v31 = vcombine.low %v3896_v28, %v3899_v37  ;;  %v7735_v28 = vld [vmem:[#allocation2 + $0xcc] sm:$0xf]  ;;  %vm8054_vm1 = vmmov %vm8050_vm0 }
 0x289   : > { %3981 = vrot.lane.b32.xlu1 %v7571_v11, %s5434_s24  ;;  %v7638_v45 = vpop.permute.xlu1 %4269  ;;  %v4037_v17 = vpop.permute.xlu0 %4036  ;;  %v7674_v20 = vld [vmem:[#allocation2 + $0xc0] sm:$0xf]  ;;  %vm8055_vm10 = vmmov %vm8050_vm0 }
 0x28a   : > { %v3162_v19 = vld [vmem:[#allocation2 + $0xb4] sm:$0xf]  ;;  %v4089_v54 = vshrl.u32 %v7674_v20, 16  ;;  %v4092_v25 = vshll.u32 %v7674_v20, 16 }
 0x28b   : > { %v5139_v11 = vrot.slane %v3162_v19, 9  ;;  %v3644_v32 = vshrl.u32 %v3162_v19, 16  ;;  %v3647_v33 = vshll.u32 %v3162_v19, 16  ;;  %4374 = vrot.lane.b32.xlu0 %v7640_v27, %s5441_s10  ;;  %v3163_v30 = vld [vmem:[#allocation2 + $0xb8] sm:$0xf] }
 0x28c   : > { %v3164_v49 = vld [vmem:[#allocation2 + $0xbc] sm:$0x1]  ;;  %v3902_v13 = vrot.slane %v3163_v30, 5  ;;  %v5107_v43 = vcombine.low %v3162_v19, %v3163_v30  ;;  %v3653_v23 = vshll.u32 %v3163_v30, 16  ;;  %v3657_v42 = vshrl.u32 %v3163_v30, 16 }
 0x28d   : > { %4141 = vrot.lane.b32.xlu1 %v7640_v27, %s5440_s9  ;;  %v3905_v1 = vrot.slane %v3164_v49, 5  ;;  %v3728_v24 = vpop.permute.xlu1 %3727  ;;  %v4124_v58 = vpop.permute.xlu0 %4123  ;;  %v3646_v9 = vrot.slane %v3644_v32, 4  ;;  %v3649_v50 = vrot.slane %v3647_v33, 5  ;;  %v3663_v63 = vshll.u32 %v3164_v49, 16 }
 0x28e   : > { %3769 = vst.msk [vmem:[#allocation3 + $0x30] sm:$0xff] %vm1563_vm2, %v3728_v24  ;;  %v3903_v62 = vsel %vm5570_vm14, %v5139_v11, %v3902_v13  ;;  %v3904_v14 = vrot.slane %v3902_v13, 4  ;;  %v3655_v44 = vrot.slane %v3653_v23, 5  ;;  %v3659_v26 = vrot.slane %v3657_v42, 4  ;;  %v7737_v13 = vld [vmem:[#allocation2 + $0xd0] sm:$0xf] }
 0x28f   : > { %3282 = vst.msk [vmem:[#allocation3 + $0x78] sm:$0xff] %vm1063_vm13, %v5107_v43  ;;  %4449 = vrot.lane.b32.xlu0 %v5154_v31, %s5439_s29  ;;  %v3650_v6 = vor.u32 %v3649_v50, %v3646_v9  ;;  %v4091_v39 = vrot.slane %v4089_v54, 4  ;;  %v4094_v3 = vrot.slane %v4092_v25, 5  ;;  %v5158_v49 = vrot.slane %v7674_v20, 9 }
 0x290   : > { %4009 = vst.msk [vmem:[#allocation3 + $0x30] sm:$0xff] %vm1807_vm4, %v7553_v48  ;;  %v3906_v57 = vsel %vm5570_vm14, %v3904_v14, %v3905_v1  ;;  %v3660_v7 = vor.u32 %v3659_v26, %v3655_v44  ;;  %v4324_v23 = vshrl.u32 %v7735_v28, 16  ;;  %v4327_v42 = vshll.u32 %v7735_v28, 16 }
 0x291   : > { %4167 = vst.msk [vmem:[#allocation3 + $0x20] sm:$0xff] %vm1969_vm7, %v4124_v58  ;;  %4372 = vrot.lane.b32.xlu1 %v7594_v55, %s5441_s10  ;;  %v4357_v48 = vpop.permute.xlu1 %4356  ;;  %v7668_v22 = vcombine.low %v3903_v62, %v3906_v57  ;;  %v7672_v53 = vpop.permute.xlu0 %4437  ;;  %v4095_v0 = vor.u32 %v4094_v3, %v4091_v39  ;;  %v4337_v58 = vshrl.u32 %v7737_v13, 16  ;;  %v4333_v62 = vshll.u32 %v7737_v13, 16 }
 0x292   : > { %4078 = vst.msk [vmem:[#allocation3 + $0x30] sm:$0xff] %vm1877_vm6, %v4037_v17  ;;  %v3661_v12 = vrot.slane %v3660_v7, 4  ;;  %v4326_v57 = vrot.slane %v4324_v23, 4  ;;  %v5162_v3 = vrot.slane %v7735_v28, 9 }
 0x293   : > { %4242 = vst.msk [vmem:[#allocation3 + $0x20] sm:$0xff] %vm2045_vm5, %v7596_v38  ;;  %v7676_v38 = vld [vmem:[#allocation2 + $0xc4] sm:$0xf]  ;;  %4451 = vrot.lane.b32.xlu0 %v7668_v22, %s5439_s29  ;;  %v4096_v17 = vrot.slane %v4095_v0, 4  ;;  %v4339_v7 = vrot.slane %v4337_v58, 4 }
 0x294   : > { %4311 = vst.msk [vmem:[#allocation3 + $0x20] sm:$0xff] %vm2115_vm8, %v7446_v4  ;;  %v4102_v36 = vshrl.u32 %v7676_v38, 16  ;;  %v4098_v10 = vshll.u32 %v7676_v38, 16  ;;  %v4182_v32 = vrot.slane %v7676_v38, 5  ;;  %v5156_v30 = vcombine.low %v7674_v20, %v7676_v38  ;;  %v3170_v38 = vld [vmem:[#allocation2 + $0xd4] sm:$0x1] }
 0x295   : > { %4402 = vst.msk [vmem:[#allocation3 + $0x20] sm:$0xff] %vm2207_vm9, %v4359_v60  ;;  %4401 = vst.msk [vmem:[#allocation3 + $0x18] sm:$0xff] %vm2207_vm9, %v4357_v48  ;;  %3741 = vrot.lane.b32.xlu1 %v7594_v55, %s5437_s27  ;;  %v3726_v4 = vpop.permute.xlu1 %3725  ;;  %v7690_v47 = vpop.permute.xlu0 %3971  ;;  %v4329_v48 = vrot.slane %v4327_v42, 5  ;;  %v4343_v25 = vshll.u32 %v3170_v38, 16 }
 0x296   : > { %4477 = vst.msk [vmem:[#allocation3 + $0x20] sm:$0xff] %vm8050_vm0, %v7528_v21  ;;  %v3651_v21 = vrot.slane %v3650_v6, 4  ;;  %v4104_v59 = vrot.slane %v4102_v36, 4  ;;  %v4184_v24 = vrot.slane %v4182_v32, 4  ;;  %v4335_v6 = vrot.slane %v4333_v62, 5  ;;  %vm8056_vm0 = vmmov %vm8052_vm11 }
 0x297   : > { %4476 = vst.msk [vmem:[#allocation3 + $0x18] sm:$0xff] %vm8051_vm3, %v7577_v51  ;;  %v3665_v51 = vrot.slane %v3663_v63, 5  ;;  %3983 = vrot.lane.b32.xlu0 %v5154_v31, %s5434_s24  ;;  %vm8059_vm3 = vmmov %vm8054_vm1 }
 0x298   : > { %3768 = vst.msk [vmem:[#allocation3 + $0x28] sm:$0xff] %vm1563_vm2, %v3726_v4  ;;  %v3656_v16 = vsel %vm5584_vm15, %v3651_v21, %v3655_v44  ;;  %v4183_v44 = vsel %vm5570_vm14, %v5158_v49, %v4182_v32  ;;  %v4340_v54 = vor.u32 %v4339_v7, %v4335_v6 }
 0x299   : > { %4008 = vst.msk [vmem:[#allocation3 + $0x28] sm:$0xff] %vm1807_vm4, %v7592_v40  ;;  %4216 = vrot.lane.b32.xlu1 %v5154_v31, %s5438_s28  ;;  %v7701_v55 = vpop.permute.xlu1 %4204  ;;  %v7705_v35 = vpop.permute.xlu0 %4435  ;;  %v3666_v56 = vsel %vm5584_vm15, %v3661_v12, %v3665_v51  ;;  %v4345_v51 = vrot.slane %v4343_v25, 5 }
 0x29a   : > { %4077 = vst.msk [vmem:[#allocation3 + $0x28] sm:$0xff] %vm1877_vm6, %v7440_v46  ;;  %v4100_v46 = vrot.slane %v4098_v10, 5  ;;  %v5123_v29 = vcombine.low %v3656_v16, %v3666_v56  ;;  %v4341_v12 = vrot.slane %v4340_v54, 4  ;;  %v4417_v10 = vrot.slane %v7737_v13, 5 }
 0x29b   : > { %4168 = vst.msk [vmem:[#allocation3 + $0x28] sm:$0xff] %vm1969_vm7, %v7627_v61  ;;  %4052 = vrot.lane.b32.xlu0 %v5107_v43, %s5435_s25  ;;  %v3167_v61 = vld [vmem:[#allocation2 + $0xc8] sm:$0x1]  ;;  %v4420_v56 = vrot.slane %v3170_v38, 5 }
 0x29c   : > { %4243 = vst.msk [vmem:[#allocation3 + $0x28] sm:$0xff] %vm2045_vm5, %v7569_v34  ;;  %v4105_v41 = vor.u32 %v4104_v59, %v4100_v46  ;;  %v4108_v5 = vshll.u32 %v3167_v61, 16  ;;  %v4185_v31 = vrot.slane %v3167_v61, 5  ;;  %v4419_v16 = vrot.slane %v4417_v10, 4 }
 0x29d   : > { %4312 = vst.msk [vmem:[#allocation3 + $0x28] sm:$0xff] %vm2115_vm8, %v7638_v45  ;;  %4285 = vrot.lane.b32.xlu1 %v5107_v43, %s5436_s26  ;;  %v4493_v34 = vld [vmem:[#allocation3 + $0x20] sm:$0xff]  ;;  %v7717_v60 = vpop.permute.xlu1 %3969  ;;  %v4203_v15 = vpop.permute.xlu0 %4202  ;;  %v4101_v43 = vsel %vm5584_vm15, %v4096_v17, %v4100_v46 }
 0x29e   : > { %v4492_v40 = vld [vmem:[#allocation3 + $0x18] sm:$0xff]  ;;  %v4106_v37 = vrot.slane %v4105_v41, 4  ;;  %v4110_v11 = vrot.slane %v4108_v5, 5  ;;  %v4186_v26 = vsel %vm5570_vm14, %v4184_v24, %v4185_v31 }
 0x29f   : > { %5339 = vmatmul.mubr.msk.bf16.gmra.mrb[4].mxu1 %vm8052_vm11, %v4492_v40  ;;  %4143 = vrot.lane.b32.xlu0 %v5123_v29, %s5440_s9  ;;  %v5159_v20 = vcombine.low %v4183_v44, %v4186_v26  ;;  %v4346_v40 = vsel %vm5584_vm15, %v4341_v12, %v4345_v51  ;;  %vm8060_vm11 = vmmov %vm8056_vm0 }
 0x2a0   : > { %5342 = vmatprep.mubr.msk.bf16.mxu1 %vm8053_vm12, %v4493_v34  ;;  %v4418_v34 = vsel %vm5570_vm14, %v5162_v3, %v4417_v10  ;;  %vm8061_vm12 = vmmov %vm8056_vm0 }
 0x2a1   : > { %4376 = vrot.lane.b32.xlu1 %v5123_v29, %s5441_s10  ;;  %v7721_v45 = vpop.permute.xlu1 %4042  ;;  %v7723_v19 = vpop.permute.xlu0 %4275 }
 0x2a3   : > { %4218 = vrot.lane.b32.xlu0 %v7668_v22, %s5438_s28 }
 0x2a5   : > { %3743 = vrot.lane.b32.xlu1 %v7640_v27, %s5437_s27  ;;  %v7730_v33 = vpop.permute.xlu1 %4129  ;;  %v4363_v1 = vpop.permute.xlu0 %4362  ;;  %v4111_v27 = vsel %vm5584_vm15, %v4106_v37, %v4110_v11 }
 0x2a6   : > { %v5157_v9 = vcombine.low %v4101_v43, %v4111_v27 }
 0x2a7   : > { %4287 = vrot.lane.b32.xlu0 %v5156_v30, %s5436_s26 }
 0x2a9   : > { %3745 = vrot.lane.b32.xlu1 %v5123_v29, %s5437_s27  ;;  %v4274_v14 = vpop.permute.xlu1 %4273  ;;  %v4041_v50 = vpop.permute.xlu0 %4040 }
 0x2ab   : > { %4378 = vrot.lane.b32.xlu0 %v5157_v9, %s5441_s10 }
 0x2ad   : > { %3985 = vrot.lane.b32.xlu1 %v7668_v22, %s5434_s24  ;;  %v3732_v63 = vpop.permute.xlu1 %3731  ;;  %v4128_v4 = vpop.permute.xlu0 %4127  ;;  %v4330_v22 = vor.u32 %v4329_v48, %v4326_v57 }
 0x2ae   : > { %3771 = vst.msk [vmem:[#allocation3 + $0x40] sm:$0xff] %vm1563_vm2, %v3732_v63 }
 0x2af   : > { %4011 = vst.msk [vmem:[#allocation3 + $0x40] sm:$0xff] %vm1807_vm4, %v7690_v47  ;;  %4453 = vrot.lane.b32.xlu0 %v5159_v20, %s5439_s29  ;;  %v4331_v21 = vrot.slane %v4330_v22, 4 }
 0x2b0   : > { %4169 = vst.msk [vmem:[#allocation3 + $0x30] sm:$0xff] %vm1969_vm7, %v4128_v4 }
 0x2b1   : > { %4054 = vrot.lane.b32.xlu1 %v5156_v30, %s5435_s25  ;;  %4080 = vst.msk [vmem:[#allocation3 + $0x40] sm:$0xff] %vm1877_vm6, %v4041_v50  ;;  %v4361_v36 = vpop.permute.xlu1 %4360  ;;  %v4442_v47 = vpop.permute.xlu0 %4441 }
 0x2b2   : > { %4244 = vst.msk [vmem:[#allocation3 + $0x30] sm:$0xff] %vm2045_vm5, %v4203_v15 }
 0x2b3   : > { %4313 = vst.msk [vmem:[#allocation3 + $0x30] sm:$0xff] %vm2115_vm8, %v7614_v2 }
 0x2b4   : > { %4404 = vst.msk [vmem:[#allocation3 + $0x30] sm:$0xff] %vm2207_vm9, %v4363_v1  ;;  %4403 = vst.msk [vmem:[#allocation3 + $0x28] sm:$0xff] %vm2207_vm9, %v4361_v36 }
 0x2b5   : > { %4479 = vst.msk [vmem:[#allocation3 + $0x30] sm:$0xff] %vm8054_vm1, %v7672_v53  ;;  %4145 = vrot.lane.b32.xlu1 %v5157_v9, %s5440_s9  ;;  %v3730_v2 = vpop.permute.xlu1 %3729  ;;  %v3976_v39 = vpop.permute.xlu0 %3975  ;;  %v5160_v53 = vcombine.low %v7735_v28, %v7737_v13 }
 0x2b6   : > { %4478 = vst.msk [vmem:[#allocation3 + $0x28] sm:$0xff] %vm8055_vm10, %v7705_v35  ;;  %v4336_v35 = vsel %vm5584_vm15, %v4331_v21, %v4335_v6  ;;  %vm8057_vm15 = vmmov %vm8056_vm0 }
 0x2b7   : > { %3770 = vst.msk [vmem:[#allocation3 + $0x38] sm:$0xff] %vm1563_vm2, %v3730_v2  ;;  %v5161_v18 = vcombine.low %v4336_v35, %v4346_v40  ;;  %vm8062_vm10 = vmmov %vm8054_vm1 }
 0x2b8   : > { %4010 = vst.msk [vmem:[#allocation3 + $0x38] sm:$0xff] %vm1807_vm4, %v7717_v60  ;;  %v4421_v60 = vsel %vm5570_vm14, %v4419_v16, %v4420_v56  ;;  %vm8058_vm14 = vmmov %vm8054_vm1 }
 0x2b9   : > { %4220 = vrot.lane.b32.xlu1 %v5159_v20, %s5438_s28  ;;  %4079 = vst.msk [vmem:[#allocation3 + $0x38] sm:$0xff] %vm1877_vm6, %v7608_v52  ;;  %v4209_v46 = vpop.permute.xlu1 %4208  ;;  %v4440_v59 = vpop.permute.xlu0 %4439  ;;  %v5163_v15 = vcombine.low %v4418_v34, %v4421_v60  ;;  %s7895_s28 = scalar_lea.vmem %s8026_s5, %s5186_s20 }
 0x2ba   : > { %4170 = vst.msk [vmem:[#allocation3 + $0x38] sm:$0xff] %vm1969_vm7, %v7730_v33 }
 0x2bb   : > { %4245 = vst.msk [vmem:[#allocation3 + $0x38] sm:$0xff] %vm2045_vm5, %v7701_v55 }
 0x2bc   : > { %4314 = vst.msk [vmem:[#allocation3 + $0x38] sm:$0xff] %vm2115_vm8, %v4274_v14  ;;  %v4495_v52 = vld [vmem:[#allocation3 + $0x30] sm:$0xff] }
 0x2bd   : > { %v4494_v61 = vld [vmem:[#allocation3 + $0x28] sm:$0xff]  ;;  %4289 = vrot.lane.b32.xlu1 %v5160_v53, %s5436_s26  ;;  %v3974_v29 = vpop.permute.xlu1 %3973  ;;  %v4207_v55 = vpop.permute.xlu0 %4206 }
 0x2be   : > { %5343 = vmatmul.mubr.msk.bf16.gmra.mrb[8].mxu1 %vm8056_vm0, %v4494_v61 }
 0x2bf   : > { %5346 = vmatprep.mubr.msk.bf16.mxu1 %vm8057_vm15, %v4495_v52  ;;  %vm8063_vm15 = vmmov %vm8056_vm0 }
 0x2c1   : > { %4380 = vrot.lane.b32.xlu1 %v5161_v18, %s5441_s10  ;;  %v7800_v0 = vpop.permute.xlu1 %4046  ;;  %v4280_v41 = vpop.permute.xlu0 %4279 }
 0x2c5   : > { %4455 = vrot.lane.b32.xlu1 %v5163_v15, %s5439_s29  ;;  %v4134_v5 = vpop.permute.xlu1 %4133  ;;  %v4367_v17 = vpop.permute.xlu0 %4366 }
 0x2c9   : > { %v4278_v37 = vpop.permute.xlu1 %4277  ;;  %v4045_v11 = vpop.permute.xlu0 %4044 }
 0x2cd   : > { %v3736_v32 = vpop.permute.xlu1 %3735  ;;  %v4132_v33 = vpop.permute.xlu0 %4131 }
 0x2ce   : > { %3773 = vst.msk [vmem:[#allocation3 + $0x50] sm:$0xff] %vm1563_vm2, %v3736_v32 }
 0x2cf   : > { %4013 = vst.msk [vmem:[#allocation3 + $0x50] sm:$0xff] %vm1807_vm4, %v3976_v39 }
 0x2d0   : > { %4171 = vst.msk [vmem:[#allocation3 + $0x40] sm:$0xff] %vm1969_vm7, %v4132_v33 }
 0x2d1   : > { %4082 = vst.msk [vmem:[#allocation3 + $0x50] sm:$0xff] %vm1877_vm6, %v4045_v11  ;;  %v4365_v8 = vpop.permute.xlu1 %4364  ;;  %v4446_v30 = vpop.permute.xlu0 %4445  ;;  %v4744_v11 = vld [vmem:[%s5504_s23] sm:$0xff] }
 0x2d2   : > { %4246 = vst.msk [vmem:[#allocation3 + $0x40] sm:$0xff] %vm2045_vm5, %v4207_v55 }
 0x2d3   : > { %4315 = vst.msk [vmem:[#allocation3 + $0x40] sm:$0xff] %vm2115_vm8, %v7723_v19 }
 0x2d4   : > { %4406 = vst.msk [vmem:[#allocation3 + $0x40] sm:$0xff] %vm2207_vm9, %v4367_v17  ;;  %4405 = vst.msk [vmem:[#allocation3 + $0x38] sm:$0xff] %vm2207_vm9, %v4365_v8  ;;  %v4747_v8 = vld [vmem:[%s5504_s23 + $0x18] sm:$0xff] }
 0x2d5   : > { %4481 = vst.msk [vmem:[#allocation3 + $0x40] sm:$0xff] %vm8058_vm14, %v4442_v47  ;;  %v3734_v49 = vpop.permute.xlu1 %3733  ;;  %v3980_v28 = vpop.permute.xlu0 %3979  ;;  %vm8064_vm14 = vmmov %vm8054_vm1 }
 0x2d6   : > { %4480 = vst.msk [vmem:[#allocation3 + $0x38] sm:$0xff] %vm8059_vm3, %v4440_v59  ;;  %vm8065_vm3 = vmmov %vm8054_vm1 }
 0x2d7   : > { %3772 = vst.msk [vmem:[#allocation3 + $0x48] sm:$0xff] %vm1563_vm2, %v3734_v49 }
 0x2d8   : > { %4012 = vst.msk [vmem:[#allocation3 + $0x48] sm:$0xff] %vm1807_vm4, %v3974_v29 }
 0x2d9   : > { %4081 = vst.msk [vmem:[#allocation3 + $0x48] sm:$0xff] %vm1877_vm6, %v7721_v45  ;;  %v4213_v19 = vpop.permute.xlu1 %4212  ;;  %v4444_v13 = vpop.permute.xlu0 %4443 }
 0x2da   : > { %4172 = vst.msk [vmem:[#allocation3 + $0x48] sm:$0xff] %vm1969_vm7, %v4134_v5  ;;  %v4746_v5 = vld [vmem:[%s5504_s23 + $0x10] sm:$0xff] }
 0x2db   : > { %4247 = vst.msk [vmem:[#allocation3 + $0x48] sm:$0xff] %vm2045_vm5, %v4209_v46 }
 0x2dc   : > { %4316 = vst.msk [vmem:[#allocation3 + $0x48] sm:$0xff] %vm2115_vm8, %v4278_v37  ;;  %v4497_v43 = vld [vmem:[#allocation3 + $0x40] sm:$0xff] }
 0x2dd   : > { %v4496_v1 = vld [vmem:[#allocation3 + $0x38] sm:$0xff]  ;;  %v3978_v27 = vpop.permute.xlu1 %3977  ;;  %v4211_v24 = vpop.permute.xlu0 %4210 }
 0x2de   : > { %5347 = vmatmul.mubr.msk.bf16.gmra.mrb[12].mxu1 %vm8060_vm11, %v4496_v1  ;;  %vm8066_vm11 = vmmov %vm8056_vm0 }
 0x2df   : > { %5350 = vmatprep.mubr.msk.bf16.mxu1 %vm8061_vm12, %v4497_v43  ;;  %vm8067_vm12 = vmmov %vm8056_vm0 }
 0x2e1   : > { %v4371_v23 = vpop.permute.xlu0 %4370 }
 0x2e3   : > { %v4051_v31 = vpop.permute.xlu1 %4050 }
 0x2e5   : > { %v4049_v45 = vpop.permute.xlu0 %4048 }
 0x2e7   : > { %v4138_v42 = vpop.permute.xlu1 %4137 }
 0x2e9   : > { %v4136_v62 = vpop.permute.xlu0 %4135 }
 0x2ea   : > { %4173 = vst.msk [vmem:[#allocation3 + $0x50] sm:$0xff] %vm1969_vm7, %v4136_v62 }
 0x2eb   : > { %v4282_v58 = vpop.permute.xlu1 %4281  ;;  %4248 = vst.msk [vmem:[#allocation3 + $0x50] sm:$0xff] %vm2045_vm5, %v4211_v24 }
 0x2ec   : > { %4317 = vst.msk [vmem:[#allocation3 + $0x50] sm:$0xff] %vm2115_vm8, %v4280_v41 }
 0x2ed   : > { %4408 = vst.msk [vmem:[#allocation3 + $0x50] sm:$0xff] %vm2207_vm9, %v4371_v23  ;;  %v4448_v9 = vpop.permute.xlu0 %4447 }
 0x2ee   : > { %4483 = vst.msk [vmem:[#allocation3 + $0x50] sm:$0xff] %vm8054_vm1, %v4446_v30 }
 0x2ef   : > { %v3740_v14 = vpop.permute.xlu1 %3739 }
 0x2f0   : > { %3775 = vst.msk [vmem:[#allocation3 + $0x60] sm:$0xff] %vm1563_vm2, %v3740_v14 }
 0x2f1   : > { %4015 = vst.msk [vmem:[#allocation3 + $0x60] sm:$0xff] %vm1807_vm4, %v3980_v28  ;;  %v4140_v44 = vpop.permute.xlu0 %4139 }
 0x2f2   : > { %4084 = vst.msk [vmem:[#allocation3 + $0x60] sm:$0xff] %vm1877_vm6, %v4049_v45 }
 0x2f3   : > { %v4369_v50 = vpop.permute.xlu1 %4368  ;;  %4175 = vst.msk [vmem:[#allocation3 + $0x60] sm:$0xff] %vm1969_vm7, %v4140_v44 }
 0x2f4   : > { %4407 = vst.msk [vmem:[#allocation3 + $0x48] sm:$0xff] %vm2207_vm9, %v4369_v50 }
 0x2f5   : > { %4482 = vst.msk [vmem:[#allocation3 + $0x48] sm:$0xff] %vm8062_vm10, %v4444_v13  ;;  %v4215_v57 = vpop.permute.xlu0 %4214  ;;  %v4499_v63 = vld [vmem:[#allocation3 + $0x50] sm:$0xff]  ;;  %vm8068_vm10 = vmmov %vm8056_vm0 }
 0x2f6   : > { %4250 = vst.msk [vmem:[#allocation3 + $0x60] sm:$0xff] %vm2045_vm5, %v4215_v57 }
 0x2f7   : > { %v3738_v26 = vpop.permute.xlu1 %3737 }
 0x2f8   : > { %3774 = vst.msk [vmem:[#allocation3 + $0x58] sm:$0xff] %vm1563_vm2, %v3738_v26  ;;  %v4751_v26 = vld [vmem:[%s5504_s23 + $0x38] sm:$0xff] }
 0x2f9   : > { %4014 = vst.msk [vmem:[#allocation3 + $0x58] sm:$0xff] %vm1807_vm4, %v3978_v27  ;;  %v4284_v6 = vpop.permute.xlu0 %4283 }
 0x2fa   : > { %4083 = vst.msk [vmem:[#allocation3 + $0x58] sm:$0xff] %vm1877_vm6, %v7800_v0  ;;  %v7881_v0 = vld [vmem:[%s8025_s4] ss:$0 sm:$0xff] }
 0x2fb   : > { %4174 = vst.msk [vmem:[#allocation3 + $0x58] sm:$0xff] %vm1969_vm7, %v4138_v42  ;;  %v3982_v48 = vpop.permute.xlu1 %3981 }
 0x2fc   : > { %4249 = vst.msk [vmem:[#allocation3 + $0x58] sm:$0xff] %vm2045_vm5, %v4213_v19  ;;  %v4498_v7 = vld [vmem:[#allocation3 + $0x48] sm:$0xff]  ;;  %v4745_v19 = vld [vmem:[%s5504_s23 + $0x8] sm:$0xff] }
 0x2fd   : > { %4318 = vst.msk [vmem:[#allocation3 + $0x58] sm:$0xff] %vm2115_vm8, %v4282_v58  ;;  %4319 = vst.msk [vmem:[#allocation3 + $0x60] sm:$0xff] %vm2115_vm8, %v4284_v6  ;;  %5351 = vmatmul.mubr.msk.bf16.gmra.mrb[16].mxu1 %vm8056_vm0, %v4498_v7  ;;  %v4375_v38 = vpop.permute.xlu0 %4374  ;;  %v4750_v58 = vld [vmem:[%s5504_s23 + $0x30] sm:$0xff]  ;;  %v4749_v7 = vld [vmem:[%s5504_s23 + $0x28] sm:$0xff] }
 0x2fe   : > { %5354 = vmatprep.mubr.msk.bf16.mxu1 %vm8063_vm15, %v4499_v63  ;;  %4410 = vst.msk [vmem:[#allocation3 + $0x60] sm:$0xff] %vm2207_vm9, %v4375_v38  ;;  %vm8069_vm0 = vmmov %vm8054_vm1 }
 0x2ff   : > { %v4142_v20 = vpop.permute.xlu1 %4141 }
 0x301   : > { %v4450_v22 = vpop.permute.xlu0 %4449 }
 0x302   : > { %4485 = vst.msk [vmem:[#allocation3 + $0x60] sm:$0xff] %vm8065_vm3, %v4450_v22 }
 0x303   : > { %v4373_v4 = vpop.permute.xlu1 %4372 }
 0x304   : > { %4409 = vst.msk [vmem:[#allocation3 + $0x58] sm:$0xff] %vm2207_vm9, %v4373_v4 }
 0x305   : > { %4484 = vst.msk [vmem:[#allocation3 + $0x58] sm:$0xff] %vm8064_vm14, %v4448_v9  ;;  %v4452_v25 = vpop.permute.xlu0 %4451  ;;  %v4748_v9 = vld [vmem:[%s5504_s23 + $0x20] sm:$0xff] }
 0x307   : > { %v3742_v54 = vpop.permute.xlu1 %3741 }
 0x308   : > { %3776 = vst.msk [vmem:[#allocation3 + $0x68] sm:$0xff] %vm1563_vm2, %v3742_v54 }
 0x309   : > { %4016 = vst.msk [vmem:[#allocation3 + $0x68] sm:$0xff] %vm1807_vm4, %v3982_v48  ;;  %v3984_v47 = vpop.permute.xlu0 %3983  ;;  %v4501_v12 = vld [vmem:[#allocation3 + $0x60] sm:$0xff] }
 0x30a   : > { %4085 = vst.msk [vmem:[#allocation3 + $0x68] sm:$0xff] %vm1877_vm6, %v4051_v31 }
 0x30b   : > { %4176 = vst.msk [vmem:[#allocation3 + $0x68] sm:$0xff] %vm1969_vm7, %v4142_v20  ;;  %v4217_v36 = vpop.permute.xlu1 %4216 }
 0x30c   : > { %4251 = vst.msk [vmem:[#allocation3 + $0x68] sm:$0xff] %vm2045_vm5, %v4217_v36  ;;  %v4500_v21 = vld [vmem:[#allocation3 + $0x58] sm:$0xff] }
 0x30d   : > { %5355 = vmatmul.mubr.msk.bf16.gmra.mrb[20].mxu1 %vm8066_vm11, %v4500_v21  ;;  %v4053_v10 = vpop.permute.xlu0 %4052  ;;  %v4754_v21 = vld [vmem:[%s5504_s23 + $0x50] sm:$0xff] }
 0x30e   : > { %5358 = vmatprep.mubr.msk.bf16.mxu1 %vm8067_vm12, %v4501_v12 }
 0x30f   : > { %v4286_v51 = vpop.permute.xlu1 %4285 }
 0x310   : > { %4320 = vst.msk [vmem:[#allocation3 + $0x68] sm:$0xff] %vm2115_vm8, %v4286_v51 }
 0x311   : > { %v4144_v39 = vpop.permute.xlu0 %4143 }
 0x313   : > { %v4377_v2 = vpop.permute.xlu1 %4376 }
 0x314   : > { %4411 = vst.msk [vmem:[#allocation3 + $0x68] sm:$0xff] %vm2207_vm9, %v4377_v2 }
 0x315   : > { %4486 = vst.msk [vmem:[#allocation3 + $0x68] sm:$0xff] %vm8054_vm1, %v4452_v25  ;;  %v4219_v3 = vpop.permute.xlu0 %4218 }
 0x317   : > { %v3744_v53 = vpop.permute.xlu1 %3743 }
 0x318   : > { %3777 = vst.msk [vmem:[#allocation3 + $0x70] sm:$0xff] %vm1563_vm2, %v3744_v53  ;;  %v4755_v53 = vld [vmem:[%s5504_s23 + $0x58] sm:$0xff] }
 0x319   : > { %4017 = vst.msk [vmem:[#allocation3 + $0x70] sm:$0xff] %vm1807_vm4, %v3984_v47  ;;  %v4288_v40 = vpop.permute.xlu0 %4287 }
 0x31a   : > { %4086 = vst.msk [vmem:[#allocation3 + $0x70] sm:$0xff] %vm1877_vm6, %v4053_v10  ;;  %v4752_v10 = vld [vmem:[%s5504_s23 + $0x40] sm:$0xff] }
 0x31b   : > { %4177 = vst.msk [vmem:[#allocation3 + $0x70] sm:$0xff] %vm1969_vm7, %v4144_v39  ;;  %v3746_v35 = vpop.permute.xlu1 %3745 }
 0x31c   : > { %4252 = vst.msk [vmem:[#allocation3 + $0x70] sm:$0xff] %vm2045_vm5, %v4219_v3  ;;  %v4502_v16 = vld [vmem:[#allocation3 + $0x68] sm:$0xff] }
 0x31d   : > { %3778 = vst.msk [vmem:[#allocation3 + $0x78] sm:$0xff] %vm1563_vm2, %v3746_v35  ;;  %5359 = vmatmul.mubr.msk.bf16.gmra.mrb[24].mxu1 %vm8068_vm10, %v4502_v16  ;;  %v4379_v46 = vpop.permute.xlu0 %4378  ;;  %vm8070_vm2 = vmmov %vm8068_vm10  ;;  %v4753_v16 = vld [vmem:[%s5504_s23 + $0x48] sm:$0xff] }
 0x31e   : > { %4321 = vst.msk [vmem:[#allocation3 + $0x70] sm:$0xff] %vm2115_vm8, %v4288_v40 }
 0x31f   : > { %v3986_v56 = vpop.permute.xlu1 %3985  ;;  %4412 = vst.msk [vmem:[#allocation3 + $0x70] sm:$0xff] %vm2207_vm9, %v4379_v46 }
 0x320   : > { %4018 = vst.msk [vmem:[#allocation3 + $0x78] sm:$0xff] %vm1807_vm4, %v3986_v56  ;;  %vm8071_vm4 = vmmov %vm8069_vm0 }
 0x321   : > { %v4454_v61 = vpop.permute.xlu0 %4453 }
 0x322   : > { %4487 = vst.msk [vmem:[#allocation3 + $0x70] sm:$0xff] %vm8069_vm0, %v4454_v61 }
 0x323   : > { %v4055_v59 = vpop.permute.xlu1 %4054 }
 0x324   : > { %4087 = vst.msk [vmem:[#allocation3 + $0x78] sm:$0xff] %vm1877_vm6, %v4055_v59  ;;  %vm8072_vm6 = vmmov %vm8070_vm2 }
 0x327   : > { %v4146_v52 = vpop.permute.xlu1 %4145 }
 0x328   : > { %4178 = vst.msk [vmem:[#allocation3 + $0x78] sm:$0xff] %vm1969_vm7, %v4146_v52 }
 0x329   : > { %v4503_v34 = vld [vmem:[#allocation3 + $0x70] sm:$0xff] }
 0x32a   : > { %5362 = vmatprep.mubr.msk.bf16.mxu1 %vm8070_vm2, %v4503_v34 }
 0x32b   : > { %v4221_v18 = vpop.permute.xlu1 %4220 }
 0x32c   : > { %4253 = vst.msk [vmem:[#allocation3 + $0x78] sm:$0xff] %vm2045_vm5, %v4221_v18 }
 0x32f   : > { %v4290_v60 = vpop.permute.xlu1 %4289 }
 0x330   : > { %4322 = vst.msk [vmem:[#allocation3 + $0x78] sm:$0xff] %vm2115_vm8, %v4290_v60 }
 0x333   : > { %v4381_v29 = vpop.permute.xlu1 %4380 }
 0x334   : > { %4413 = vst.msk [vmem:[#allocation3 + $0x78] sm:$0xff] %vm2207_vm9, %v4381_v29 }
 0x337   : > { %v4456_v55 = vpop.permute.xlu1 %4455 }
 0x338   : > { %4488 = vst.msk [vmem:[#allocation3 + $0x78] sm:$0xff] %vm8071_vm4, %v4456_v55  ;;  %v4758_v55 = vld [vmem:[%s5504_s23 + $0x70] sm:$0xff] }
 0x33f   : > { %v4504_v15 = vld [vmem:[#allocation3 + $0x78] sm:$0xff] }
 0x340   : > { %5363 = vmatmul.mubr.msk.bf16.gmra.mrb[28].mxu1 %vm8072_vm6, %v4504_v15 }
 0x351   : > { %v5336_v41 = vpop.f32.mrb[0].mxu1 }
 0x352   : > { %v4626_v17 = vadd.f32 %v5336_v41, %v7881_v0  ;;  %v4617_v37 = vpop.f32.mrb[1].mxu1 }
 0x353   : > { %v4618_v32 = vadd.f32 %v7881_v0, %v4617_v37  ;;  %v5337_v33 = vpop.f32.mrb[2].mxu1 }
 0x354   : > { %v4778_v30 = vadd.f32 %v4746_v5, %v4626_v17  ;;  %v4629_v49 = vadd.f32 %v5337_v33, %v7881_v0  ;;  %v4620_v28 = vpop.f32.mrb[3].mxu1  ;;  %v4756_v5 = vld [vmem:[%s5504_s23 + $0x60] sm:$0xff] }
 0x355   : > { %v4776_v13 = vadd.f32 %v4744_v11, %v4618_v32  ;;  %v4621_v1 = vadd.f32 %v7881_v0, %v4620_v28  ;;  %v4759_v11 = vld [vmem:[%s5504_s23 + $0x78] sm:$0xff] }
 0x356   : > { %v4810_v43 = vmax.f32 %v4778_v30, 0.0  ;;  %v4779_v27 = vadd.f32 %v4747_v8, %v4629_v49  ;;  %v4757_v30 = vld [vmem:[%s5504_s23 + $0x68] sm:$0xff] }
 0x357   : > { %v4808_v24 = vmax.f32 %v4776_v13, 0.0  ;;  %v4777_v31 = vadd.f32 %v4745_v19, %v4621_v1 }
 0x358   : > { %4842 = vst.msk [vmem:[%s7895_s28 + $0x10] sm:$0xff] %vm1063_vm13, %v4810_v43  ;;  %v4811_v23 = vmax.f32 %v4779_v27, 0.0 }
 0x359   : > { %4840 = vst.msk [vmem:[%s7895_s28] sm:$0xff] %vm1063_vm13, %v4808_v24  ;;  %v4809_v42 = vmax.f32 %v4777_v31, 0.0 }
 0x35a   : > { %4843 = vst.msk [vmem:[%s7895_s28 + $0x18] sm:$0xff] %vm1063_vm13, %v4811_v23  ;;  %v4762_v23 = vld [vmem:[%s5504_s23 + $0x90] sm:$0xff] }
 0x35b   : > { %4841 = vst.msk [vmem:[%s7895_s28 + $0x8] sm:$0xff] %vm1063_vm13, %v4809_v42 }
 0x372   : > { %v5340_v45 = vpop.f32.mrb[4].mxu1 }
 0x373   : > { %v4642_v62 = vadd.f32 %v5340_v45, %v7881_v0  ;;  %v4633_v14 = vpop.f32.mrb[5].mxu1 }
 0x374   : > { %v4634_v50 = vadd.f32 %v7881_v0, %v4633_v14  ;;  %v5341_v44 = vpop.f32.mrb[6].mxu1 }
 0x375   : > { %v4782_v57 = vadd.f32 %v4750_v58, %v4642_v62  ;;  %v4645_v48 = vadd.f32 %v5341_v44, %v7881_v0  ;;  %v4636_v6 = vpop.f32.mrb[7].mxu1  ;;  %v4760_v58 = vld [vmem:[%s5504_s23 + $0x80] sm:$0xff] }
 0x376   : > { %v4780_v63 = vadd.f32 %v4748_v9, %v4634_v50  ;;  %v4637_v20 = vadd.f32 %v7881_v0, %v4636_v6  ;;  %v4763_v9 = vld [vmem:[%s5504_s23 + $0x98] sm:$0xff] }
 0x377   : > { %v4814_v38 = vmax.f32 %v4782_v57, 0.0  ;;  %v4783_v4 = vadd.f32 %v4751_v26, %v4645_v48  ;;  %v4761_v57 = vld [vmem:[%s5504_s23 + $0x88] sm:$0xff] }
 0x378   : > { %v4812_v22 = vmax.f32 %v4780_v63, 0.0  ;;  %v4781_v54 = vadd.f32 %v4749_v7, %v4637_v20 }
 0x379   : > { %4846 = vst.msk [vmem:[%s7895_s28 + $0x30] sm:$0xff] %vm1063_vm13, %v4814_v38  ;;  %v4815_v25 = vmax.f32 %v4783_v4, 0.0 }
 0x37a   : > { %4844 = vst.msk [vmem:[%s7895_s28 + $0x20] sm:$0xff] %vm1063_vm13, %v4812_v22  ;;  %v4813_v36 = vmax.f32 %v4781_v54, 0.0 }
 0x37b   : > { %4847 = vst.msk [vmem:[%s7895_s28 + $0x38] sm:$0xff] %vm1063_vm13, %v4815_v25  ;;  %v4766_v25 = vld [vmem:[%s5504_s23 + $0xb0] sm:$0xff] }
 0x37c   : > { %4845 = vst.msk [vmem:[%s7895_s28 + $0x28] sm:$0xff] %vm1063_vm13, %v4813_v36 }
 0x391   : > { %v5344_v47 = vpop.f32.mrb[8].mxu1 }
 0x392   : > { %v4658_v12 = vadd.f32 %v5344_v47, %v7881_v0  ;;  %v4649_v51 = vpop.f32.mrb[9].mxu1 }
 0x393   : > { %v4650_v2 = vadd.f32 %v7881_v0, %v4649_v51  ;;  %v5345_v39 = vpop.f32.mrb[10].mxu1 }
 0x394   : > { %v4786_v3 = vadd.f32 %v4754_v21, %v4658_v12  ;;  %v4661_v35 = vadd.f32 %v5345_v39, %v7881_v0  ;;  %v4652_v40 = vpop.f32.mrb[11].mxu1  ;;  %v4764_v21 = vld [vmem:[%s5504_s23 + $0xa0] sm:$0xff] }
 0x395   : > { %v4784_v56 = vadd.f32 %v4752_v10, %v4650_v2  ;;  %v4653_v46 = vadd.f32 %v7881_v0, %v4652_v40  ;;  %v4767_v10 = vld [vmem:[%s5504_s23 + $0xb8] sm:$0xff] }
 0x396   : > { %v4818_v59 = vmax.f32 %v4786_v3, 0.0  ;;  %v4787_v61 = vadd.f32 %v4755_v53, %v4661_v35  ;;  %v4765_v3 = vld [vmem:[%s5504_s23 + $0xa8] sm:$0xff] }
 0x397   : > { %v4816_v52 = vmax.f32 %v4784_v56, 0.0  ;;  %v4785_v18 = vadd.f32 %v4753_v16, %v4653_v46 }
 0x398   : > { %4850 = vst.msk [vmem:[%s7895_s28 + $0x50] sm:$0xff] %vm1063_vm13, %v4818_v59  ;;  %v4819_v34 = vmax.f32 %v4787_v61, 0.0 }
 0x399   : > { %4848 = vst.msk [vmem:[%s7895_s28 + $0x40] sm:$0xff] %vm1063_vm13, %v4816_v52  ;;  %v4817_v60 = vmax.f32 %v4785_v18, 0.0 }
 0x39a   : > { %4851 = vst.msk [vmem:[%s7895_s28 + $0x58] sm:$0xff] %vm1063_vm13, %v4819_v34  ;;  %v4770_v34 = vld [vmem:[%s5504_s23 + $0xd0] sm:$0xff] }
 0x39b   : > { %4849 = vst.msk [vmem:[%s7895_s28 + $0x48] sm:$0xff] %vm1063_vm13, %v4817_v60 }
 0x3b1   : > { %v5348_v29 = vpop.f32.mrb[12].mxu1 }
 0x3b2   : > { %v4674_v15 = vadd.f32 %v5348_v29, %v7881_v0  ;;  %v4665_v41 = vpop.f32.mrb[13].mxu1 }
 0x3b3   : > { %v4666_v17 = vadd.f32 %v7881_v0, %v4665_v41  ;;  %v5349_v37 = vpop.f32.mrb[14].mxu1 }
 0x3b4   : > { %v4790_v32 = vadd.f32 %v4758_v55, %v4674_v15  ;;  %v4677_v33 = vadd.f32 %v5349_v37, %v7881_v0  ;;  %v4668_v8 = vpop.f32.mrb[15].mxu1  ;;  %v4768_v55 = vld [vmem:[%s5504_s23 + $0xc0] sm:$0xff] }
 0x3b5   : > { %v4788_v49 = vadd.f32 %v4756_v5, %v4666_v17  ;;  %v4669_v28 = vadd.f32 %v7881_v0, %v4668_v8  ;;  %v4771_v5 = vld [vmem:[%s5504_s23 + $0xd8] sm:$0xff] }
 0x3b6   : > { %v4822_v19 = vmax.f32 %v4790_v32, 0.0  ;;  %v4791_v13 = vadd.f32 %v4759_v11, %v4677_v33  ;;  %v4769_v32 = vld [vmem:[%s5504_s23 + $0xc8] sm:$0xff] }
 0x3b7   : > { %v4820_v1 = vmax.f32 %v4788_v49, 0.0  ;;  %v4789_v43 = vadd.f32 %v4757_v30, %v4669_v28 }
 0x3b8   : > { %4854 = vst.msk [vmem:[%s7895_s28 + $0x70] sm:$0xff] %vm1063_vm13, %v4822_v19  ;;  %v4823_v27 = vmax.f32 %v4791_v13, 0.0 }
 0x3b9   : > { %4852 = vst.msk [vmem:[%s7895_s28 + $0x60] sm:$0xff] %vm1063_vm13, %v4820_v1  ;;  %v4821_v24 = vmax.f32 %v4789_v43, 0.0 }
 0x3ba   : > { %4855 = vst.msk [vmem:[%s7895_s28 + $0x78] sm:$0xff] %vm1063_vm13, %v4823_v27  ;;  %v4774_v27 = vld [vmem:[%s5504_s23 + $0xf0] sm:$0xff] }
 0x3bb   : > { %4853 = vst.msk [vmem:[%s7895_s28 + $0x68] sm:$0xff] %vm1063_vm13, %v4821_v24 }
 0x3d0   : > { %v5352_v31 = vpop.f32.mrb[16].mxu1 }
 0x3d1   : > { %v4690_v42 = vadd.f32 %v5352_v31, %v7881_v0  ;;  %v4681_v45 = vpop.f32.mrb[17].mxu1 }
 0x3d2   : > { %v4682_v62 = vadd.f32 %v7881_v0, %v4681_v45  ;;  %v5353_v14 = vpop.f32.mrb[18].mxu1 }
 0x3d3   : > { %v4794_v50 = vadd.f32 %v4762_v23, %v4690_v42  ;;  %v4693_v44 = vadd.f32 %v5353_v14, %v7881_v0  ;;  %v4684_v26 = vpop.f32.mrb[19].mxu1  ;;  %v4772_v23 = vld [vmem:[%s5504_s23 + $0xe0] sm:$0xff] }
 0x3d4   : > { %v4792_v48 = vadd.f32 %v4760_v58, %v4682_v62  ;;  %v4685_v6 = vadd.f32 %v7881_v0, %v4684_v26  ;;  %v4775_v58 = vld [vmem:[%s5504_s23 + $0xf8] sm:$0xff] }
 0x3d5   : > { %v4826_v7 = vmax.f32 %v4794_v50, 0.0  ;;  %v4795_v63 = vadd.f32 %v4763_v9, %v4693_v44  ;;  %v4773_v50 = vld [vmem:[%s5504_s23 + $0xe8] sm:$0xff] }
 0x3d6   : > { %v4824_v20 = vmax.f32 %v4792_v48, 0.0  ;;  %v4793_v38 = vadd.f32 %v4761_v57, %v4685_v6 }
 0x3d7   : > { %4858 = vst.msk [vmem:[%s7895_s28 + $0x90] sm:$0xff] %vm1063_vm13, %v4826_v7  ;;  %v4827_v4 = vmax.f32 %v4795_v63, 0.0 }
 0x3d8   : > { %4856 = vst.msk [vmem:[%s7895_s28 + $0x80] sm:$0xff] %vm1063_vm13, %v4824_v20  ;;  %v4825_v22 = vmax.f32 %v4793_v38, 0.0 }
 0x3d9   : > { %4859 = vst.msk [vmem:[%s7895_s28 + $0x98] sm:$0xff] %vm1063_vm13, %v4827_v4 }
 0x3da   : > { %4857 = vst.msk [vmem:[%s7895_s28 + $0x88] sm:$0xff] %vm1063_vm13, %v4825_v22 }
 0x3e0   : > { %v5356_v54 = vpop.f32.mrb[20].mxu1 }
 0x3e1   : > { %v4706_v36 = vadd.f32 %v5356_v54, %v7881_v0  ;;  %v4697_v47 = vpop.f32.mrb[21].mxu1 }
 0x3e2   : > { %v4698_v12 = vadd.f32 %v7881_v0, %v4697_v47  ;;  %v5357_v51 = vpop.f32.mrb[22].mxu1 }
 0x3e3   : > { %v4798_v2 = vadd.f32 %v4766_v25, %v4706_v36  ;;  %v4709_v39 = vadd.f32 %v5357_v51, %v7881_v0  ;;  %v4700_v53 = vpop.f32.mrb[23].mxu1 }
 0x3e4   : > { %v4796_v35 = vadd.f32 %v4764_v21, %v4698_v12  ;;  %v4701_v40 = vadd.f32 %v7881_v0, %v4700_v53 }
 0x3e5   : > { %v4830_v16 = vmax.f32 %v4798_v2, 0.0  ;;  %v4799_v56 = vadd.f32 %v4767_v10, %v4709_v39 }
 0x3e6   : > { %v4828_v46 = vmax.f32 %v4796_v35, 0.0  ;;  %v4797_v59 = vadd.f32 %v4765_v3, %v4701_v40 }
 0x3e7   : > { %4862 = vst.msk [vmem:[%s7895_s28 + $0xb0] sm:$0xff] %vm1063_vm13, %v4830_v16  ;;  %v4831_v61 = vmax.f32 %v4799_v56, 0.0 }
 0x3e8   : > { %4860 = vst.msk [vmem:[%s7895_s28 + $0xa0] sm:$0xff] %vm1063_vm13, %v4828_v46  ;;  %v4829_v52 = vmax.f32 %v4797_v59, 0.0 }
 0x3e9   : > { %4863 = vst.msk [vmem:[%s7895_s28 + $0xb8] sm:$0xff] %vm1063_vm13, %v4831_v61 }
 0x3ea   : > { %4861 = vst.msk [vmem:[%s7895_s28 + $0xa8] sm:$0xff] %vm1063_vm13, %v4829_v52 }
 0x3f0   : > { %v5360_v18 = vpop.f32.mrb[24].mxu1 }
 0x3f1   : > { %v4722_v60 = vadd.f32 %v5360_v18, %v7881_v0  ;;  %v4713_v29 = vpop.f32.mrb[25].mxu1 }
 0x3f2   : > { %v4714_v15 = vadd.f32 %v7881_v0, %v4713_v29  ;;  %v5361_v41 = vpop.f32.mrb[26].mxu1 }
 0x3f3   : > { %v4802_v17 = vadd.f32 %v4770_v34, %v4722_v60  ;;  %v4725_v37 = vadd.f32 %v5361_v41, %v7881_v0  ;;  %v4716_v11 = vpop.f32.mrb[27].mxu1 }
 0x3f4   : > { %v4800_v33 = vadd.f32 %v4768_v55, %v4714_v15  ;;  %v4717_v8 = vadd.f32 %v7881_v0, %v4716_v11 }
 0x3f5   : > { %v4834_v30 = vmax.f32 %v4802_v17, 0.0  ;;  %v4803_v49 = vadd.f32 %v4771_v5, %v4725_v37 }
 0x3f6   : > { %v4832_v28 = vmax.f32 %v4800_v33, 0.0  ;;  %v4801_v19 = vadd.f32 %v4769_v32, %v4717_v8 }
 0x3f7   : > { %4866 = vst.msk [vmem:[%s7895_s28 + $0xd0] sm:$0xff] %vm1063_vm13, %v4834_v30  ;;  %v4835_v13 = vmax.f32 %v4803_v49, 0.0 }
 0x3f8   : > { %4864 = vst.msk [vmem:[%s7895_s28 + $0xc0] sm:$0xff] %vm1063_vm13, %v4832_v28  ;;  %v4833_v1 = vmax.f32 %v4801_v19, 0.0 }
 0x3f9   : > { %4867 = vst.msk [vmem:[%s7895_s28 + $0xd8] sm:$0xff] %vm1063_vm13, %v4835_v13 }
 0x3fa   : > { %4865 = vst.msk [vmem:[%s7895_s28 + $0xc8] sm:$0xff] %vm1063_vm13, %v4833_v1 }
 0x413   : > { %v5364_v43 = vpop.f32.mrb[28].mxu1 }
 0x414   : > { %v4738_v24 = vadd.f32 %v5364_v43, %v7881_v0  ;;  %v4729_v31 = vpop.f32.mrb[29].mxu1 }
 0x415   : > { %v4730_v42 = vadd.f32 %v7881_v0, %v4729_v31  ;;  %v5365_v45 = vpop.f32.mrb[30].mxu1 }
 0x416   : > { %v4806_v62 = vadd.f32 %v4774_v27, %v4738_v24  ;;  %v4741_v14 = vadd.f32 %v5365_v45, %v7881_v0  ;;  %v4732_v9 = vpop.f32.mrb[31].mxu1 }
 0x417   : > { %v4804_v44 = vadd.f32 %v4772_v23, %v4730_v42  ;;  %v4733_v26 = vadd.f32 %v7881_v0, %v4732_v9 }
 0x418   : > { %v4838_v57 = vmax.f32 %v4806_v62, 0.0  ;;  %v4807_v48 = vadd.f32 %v4775_v58, %v4741_v14 }
 0x419   : > { %v4836_v6 = vmax.f32 %v4804_v44, 0.0  ;;  %v4805_v7 = vadd.f32 %v4773_v50, %v4733_v26 }
 0x41a   : > { %4870 = vst.msk [vmem:[%s7895_s28 + $0xf0] sm:$0xff] %vm1063_vm13, %v4838_v57  ;;  %v4839_v63 = vmax.f32 %v4807_v48, 0.0 }
 0x41b   : > { %4868 = vst.msk [vmem:[%s7895_s28 + $0xe0] sm:$0xff] %vm1063_vm13, %v4836_v6  ;;  %v4837_v20 = vmax.f32 %v4805_v7, 0.0 }
 0x41c   : > { %4871 = vst.msk [vmem:[%s7895_s28 + $0xf8] sm:$0xff] %vm1063_vm13, %v4839_v63 }
 0x41d   : > { %4869 = vst.msk [vmem:[%s7895_s28 + $0xe8] sm:$0xff] %vm1063_vm13, %v4837_v20 }
 0x41e PF: > { %s15_s18 = sadd.s32 1, %s5431_s18  }
 0x41f   : > { %p12_p4 = scmp.ge.s32.totalorder %s15_s18, 4  }
 0x421   :  { %14 = sbr.rel (!%p12_p4) target bundleno = 1 (0x1), region = 72 }

</bundles_post_ra>
